<compile_context>
chip_gen: v5e
topology: v5e:2x2
jax: 0.10.0
libtpu: 0.0.40
codegen_flags: <defaults>
</compile_context>

<pallas_src>
import functools

import jax
import jax.numpy as jnp
from jax.experimental import pallas as pl
from jax.experimental.pallas import tpu as pltpu

HIDDEN = 32   # hidden_channels (asserted == 32 in the torch module)
IN_CH = 1     # in_channels (asserted == 1 in the torch module)
KSIZE = 3     # kernel_size
PAD = KSIZE // 2
CIN = IN_CH + HIDDEN          # 33, torch cat([x, h]) order
COUT = 4 * HIDDEN             # 128


def _round_up(n, m):
    return ((n + m - 1) // m) * m


def _convlstm_kernel(comb_ref, cprev_ref, w_ref, b_ref, out_ref, *, wpp, tr):
    # comb_ref : (1, Lp, 33)        zero-padded, flattened [x | h_prev] image
    # cprev_ref: (1, lblk, 32)      previous cell state for this row block
    # w_ref    : (3, 99, 128)       conv weights grouped per kh, rows = (kw, cin)
    # b_ref    : (1, 128)           conv bias
    # out_ref  : (1, lblk, 64)      [h_next | c_next] lane-concatenated
    lblk = tr * wpp
    cout = w_ref.shape[2]
    hc = cout // 4

    rb = pl.program_id(1)
    row0 = pl.multiple_of(rb * lblk, 8)   # sublane-aligned flat offset of this block

    # 3x3 SAME conv as 3 grouped matmuls (one per kernel row kh), K = 3*33 = 99.
    # Accumulate in registers; bias folded in once at the end.
    acc = None
    for kh in range(KSIZE):
        base = pl.multiple_of(row0 + kh * wpp, 8)
        taps = [comb_ref[0, pl.ds(base + kw, lblk), :] for kw in range(KSIZE)]
        op = jnp.concatenate(taps, axis=-1)                 # (lblk, 99)
        part = jnp.dot(op, w_ref[kh], preferred_element_type=jnp.float32)
        acc = part if acc is None else acc + part

    gates = acc + b_ref[...]                                # (lblk, 128) f32

    # torch split order: i, f, o, g (each 32 channels)
    s = jax.nn.sigmoid(gates[:, :3 * hc])                   # fused sigmoid over i,f,o
    g = jnp.tanh(gates[:, 3 * hc:])
    i_g = s[:, :hc]
    f_g = s[:, hc:2 * hc]
    o_g = s[:, 2 * hc:3 * hc]

    c_prev = cprev_ref[0]
    c_next = f_g * c_prev + i_g * g
    h_next = o_g * jnp.tanh(c_next)

    out_ref[0] = jnp.concatenate([h_next, c_next], axis=-1).astype(out_ref.dtype)


def conv_lstm_cell(x, hidden, weight_hwio, bias):
    """x: NCHW (B,1,H,W) or 5D (B,1,1,H,W); hidden=(h_prev,c_prev) NCHW (B,32,H,W)."""
    if x.ndim == 5:
        x = jnp.squeeze(x, axis=1)
    assert x.shape[1] == IN_CH
    h_prev, c_prev = hidden
    assert h_prev.shape[1] == HIDDEN

    B, _, H, W = x.shape
    Wpp = _round_up(W + 2 * PAD, 8)          # padded row stride, multiple of 8

    # Row-block selection: target ~512 sublanes per block, but keep >=4 grid
    # steps so the software pipeline and both v7x TensorCores stay busy.
    TR = max(1, min(H, max(1, 512 // Wpp)))
    while TR > 1 and B * (-(-H // TR)) < 4:
        TR = -(-TR // 2)
    nrb = -(-H // TR)
    Hp_out = nrb * TR                        # output rows rounded up; tail cropped
    lblk = TR * Wpp
    Lq = Hp_out * Wpp                        # flat output positions
    Lp = (Hp_out + 2 * PAD + 1) * Wpp        # padded flat input positions (+1 guard row)

    # ---- layout glue (plain JAX): NCHW -> NHWC, concat [x|h], zero-pad, flatten ----
    x_nhwc = jnp.transpose(x, (0, 2, 3, 1))                   # (B,H,W,1)
    h_nhwc = jnp.transpose(h_prev, (0, 2, 3, 1))              # (B,H,W,32)
    c_nhwc = jnp.transpose(c_prev, (0, 2, 3, 1))              # (B,H,W,32)
    comb = jnp.concatenate([x_nhwc, h_nhwc], axis=-1)         # (B,H,W,33), torch cat order
    comb_pad = jnp.pad(
        comb,
        ((0, 0), (PAD, Hp_out - H + PAD + 1), (PAD, Wpp - W - PAD), (0, 0)),
    ).reshape(B, Lp, CIN)
    # c_prev aligned with the (unshifted) output q-layout
    cpad = jnp.pad(
        c_nhwc, ((0, 0), (0, Hp_out - H), (0, Wpp - W), (0, 0))
    ).reshape(B, Lq, HIDDEN)

    # Group conv weights per kernel row: (kh, kw, cin, cout) -> (3, kw*cin, cout)
    w_grp = weight_hwio.reshape(KSIZE, KSIZE * CIN, COUT)     # (3, 99, 128)
    bias2 = bias.reshape(1, COUT)

    kernel = functools.partial(_convlstm_kernel, wpp=Wpp, tr=TR)

    # VMEM budget: double-buffered blocks, minor dims padded to 128 lanes.
    f32 = 4
    blk_bytes = f32 * 128 * (Lp + 2 * lblk + KSIZE * _round_up(KSIZE * CIN, 8) + 8)
    vmem_limit = int(min(max(32 * 1024 * 1024, 3 * blk_bytes), 64 * 1024 * 1024))

    cost = pl.CostEstimate(
        flops=int(2 * B * Lq * KSIZE * KSIZE * CIN * COUT),
        transcendentals=int(5 * HIDDEN * B * Lq),
        bytes_accessed=int(f32 * (B * Lp * CIN + B * Lq * HIDDEN
                                  + B * Lq * 2 * HIDDEN
                                  + KSIZE * KSIZE * CIN * COUT + COUT)),
    )

    out = pl.pallas_call(
        kernel,
        out_shape=jax.ShapeDtypeStruct((B, Lq, 2 * HIDDEN), x.dtype),
        grid_spec=pltpu.PrefetchScalarGridSpec(
            num_scalar_prefetch=0,
            grid=(B, nrb),
            in_specs=[
                pl.BlockSpec((1, Lp, CIN), lambda b, r: (b, 0, 0)),
                pl.BlockSpec((1, lblk, HIDDEN), lambda b, r: (b, r, 0)),
                pl.BlockSpec((KSIZE, KSIZE * CIN, COUT), lambda b, r: (0, 0, 0)),
                pl.BlockSpec((1, COUT), lambda b, r: (0, 0)),
            ],
            out_specs=pl.BlockSpec((1, lblk, 2 * HIDDEN), lambda b, r: (b, r, 0)),
        ),
        compiler_params=pltpu.CompilerParams(
            dimension_semantics=("parallel", "parallel"),
            vmem_limit_bytes=vmem_limit),
        cost_estimate=cost,
    )(comb_pad, cpad, w_grp, bias2)

    # crop padded columns / tail rows and go back to NCHW
    out = out.reshape(B, Hp_out, Wpp, 2 * HIDDEN)[:, :H, :W, :]
    h_next = jnp.transpose(out[..., :HIDDEN], (0, 3, 1, 2))
    c_next = jnp.transpose(out[..., HIDDEN:], (0, 3, 1, 2))
    return h_next, c_next


def _reference(x, hidden, weight_hwio, bias):
    """Pure-JAX reference matching the PyTorch forward semantics."""
    if x.ndim == 5:
        x = jnp.squeeze(x, axis=1)
    h_prev, c_prev = hidden
    x_nhwc = jnp.transpose(x, (0, 2, 3, 1))
    h_nhwc = jnp.transpose(h_prev, (0, 2, 3, 1))
    c_nhwc = jnp.transpose(c_prev, (0, 2, 3, 1))
    comb = jnp.concatenate([x_nhwc, h_nhwc], axis=-1)
    gates = jax.lax.conv_general_dilated(
        comb, weight_hwio, window_strides=(1, 1), padding="SAME",
        dimension_numbers=("NHWC", "HWIO", "NHWC")) + bias
    hc = HIDDEN
    i = jax.nn.sigmoid(gates[..., 0:hc])
    f = jax.nn.sigmoid(gates[..., hc:2 * hc])
    o = jax.nn.sigmoid(gates[..., 2 * hc:3 * hc])
    g = jnp.tanh(gates[..., 3 * hc:4 * hc])
    c_next = f * c_nhwc + i * g
    h_next = o * jnp.tanh(c_next)
    return (jnp.transpose(h_next, (0, 3, 1, 2)),
            jnp.transpose(c_next, (0, 3, 1, 2)))


if __name__ == "__main__":
    B, H, W = 2, 16, 16

    key = jax.random.PRNGKey(0)
    kx, kh, kc, kw, kb = jax.random.split(key, 5)

    # deterministic synthetic parameters (conv: HWIO layout == torch OIHW transposed)
    fan_in = CIN * KSIZE * KSIZE
    weight = jax.random.normal(kw, (KSIZE, KSIZE, CIN, COUT), jnp.float32) / jnp.sqrt(fan_in)
    bias = 0.01 * jax.random.normal(kb, (COUT,), jnp.float32)

    # inputs: x is the 5D path of the torch forward (B,1,1,H,W) -> squeeze(1)
    x = jax.random.normal(kx, (B, 1, IN_CH, H, W), jnp.float32)
    h0 = jax.random.normal(kh, (B, HIDDEN, H, W), jnp.float32)
    c0 = jax.random.normal(kc, (B, HIDDEN, H, W), jnp.float32)

    h_next, c_next = conv_lstm_cell(x, (h0, c0), weight, bias)
    jax.block_until_ready((h_next, c_next))

    h_ref, c_ref = _reference(x, (h0, c0), weight, bias)
    assert h_next.shape == (B, HIDDEN, H, W) and c_next.shape == (B, HIDDEN, H, W)
    assert jnp.allclose(h_next, h_ref, atol=2e-5, rtol=1e-5)
    assert jnp.allclose(c_next, c_ref, atol=2e-5, rtol=1e-5)

    print("KERNEL_OK")
</pallas_src>

<mosaic_0001>
module attributes {stable_mosaic.version = 11 : i64} {
  func.func @_convlstm_kernel(%arg0: i32, %arg1: i32, %arg2: memref<1x456x33xf32, #tpu.memory_space<vmem>>, %arg3: memref<1x192x32xf32, #tpu.memory_space<vmem>>, %arg4: memref<3x99x128xf32, #tpu.memory_space<vmem>>, %arg5: memref<1x128xf32, #tpu.memory_space<vmem>>, %arg6: memref<1x192x64xf32, #tpu.memory_space<vmem>>) attributes {dimension_semantics = [#tpu.dimension_semantics<parallel>, #tpu.dimension_semantics<parallel>], iteration_bounds = array<i64: 2, 2>, scalar_prefetch = 0 : i64, scratch_operands = 0 : i64, tpu.core_type = #tpu.core_type<tc>, window_params = [{transform_indices = @transform_0, window_bounds = array<i64: 1, 456, 33>}, {transform_indices = @transform_1, window_bounds = array<i64: 1, 192, 32>}, {pipeline_mode = #tpu.pipeline_mode<synchronous>, transform_indices = @transform_2, window_bounds = array<i64: 3, 99, 128>}, {pipeline_mode = #tpu.pipeline_mode<synchronous>, transform_indices = @transform_3, window_bounds = array<i64: 1, 128>}, {transform_indices = @transform_4, window_bounds = array<i64: 1, 192, 64>}]} {
    %c192_i32 = arith.constant 192 : i32
    %0 = arith.muli %arg1, %c192_i32 : i32
    %1 = tpu.assume_multiple %0, 8 : i32
    %c0_i32 = arith.constant 0 : i32
    %2 = arith.addi %1, %c0_i32 : i32
    %3 = tpu.assume_multiple %2, 8 : i32
    %c0_i32_0 = arith.constant 0 : i32
    %4 = arith.addi %3, %c0_i32_0 : i32
    %c0 = arith.constant 0 : index
    %5 = arith.index_cast %4 : i32 to index
    %c0_1 = arith.constant 0 : index
    %6 = vector.load %arg2[%c0, %5, %c0_1] : memref<1x456x33xf32, #tpu.memory_space<vmem>>, vector<1x192x33xf32>
    %7 = vector.shape_cast %6 : vector<1x192x33xf32> to vector<192x33xf32>
    %c1_i32 = arith.constant 1 : i32
    %8 = arith.addi %3, %c1_i32 : i32
    %c0_2 = arith.constant 0 : index
    %9 = arith.index_cast %8 : i32 to index
    %c0_3 = arith.constant 0 : index
    %10 = vector.load %arg2[%c0_2, %9, %c0_3] : memref<1x456x33xf32, #tpu.memory_space<vmem>>, vector<1x192x33xf32>
    %11 = vector.shape_cast %10 : vector<1x192x33xf32> to vector<192x33xf32>
    %c2_i32 = arith.constant 2 : i32
    %12 = arith.addi %3, %c2_i32 : i32
    %c0_4 = arith.constant 0 : index
    %13 = arith.index_cast %12 : i32 to index
    %c0_5 = arith.constant 0 : index
    %14 = vector.load %arg2[%c0_4, %13, %c0_5] : memref<1x456x33xf32, #tpu.memory_space<vmem>>, vector<1x192x33xf32>
    %15 = vector.shape_cast %14 : vector<1x192x33xf32> to vector<192x33xf32>
    %16 = tpu.concatenate %7, %11, %15 in 1 : vector<192x33xf32>, vector<192x33xf32>, vector<192x33xf32> -> vector<192x99xf32>
    %c0_6 = arith.constant 0 : index
    %c0_7 = arith.constant 0 : index
    %c0_8 = arith.constant 0 : index
    %17 = vector.load %arg4[%c0_6, %c0_7, %c0_8] : memref<3x99x128xf32, #tpu.memory_space<vmem>>, vector<1x99x128xf32>
    %18 = vector.shape_cast %17 : vector<1x99x128xf32> to vector<99x128xf32>
    %cst = arith.constant dense<0.000000e+00> : vector<192x128xf32>
    %19 = tpu.matmul %16, %18, %cst {dimension_numbers = #tpu.dot_dimension_numbers<[1], [0], [0], [1], [0, 0, 1, 1], [], []>} : vector<192x99xf32>, vector<99x128xf32>, vector<192x128xf32> -> vector<192x128xf32>
    %c24_i32 = arith.constant 24 : i32
    %20 = arith.addi %1, %c24_i32 : i32
    %21 = tpu.assume_multiple %20, 8 : i32
    %c0_i32_9 = arith.constant 0 : i32
    %22 = arith.addi %21, %c0_i32_9 : i32
    %c0_10 = arith.constant 0 : index
    %23 = arith.index_cast %22 : i32 to index
    %c0_11 = arith.constant 0 : index
    %24 = vector.load %arg2[%c0_10, %23, %c0_11] : memref<1x456x33xf32, #tpu.memory_space<vmem>>, vector<1x192x33xf32>
    %25 = vector.shape_cast %24 : vector<1x192x33xf32> to vector<192x33xf32>
    %c1_i32_12 = arith.constant 1 : i32
    %26 = arith.addi %21, %c1_i32_12 : i32
    %c0_13 = arith.constant 0 : index
    %27 = arith.index_cast %26 : i32 to index
    %c0_14 = arith.constant 0 : index
    %28 = vector.load %arg2[%c0_13, %27, %c0_14] : memref<1x456x33xf32, #tpu.memory_space<vmem>>, vector<1x192x33xf32>
    %29 = vector.shape_cast %28 : vector<1x192x33xf32> to vector<192x33xf32>
    %c2_i32_15 = arith.constant 2 : i32
    %30 = arith.addi %21, %c2_i32_15 : i32
    %c0_16 = arith.constant 0 : index
    %31 = arith.index_cast %30 : i32 to index
    %c0_17 = arith.constant 0 : index
    %32 = vector.load %arg2[%c0_16, %31, %c0_17] : memref<1x456x33xf32, #tpu.memory_space<vmem>>, vector<1x192x33xf32>
    %33 = vector.shape_cast %32 : vector<1x192x33xf32> to vector<192x33xf32>
    %34 = tpu.concatenate %25, %29, %33 in 1 : vector<192x33xf32>, vector<192x33xf32>, vector<192x33xf32> -> vector<192x99xf32>
    %c1 = arith.constant 1 : index
    %c0_18 = arith.constant 0 : index
    %c0_19 = arith.constant 0 : index
    %35 = vector.load %arg4[%c1, %c0_18, %c0_19] : memref<3x99x128xf32, #tpu.memory_space<vmem>>, vector<1x99x128xf32>
    %36 = vector.shape_cast %35 : vector<1x99x128xf32> to vector<99x128xf32>
    %cst_20 = arith.constant dense<0.000000e+00> : vector<192x128xf32>
    %37 = tpu.matmul %34, %36, %cst_20 {dimension_numbers = #tpu.dot_dimension_numbers<[1], [0], [0], [1], [0, 0, 1, 1], [], []>} : vector<192x99xf32>, vector<99x128xf32>, vector<192x128xf32> -> vector<192x128xf32>
    %38 = arith.addf %19, %37 : vector<192x128xf32>
    %c48_i32 = arith.constant 48 : i32
    %39 = arith.addi %1, %c48_i32 : i32
    %40 = tpu.assume_multiple %39, 8 : i32
    %c0_i32_21 = arith.constant 0 : i32
    %41 = arith.addi %40, %c0_i32_21 : i32
    %c0_22 = arith.constant 0 : index
    %42 = arith.index_cast %41 : i32 to index
    %c0_23 = arith.constant 0 : index
    %43 = vector.load %arg2[%c0_22, %42, %c0_23] : memref<1x456x33xf32, #tpu.memory_space<vmem>>, vector<1x192x33xf32>
    %44 = vector.shape_cast %43 : vector<1x192x33xf32> to vector<192x33xf32>
    %c1_i32_24 = arith.constant 1 : i32
    %45 = arith.addi %40, %c1_i32_24 : i32
    %c0_25 = arith.constant 0 : index
    %46 = arith.index_cast %45 : i32 to index
    %c0_26 = arith.constant 0 : index
    %47 = vector.load %arg2[%c0_25, %46, %c0_26] : memref<1x456x33xf32, #tpu.memory_space<vmem>>, vector<1x192x33xf32>
    %48 = vector.shape_cast %47 : vector<1x192x33xf32> to vector<192x33xf32>
    %c2_i32_27 = arith.constant 2 : i32
    %49 = arith.addi %40, %c2_i32_27 : i32
    %c0_28 = arith.constant 0 : index
    %50 = arith.index_cast %49 : i32 to index
    %c0_29 = arith.constant 0 : index
    %51 = vector.load %arg2[%c0_28, %50, %c0_29] : memref<1x456x33xf32, #tpu.memory_space<vmem>>, vector<1x192x33xf32>
    %52 = vector.shape_cast %51 : vector<1x192x33xf32> to vector<192x33xf32>
    %53 = tpu.concatenate %44, %48, %52 in 1 : vector<192x33xf32>, vector<192x33xf32>, vector<192x33xf32> -> vector<192x99xf32>
    %c2 = arith.constant 2 : index
    %c0_30 = arith.constant 0 : index
    %c0_31 = arith.constant 0 : index
    %54 = vector.load %arg4[%c2, %c0_30, %c0_31] : memref<3x99x128xf32, #tpu.memory_space<vmem>>, vector<1x99x128xf32>
    %55 = vector.shape_cast %54 : vector<1x99x128xf32> to vector<99x128xf32>
    %cst_32 = arith.constant dense<0.000000e+00> : vector<192x128xf32>
    %56 = tpu.matmul %53, %55, %cst_32 {dimension_numbers = #tpu.dot_dimension_numbers<[1], [0], [0], [1], [0, 0, 1, 1], [], []>} : vector<192x99xf32>, vector<99x128xf32>, vector<192x128xf32> -> vector<192x128xf32>
    %57 = arith.addf %38, %56 : vector<192x128xf32>
    %c0_33 = arith.constant 0 : index
    %c0_34 = arith.constant 0 : index
    %58 = vector.load %arg5[%c0_33, %c0_34] : memref<1x128xf32, #tpu.memory_space<vmem>>, vector<1x128xf32>
    %59 = vector.broadcast %58 : vector<1x128xf32> to vector<192x128xf32>
    %60 = arith.addf %57, %59 : vector<192x128xf32>
    %61 = vector.extract_strided_slice %60 {offsets = [0, 0], sizes = [192, 96], strides = [1, 1]} : vector<192x128xf32> to vector<192x96xf32>
    %62 = arith.negf %61 : vector<192x96xf32>
    %63 = math.exp %62 : vector<192x96xf32>
    %cst_35 = arith.constant 1.000000e+00 : f32
    %64 = vector.broadcast %cst_35 : f32 to vector<192x96xf32>
    %65 = arith.addf %64, %63 : vector<192x96xf32>
    %66 = arith.divf %64, %65 : vector<192x96xf32>
    %67 = vector.extract_strided_slice %60 {offsets = [0, 96], sizes = [192, 32], strides = [1, 1]} : vector<192x128xf32> to vector<192x32xf32>
    %68 = math.tanh %67 : vector<192x32xf32>
    %69 = vector.extract_strided_slice %66 {offsets = [0, 0], sizes = [192, 32], strides = [1, 1]} : vector<192x96xf32> to vector<192x32xf32>
    %70 = vector.extract_strided_slice %66 {offsets = [0, 32], sizes = [192, 32], strides = [1, 1]} : vector<192x96xf32> to vector<192x32xf32>
    %71 = vector.extract_strided_slice %66 {offsets = [0, 64], sizes = [192, 32], strides = [1, 1]} : vector<192x96xf32> to vector<192x32xf32>
    %c0_36 = arith.constant 0 : index
    %c0_37 = arith.constant 0 : index
    %c0_38 = arith.constant 0 : index
    %72 = vector.load %arg3[%c0_36, %c0_37, %c0_38] : memref<1x192x32xf32, #tpu.memory_space<vmem>>, vector<1x192x32xf32>
    %73 = vector.shape_cast %72 : vector<1x192x32xf32> to vector<192x32xf32>
    %74 = arith.mulf %70, %73 : vector<192x32xf32>
    %75 = arith.mulf %69, %68 : vector<192x32xf32>
    %76 = arith.addf %74, %75 : vector<192x32xf32>
    %77 = math.tanh %76 : vector<192x32xf32>
    %78 = arith.mulf %71, %77 : vector<192x32xf32>
    %79 = tpu.concatenate %78, %76 in 1 : vector<192x32xf32>, vector<192x32xf32> -> vector<192x64xf32>
    %c0_39 = arith.constant 0 : index
    %c0_40 = arith.constant 0 : index
    %c0_41 = arith.constant 0 : index
    %80 = vector.load %arg6[%c0_39, %c0_40, %c0_41] : memref<1x192x64xf32, #tpu.memory_space<vmem>>, vector<1x192x64xf32>
    %81 = vector.shape_cast %80 : vector<1x192x64xf32> to vector<192x64xf32>
    %82 = vector.shape_cast %79 : vector<192x64xf32> to vector<1x192x64xf32>
    tpu.vector_store %arg6[%c0_39, %c0_40, %c0_41], %82 {strides = array<i32>} : memref<1x192x64xf32, #tpu.memory_space<vmem>>, vector<1x192x64xf32>,
    return
  }
  func.func @transform_0(%arg0: i32, %arg1: i32) -> (i32, i32, i32) {
    %c0_i32 = arith.constant 0 : i32
    %c0_i32_0 = arith.constant 0 : i32
    %c0_i32_1 = arith.constant 0 : i32
    return %arg0, %c0_i32, %c0_i32_0 : i32, i32, i32
  }
  func.func @transform_1(%arg0: i32, %arg1: i32) -> (i32, i32, i32) {
    %c0_i32 = arith.constant 0 : i32
    %c0_i32_0 = arith.constant 0 : i32
    return %arg0, %arg1, %c0_i32 : i32, i32, i32
  }
  func.func @transform_2(%arg0: i32, %arg1: i32) -> (i32, i32, i32) {
    %c0_i32 = arith.constant 0 : i32
    %c0_i32_0 = arith.constant 0 : i32
    %c0_i32_1 = arith.constant 0 : i32
    %c0_i32_2 = arith.constant 0 : i32
    return %c0_i32, %c0_i32_0, %c0_i32_1 : i32, i32, i32
  }
  func.func @transform_3(%arg0: i32, %arg1: i32) -> (i32, i32) {
    %c0_i32 = arith.constant 0 : i32
    %c0_i32_0 = arith.constant 0 : i32
    %c0_i32_1 = arith.constant 0 : i32
    return %c0_i32, %c0_i32_0 : i32, i32
  }
  func.func @transform_4(%arg0: i32, %arg1: i32) -> (i32, i32, i32) {
    %c0_i32 = arith.constant 0 : i32
    %c0_i32_0 = arith.constant 0 : i32
    return %arg0, %arg1, %c0_i32 : i32, i32, i32
  }
}

</mosaic_0001>

<bundles_post_ra>
// kernel: tpu_custom_call.1
= control target key start
LH: loop header
LB: loop body
LE: loop exit
PB: predicated region body
PF: predicated region fallthrough
CT: control target
= control target key end

     0   :  { %s3756_s15 = smov 0   ;;  %s3758_s16 = smov 0   ;;  %s6247_s0 = inlined_call_operand.vmem [shape: f32[2,456,33], index: 0, kind: input, shape index: {}]   ;;  %s6248_s1 = inlined_call_operand.vmem [shape: f32[2,384,32], index: 1, kind: input, shape index: {}]   ;;  %s6249_s2 = inlined_call_operand.vmem [shape: f32[3,99,128], index: 2, kind: input, shape index: {}]   ;;  %s6250_s3 = inlined_call_operand.vmem [shape: f32[1,128], index: 3, kind: input, shape index: {}]   ;;  %s6251_s4 = inlined_call_operand.vmem [shape: f32[2,384,64], index: 4, kind: output, shape index: {}]  }
   0x1   :  { %s3760_s17 = smov 0   ;;  %s3762_s18 = smov 0  }
   0x2   :  { %s3764_s19 = smov 0  }
   0x3 LB: > { %s23_s20 = sadd.s32 1, %s3717_s17  ;;  %s26_s21 = sadd.s32 1, %s3721_s18  ;;  %s3725_s19 = sphi %s3764_s19, %s14_s19   ;;  %s3721_s18 = sphi %s3762_s18, %s6403_s18   ;;  %s3717_s17 = sphi %s3760_s17, %s6402_s17   ;;  %s3713_s16 = sphi %s3758_s16, %s6401_s16   ;;  %s3709_s15 = sphi %s3756_s15, %s6400_s15  }
   0x4   : > { %p24_p0 = scmp.ge.s32.totalorder %s23_s20, 2  ;;  %p3086_p1 = scmp.ge.s32.totalorder %s3725_s19, 1 }
   0x5   : > { %p193_p2 = scmp.lt.s32.totalorder %s3725_s19, 5 }
   0x6   : > { %s6405_s20 = smov (%p24_p0, %s23_s20), 0  ;;  %s6407_s21 = smov (!%p24_p0, %s26_s21), %s3721_s18 }
   0x7   : > { %p194_p3 = pnand %p3086_p1, %p193_p2  ;;  %p28_p4 = scmp.ge.s32.totalorder %s6407_s21, 2 }
   0x9   : > { %s6409_s21 = smov (%p28_p4, %s6407_s21), 0  ;;  %197 = sbr.rel (%p194_p3) target bundleno = 1174 (0x496), region = 36 }
   0xe   : > { %p232_p5 = scmp.lt.s32.totalorder %s3713_s16, 1  ;;  %s257_s22 = smul.u32 192, %s3709_s15  ;;  %v4040_v57 = vld [vmem:[%s6249_s2 + $0x60] sm:$0x7]  ;;  %vm995_vm0 = vcmask 1042432   ;;  %v4047_v58 = vld [vmem:[%s6249_s2 + $0x58] sm:$0xff] }
   0xf   : > { %s3727_s28 = smov 33   ;;  %s3728_s29 = smov 66   ;;  %3248 = vmatpush.msk.msra.mxu1 %vm995_vm0, %v4040_v57  ;;  %v4053_v59 = vld [vmem:[%s6249_s2 + $0x50] sm:$0xff]  ;;  %v4065_v60 = vld [vmem:[%s6249_s2 + $0x48] sm:$0xff]  ;;  %vm527_vm1 = vcmask 269312   ;;  %vm922_vm2 = vcmask 809984  }
  0x10   : > { %s6411_s16 = smov (!%p232_p5, %s3713_s16), 1  ;;  %6282 = vst [vmem:[#allocation10_spill] sm:$0xff] %v4065_v60  ;;  %vm552_vm3 = vcmask 539648   ;;  %s3729_s5 = smov 32  }
  0x11   : > { %s3448_s23 = smul.u32 456, %s6411_s16  ;;  %1167 = vmatpush.msra.mxu1 %v4047_v58 }
  0x13   : > { %s236_s26 = scalar_lea.vmem %s6247_s0, %s3448_s23  ;;  %1168 = vmatpush.msra.mxu1 %v4053_v59 }
  0x14   : > { %s3795_s27 = scalar_lea.vmem %s236_s26, %s257_s22 }
  0x15   : > { %v3798_v0 = vld [vmem:[%s3795_s27 + $0x21] sm:$0xff]  ;;  %v3092_v1 = vld [vmem:[%s3795_s27 + $0x11] sm:$0xff]  ;;  %v3807_v3 = vld [vmem:[%s3795_s27 + $0x29] sm:$0xff]  ;;  %1169 = vmatpush.msra.mxu1 %v4065_v60 }
  0x16   : > { %v3090_v2 = vld [vmem:[%s3795_s27 + $0x1] sm:$0xff]  ;;  %367 = vrot.lane.b32.xlu2 %v3798_v0, %s3727_s28  ;;  %363 = vrot.lane.b32.xlu1 %v3092_v1, %s3727_s28  ;;  %v3810_v4 = vld [vmem:[%s3795_s27 + $0x19] sm:$0xff] }
  0x17   : > { %359 = vrot.lane.b32.xlu0 %v3090_v2, %s3727_s28  ;;  %v3091_v5 = vld [vmem:[%s3795_s27 + $0x9] sm:$0xff]  ;;  %v3819_v6 = vld [vmem:[%s3795_s27 + $0x41] sm:$0xff]  ;;  %v3822_v7 = vld [vmem:[%s3795_s27 + $0x39] sm:$0xff] }
  0x18   : > { %v3825_v8 = vld [vmem:[%s3795_s27 + $0x31] sm:$0xff]  ;;  %v3834_v9 = vld [vmem:[%s3795_s27 + $0x59] sm:$0xff]  ;;  %v3840_v11 = vld [vmem:[%s3795_s27 + $0x49] sm:$0xff] }
  0x19   : > { %v3837_v10 = vld [vmem:[%s3795_s27 + $0x51] sm:$0xff]  ;;  %v3852_v13 = vld [vmem:[%s3795_s27 + $0x69] sm:$0xff]  ;;  %v3855_v14 = vld [vmem:[%s3795_s27 + $0x61] sm:$0xff] }
  0x1a   : > { %v3849_v12 = vld [vmem:[%s3795_s27 + $0x71] sm:$0xff]  ;;  %v3864_v15 = vld [vmem:[%s3795_s27 + $0x89] sm:$0xff]  ;;  %v3867_v16 = vld [vmem:[%s3795_s27 + $0x81] sm:$0xff] }
  0x1b   : > { %6274 = vst [vmem:[#allocation2_spill] sm:$0xff] %v3864_v15  ;;  %v3870_v17 = vld [vmem:[%s3795_s27 + $0x79] sm:$0xff]  ;;  %v3879_v18 = vld [vmem:[%s3795_s27 + $0xa1] sm:$0xff]  ;;  %v3885_v20 = vld [vmem:[%s3795_s27 + $0x91] sm:$0xff] }
  0x1c   : > { %6275 = vst [vmem:[#allocation3_spill] sm:$0xff] %v3879_v18  ;;  %v3882_v19 = vld [vmem:[%s3795_s27 + $0x99] sm:$0xff]  ;;  %v3897_v22 = vld [vmem:[%s3795_s27 + $0xb1] sm:$0xff]  ;;  %v3900_v23 = vld [vmem:[%s3795_s27 + $0xa9] sm:$0xff] }
  0x1d   : > { %6276 = vst [vmem:[#allocation4_spill] sm:$0xff] %v3882_v19  ;;  %v3894_v21 = vld [vmem:[%s3795_s27 + $0xb9] sm:$0xff]  ;;  %v3115_v25 = vld [vmem:[%s3795_s27 + $0xa] sm:$0xff]  ;;  %v3114_v26 = vld [vmem:[%s3795_s27 + $0x2] sm:$0xff] }
  0x1e   : > { %369 = vrot.lane.b32.xlu2 %v3807_v3, %s3727_s28  ;;  %365 = vrot.lane.b32.xlu1 %v3810_v4, %s3727_s28  ;;  %6277 = vst [vmem:[#allocation5_spill] sm:$0xff] %v3885_v20  ;;  %v3116_v24 = vld [vmem:[%s3795_s27 + $0x12] sm:$0xff]  ;;  %v3915_v27 = vld [vmem:[%s3795_s27 + $0x2a] sm:$0xff] }
  0x1f   : > { %361 = vrot.lane.b32.xlu0 %v3091_v5, %s3727_s28  ;;  %6278 = vst [vmem:[#allocation6_spill] sm:$0xff] %v3894_v21  ;;  %v3918_v28 = vld [vmem:[%s3795_s27 + $0x22] sm:$0xff]  ;;  %v3921_v29 = vld [vmem:[%s3795_s27 + $0x1a] sm:$0xff]  ;;  %v3936_v32 = vld [vmem:[%s3795_s27 + $0x32] sm:$0xff] }
  0x20   : > { %6279 = vst [vmem:[#allocation7_spill] sm:$0xff] %v3897_v22  ;;  %v3930_v30 = vld [vmem:[%s3795_s27 + $0x42] sm:$0xff]  ;;  %v3933_v31 = vld [vmem:[%s3795_s27 + $0x3a] sm:$0xff]  ;;  %v3948_v34 = vld [vmem:[%s3795_s27 + $0x52] sm:$0xff] }
  0x21   : > { %6280 = vst [vmem:[#allocation8_spill] sm:$0xff] %v3900_v23  ;;  %v3945_v33 = vld [vmem:[%s3795_s27 + $0x5a] sm:$0xff]  ;;  %v3951_v35 = vld [vmem:[%s3795_s27 + $0x4a] sm:$0xff]  ;;  %v3962_v37 = vld [vmem:[%s3795_s27 + $0x72] sm:$0xff] }
  0x22   : > { %v3965_v38 = vld [vmem:[%s3795_s27 + $0x6a] sm:$0xff]  ;;  %v3968_v39 = vld [vmem:[%s3795_s27 + $0x62] sm:$0xff]  ;;  %v3985_v43 = vld [vmem:[%s3795_s27 + $0x7a] sm:$0xff] }
  0x23   : > { %v3979_v41 = vld [vmem:[%s3795_s27 + $0x8a] sm:$0xff]  ;;  %v3982_v42 = vld [vmem:[%s3795_s27 + $0x82] sm:$0xff]  ;;  %v3999_v46 = vld [vmem:[%s3795_s27 + $0x9a] sm:$0xff] }
  0x24   : > { %6281 = vst [vmem:[#allocation9_spill] sm:$0xff] %v3979_v41  ;;  %v3996_v45 = vld [vmem:[%s3795_s27 + $0xa2] sm:$0xff]  ;;  %v4002_v47 = vld [vmem:[%s3795_s27 + $0x92] sm:$0xff]  ;;  %v4017_v51 = vld [vmem:[%s3795_s27 + $0xba] sm:$0xff] }
  0x25   : > { %v4020_v52 = vld [vmem:[%s3795_s27 + $0xb2] sm:$0xff]  ;;  %v4023_v53 = vld [vmem:[%s3795_s27 + $0xaa] sm:$0xff] }
  0x26   : > { %375 = vrot.lane.b32.xlu2 %v3819_v6, %s3727_s28  ;;  %373 = vrot.lane.b32.xlu1 %v3822_v7, %s3727_s28  ;;  %v4082_v1 = vld [vmem:[%s6249_s2 + $0x38] sm:$0xff]  ;;  %v4088_v2 = vld [vmem:[%s6249_s2 + $0x30] sm:$0xff] }
  0x27   : > { %371 = vrot.lane.b32.xlu0 %v3825_v8, %s3727_s28  ;;  %6285 = vst [vmem:[#allocation13_spill] sm:$0xff] %v4082_v1  ;;  %v261_v60 = vld [vmem:[%s3795_s27 + $0x10] sm:$0xff] }
  0x28   : > { %6286 = vst [vmem:[#allocation14_spill] sm:$0xff] %v4088_v2 }
  0x2e   : > { %381 = vrot.lane.b32.xlu2 %v3834_v9, %s3727_s28  ;;  %379 = vrot.lane.b32.xlu1 %v3837_v10, %s3727_s28 }
  0x2f   : > { %377 = vrot.lane.b32.xlu0 %v3840_v11, %s3727_s28 }
  0x36   : > { %387 = vrot.lane.b32.xlu2 %v3849_v12, %s3727_s28  ;;  %385 = vrot.lane.b32.xlu1 %v3852_v13, %s3727_s28 }
  0x37   : > { %383 = vrot.lane.b32.xlu0 %v3855_v14, %s3727_s28 }
  0x3e   : > { %393 = vrot.lane.b32.xlu2 %v3864_v15, %s3727_s28  ;;  %391 = vrot.lane.b32.xlu1 %v3867_v16, %s3727_s28 }
  0x3f   : > { %389 = vrot.lane.b32.xlu0 %v3870_v17, %s3727_s28 }
  0x46   : > { %399 = vrot.lane.b32.xlu2 %v3879_v18, %s3727_s28  ;;  %397 = vrot.lane.b32.xlu1 %v3882_v19, %s3727_s28 }
  0x47   : > { %395 = vrot.lane.b32.xlu0 %v3885_v20, %s3727_s28 }
  0x4e   : > { %405 = vrot.lane.b32.xlu2 %v3894_v21, %s3727_s28  ;;  %403 = vrot.lane.b32.xlu1 %v3897_v22, %s3727_s28 }
  0x4f   : > { %401 = vrot.lane.b32.xlu0 %v3900_v23, %s3727_s28 }
  0x56   : > { %459 = vrot.lane.b32.xlu2 %v3116_v24, %s3728_s29  ;;  %457 = vrot.lane.b32.xlu1 %v3115_v25, %s3728_s29  ;;  %v4113_v25 = vld [vmem:[%s6249_s2 + $0x20] sm:$0xff] }
  0x57   : > { %455 = vrot.lane.b32.xlu0 %v3114_v26, %s3728_s29  ;;  %6289 = vst [vmem:[#allocation17_spill] sm:$0xff] %v4113_v25  ;;  %v4118_v26 = vld [vmem:[%s6249_s2 + $0x18] sm:$0xff] }
  0x58   : > { %6290 = vst [vmem:[#allocation18_spill] sm:$0xff] %v4118_v26 }
  0x5e   : > { %465 = vrot.lane.b32.xlu2 %v3915_v27, %s3728_s29  ;;  %463 = vrot.lane.b32.xlu1 %v3918_v28, %s3728_s29 }
  0x5f   : > { %461 = vrot.lane.b32.xlu0 %v3921_v29, %s3728_s29 }
  0x66   : > { %471 = vrot.lane.b32.xlu2 %v3930_v30, %s3728_s29  ;;  %469 = vrot.lane.b32.xlu1 %v3933_v31, %s3728_s29 }
  0x67   : > { %467 = vrot.lane.b32.xlu0 %v3936_v32, %s3728_s29 }
  0x6e   : > { %477 = vrot.lane.b32.xlu2 %v3945_v33, %s3728_s29  ;;  %475 = vrot.lane.b32.xlu1 %v3948_v34, %s3728_s29 }
  0x6f   : > { %473 = vrot.lane.b32.xlu0 %v3951_v35, %s3728_s29 }
  0x70   : > { %v3959_v36 = vpop.permute.xlu2 %367 }
  0x76   : > { %483 = vrot.lane.b32.xlu2 %v3962_v37, %s3728_s29  ;;  %481 = vrot.lane.b32.xlu1 %v3965_v38, %s3728_s29 }
  0x77   : > { %479 = vrot.lane.b32.xlu0 %v3968_v39, %s3728_s29 }
  0x78   : > { %v3976_v40 = vpop.permute.xlu2 %369 }
  0x7e   : > { %489 = vrot.lane.b32.xlu2 %v3979_v41, %s3728_s29  ;;  %487 = vrot.lane.b32.xlu1 %v3982_v42, %s3728_s29 }
  0x7f   : > { %485 = vrot.lane.b32.xlu0 %v3985_v43, %s3728_s29 }
  0x80   : > { %v3993_v44 = vpop.permute.xlu2 %375 }
  0x86   : > { %495 = vrot.lane.b32.xlu2 %v3996_v45, %s3728_s29  ;;  %493 = vrot.lane.b32.xlu1 %v3999_v46, %s3728_s29 }
  0x87   : > { %491 = vrot.lane.b32.xlu0 %v4002_v47, %s3728_s29 }
  0x88   : > { %v4010_v48 = vpop.permute.xlu2 %381  ;;  %v4012_v49 = vpop.permute.xlu1 %363 }
  0x89   : > { %v4014_v50 = vpop.permute.xlu0 %359 }
  0x8e   : > { %501 = vrot.lane.b32.xlu2 %v4017_v51, %s3728_s29  ;;  %499 = vrot.lane.b32.xlu1 %v4020_v52, %s3728_s29 }
  0x8f   : > { %497 = vrot.lane.b32.xlu0 %v4023_v53, %s3728_s29 }
  0x90   : > { %v4031_v54 = vpop.permute.xlu2 %387  ;;  %v4033_v55 = vpop.permute.xlu1 %365 }
  0x91   : > { %v4035_v56 = vpop.permute.xlu0 %361 }
  0x96   : > { %696 = vrot.lane.b32.xlu2 %v3807_v3, %s3727_s28  ;;  %694 = vrot.lane.b32.xlu1 %v3798_v0, %s3727_s28  ;;  %v4077_v0 = vld [vmem:[%s6249_s2 + $0x40] sm:$0xff]  ;;  %v4101_v3 = vld [vmem:[%s6249_s2 + $0x28] sm:$0xff] }
  0x97   : > { %692 = vrot.lane.b32.xlu0 %v3810_v4, %s3727_s28  ;;  %6284 = vst [vmem:[#allocation12_spill] sm:$0xff] %v4077_v0  ;;  %1170 = vmatpush.msra.mxu1 %v4077_v0 }
  0x98   : > { %v4067_v61 = vpop.permute.xlu2 %393  ;;  %v4069_v62 = vpop.permute.xlu1 %373  ;;  %6287 = vst [vmem:[#allocation15_spill] sm:$0xff] %v4101_v3 }
  0x99   : > { %6283 = vst [vmem:[#allocation11_spill] sm:$0xff] %v4067_v61  ;;  %v4071_v63 = vpop.permute.xlu0 %371  ;;  %1171 = vmatpush.msra.mxu1 %v4082_v1  ;;  %v4137_v61 = vld [vmem:[%s6249_s2 + $0x8] sm:$0xff] }
  0x9a   : > { %6292 = vst [vmem:[#allocation20_spill] sm:$0xff] %v4137_v61 }
  0x9b   : > { %1172 = vmatpush.msra.mxu1 %v4088_v2  ;;  %v4149_v2 = vld [vmem:[%s6249_s2] sm:$0xff] }
  0x9c   : > { %6294 = vst [vmem:[#allocation22_spill] sm:$0xff] %v4149_v2 }
  0x9d   : > { %1173 = vmatpush.msra.mxu1 %v4101_v3 }
  0x9e   : > { %702 = vrot.lane.b32.xlu2 %v3819_v6, %s3727_s28  ;;  %700 = vrot.lane.b32.xlu1 %v3822_v7, %s3727_s28 }
  0x9f   : > { %698 = vrot.lane.b32.xlu0 %v3825_v8, %s3727_s28  ;;  %1174 = vmatpush.msra.mxu1 %v4113_v25 }
  0xa0   : > { %v4103_v4 = vpop.permute.xlu2 %399  ;;  %v4105_v5 = vpop.permute.xlu1 %379 }
  0xa1   : > { %6288 = vst [vmem:[#allocation16_spill] sm:$0xff] %v4103_v4  ;;  %v4107_v24 = vpop.permute.xlu0 %377  ;;  %v4124_v4 = vld [vmem:[%s6249_s2 + $0x10] sm:$0xff]  ;;  %1175 = vmatpush.msra.mxu1 %v4118_v26 }
  0xa2   : > { %6291 = vst [vmem:[#allocation19_spill] sm:$0xff] %v4124_v4 }
  0xa3   : > { %1176 = vmatpush.msra.mxu1 %v4124_v4 }
  0xa5   : > { %1177 = vmatpush.msra.mxu1 %v4137_v61 }
  0xa6   : > { %708 = vrot.lane.b32.xlu2 %v3834_v9, %s3727_s28  ;;  %706 = vrot.lane.b32.xlu1 %v3837_v10, %s3727_s28 }
  0xa7   : > { %704 = vrot.lane.b32.xlu0 %v3840_v11, %s3727_s28  ;;  %1178 = vmatpush.msra.mxu1 %v4149_v2 }
  0xa8   : > { %v4139_v25 = vpop.permute.xlu2 %405  ;;  %v4141_v3 = vpop.permute.xlu1 %385 }
  0xa9   : > { %6293 = vst [vmem:[#allocation21_spill] sm:$0xff] %v4139_v25  ;;  %v4143_v26 = vpop.permute.xlu0 %383 }
  0xae   : > { %714 = vrot.lane.b32.xlu2 %v3849_v12, %s3727_s28  ;;  %712 = vrot.lane.b32.xlu1 %v3852_v13, %s3727_s28 }
  0xaf   : > { %710 = vrot.lane.b32.xlu0 %v3855_v14, %s3727_s28 }
  0xb0   : > { %v460_v25 = vpop.permute.xlu2 %459  ;;  %v4158_v4 = vpop.permute.xlu1 %391 }
  0xb1   : > { %6295 = vst [vmem:[#allocation23_spill] sm:$0xff] %v4158_v4  ;;  %v4160_v61 = vpop.permute.xlu0 %389 }
  0xb2   : > { %6296 = vst [vmem:[#allocation24_spill] sm:$0xff] %v4160_v61 }
  0xb6   : > { %720 = vrot.lane.b32.xlu2 %v3864_v15, %s3727_s28  ;;  %718 = vrot.lane.b32.xlu1 %v3867_v16, %s3727_s28 }
  0xb7   : > { %716 = vrot.lane.b32.xlu0 %v3870_v17, %s3727_s28 }
  0xb8   : > { %v4168_v2 = vpop.permute.xlu2 %465  ;;  %v4170_v1 = vpop.permute.xlu1 %397 }
  0xb9   : > { %6297 = vst [vmem:[#allocation25_spill] sm:$0xff] %v4170_v1  ;;  %v4172_v0 = vpop.permute.xlu0 %395  ;;  %v259_v1 = vld [vmem:[%s3795_s27] sm:$0xff] }
  0xba   : > { %6298 = vst [vmem:[#allocation26_spill] sm:$0xff] %v4172_v0 }
  0xbe   : > { %726 = vrot.lane.b32.xlu2 %v3879_v18, %s3727_s28  ;;  %724 = vrot.lane.b32.xlu1 %v3882_v19, %s3727_s28 }
  0xbf   : > { %722 = vrot.lane.b32.xlu0 %v3885_v20, %s3727_s28  ;;  %v4206_v20 = vld [vmem:[%s3795_s27 + $0xc1] sm:$0xff] }
  0xc0   : > { %v4180_v4 = vpop.permute.xlu2 %471  ;;  %v4182_v61 = vpop.permute.xlu1 %403 }
  0xc1   : > { %6299 = vst [vmem:[#allocation27_spill] sm:$0xff] %v4182_v61  ;;  %v4184_v15 = vpop.permute.xlu0 %401  ;;  %v528_v61 = vsel %vm527_vm1, %v259_v1, %v4014_v50 }
  0xc2   : > { %6300 = vst [vmem:[#allocation28_spill] sm:$0xff] %v4184_v15 }
  0xc6   : > { %732 = vrot.lane.b32.xlu2 %v3894_v21, %s3727_s28  ;;  %730 = vrot.lane.b32.xlu1 %v3897_v22, %s3727_s28  ;;  %v4200_v21 = vld [vmem:[%s3795_s27 + $0xd1] sm:$0xff]  ;;  %v4203_v22 = vld [vmem:[%s3795_s27 + $0xc9] sm:$0xff] }
  0xc7   : > { %728 = vrot.lane.b32.xlu0 %v3900_v23, %s3727_s28  ;;  %6301 = vst [vmem:[#allocation29_spill] sm:$0xff] %v4200_v21  ;;  %v260_v23 = vld [vmem:[%s3795_s27 + $0x8] sm:$0xff] }
  0xc8   : > { %v4193_v0 = vpop.permute.xlu2 %477  ;;  %v458_v19 = vpop.permute.xlu1 %457  ;;  %6302 = vst [vmem:[#allocation30_spill] sm:$0xff] %v4203_v22 }
  0xc9   : > { %v456_v15 = vpop.permute.xlu0 %455 }
  0xca   : > { %v553_v18 = vsel %vm552_vm3, %v528_v61, %v456_v15 }
  0xcb   : > { %3249 = vmatmul.msk.f32.vlgmr.msra.gmra.mxu1 %vm922_vm2, %v553_v18  ;;  %v529_v18 = vsel %vm527_vm1, %v260_v23, %v4035_v56  ;;  %v530_v23 = vsel %vm527_vm1, %v261_v60, %v4012_v49 }
  0xcc   : > { %v554_v1 = vsel %vm552_vm3, %v529_v18, %v458_v19  ;;  %v555_v56 = vsel %vm552_vm3, %v530_v23, %v460_v25  ;;  %v4235_v18 = vld [vmem:[%s3795_s27 + $0x18] sm:$0xff]  ;;  %v4255_v25 = vld [vmem:[%s3795_s27 + $0x20] sm:$0xff] }
  0xce   : > { %738 = vrot.lane.b32.xlu2 %v4200_v21, %s3727_s28  ;;  %736 = vrot.lane.b32.xlu1 %v4203_v22, %s3727_s28 }
  0xcf   : > { %734 = vrot.lane.b32.xlu0 %v4206_v20, %s3727_s28 }
  0xd0   : > { %v4215_v50 = vpop.permute.xlu2 %483  ;;  %v464_v15 = vpop.permute.xlu1 %463 }
  0xd1   : > { %v462_v61 = vpop.permute.xlu0 %461 }
  0xd3   : > { %3250 = vmatmul.msk.f32.gmra.mxu1 %vm922_vm2, %v554_v1 }
  0xd6   : > { %792 = vrot.lane.b32.xlu2 %v3915_v27, %s3728_s29  ;;  %790 = vrot.lane.b32.xlu1 %v3918_v28, %s3728_s29 }
  0xd7   : > { %788 = vrot.lane.b32.xlu0 %v3921_v29, %s3728_s29  ;;  %v531_v29 = vsel %vm527_vm1, %v4235_v18, %v4033_v55 }
  0xd8   : > { %v4228_v21 = vpop.permute.xlu2 %489  ;;  %v470_v22 = vpop.permute.xlu1 %469  ;;  %v556_v60 = vsel %vm552_vm3, %v531_v29, %v462_v61  ;;  %v532_v61 = vsel %vm527_vm1, %v4255_v25, %v3959_v36  ;;  %v4275_v29 = vld [vmem:[%s3795_s27 + $0x28] sm:$0xff] }
  0xd9   : > { %v468_v19 = vpop.permute.xlu0 %467 }
  0xdb   : > { %3251 = vmatmul.msk.f32.gmra.mxu1 %vm922_vm2, %v555_v56  ;;  %v557_v56 = vsel %vm552_vm3, %v532_v61, %v464_v15  ;;  %v533_v15 = vsel %vm527_vm1, %v4275_v29, %v3976_v40 }
  0xde   : > { %798 = vrot.lane.b32.xlu2 %v3930_v30, %s3728_s29  ;;  %796 = vrot.lane.b32.xlu1 %v3933_v31, %s3728_s29 }
  0xdf   : > { %794 = vrot.lane.b32.xlu0 %v3936_v32, %s3728_s29 }
  0xe0   : > { %v4243_v27 = vpop.permute.xlu2 %495  ;;  %v4245_v28 = vpop.permute.xlu1 %475 }
  0xe1   : > { %6303 = vst [vmem:[#allocation31_spill] sm:$0xff] %v4243_v27  ;;  %v4250_v49 = vpop.permute.xlu0 %473 }
  0xe3   : > { %3252 = vmatmul.msk.f32.gmra.mxu1 %vm922_vm2, %v556_v60 }
  0xe6   : > { %804 = vrot.lane.b32.xlu2 %v3945_v33, %s3728_s29  ;;  %802 = vrot.lane.b32.xlu1 %v3948_v34, %s3728_s29 }
  0xe7   : > { %800 = vrot.lane.b32.xlu0 %v3951_v35, %s3728_s29 }
  0xe8   : > { %v4263_v1 = vpop.permute.xlu2 %501  ;;  %v4265_v55 = vpop.permute.xlu1 %481 }
  0xe9   : > { %6304 = vst [vmem:[#allocation32_spill] sm:$0xff] %v4263_v1  ;;  %v4270_v23 = vpop.permute.xlu0 %479  ;;  %v4296_v1 = vld [vmem:[%s3795_s27 + $0x30] sm:$0xff] }
  0xeb   : > { %3253 = vmatmul.msk.f32.gmra.mxu1 %vm922_vm2, %v557_v56  ;;  %v558_v56 = vsel %vm552_vm3, %v533_v15, %v4168_v2  ;;  %v534_v2 = vsel %vm527_vm1, %v4296_v1, %v4071_v63 }
  0xee   : > { %810 = vrot.lane.b32.xlu2 %v3962_v37, %s3728_s29  ;;  %808 = vrot.lane.b32.xlu1 %v3965_v38, %s3728_s29 }
  0xef   : > { %806 = vrot.lane.b32.xlu0 %v3968_v39, %s3728_s29 }
  0xf0   : > { %v4283_v60 = vpop.permute.xlu2 %696  ;;  %v4285_v36 = vpop.permute.xlu1 %487 }
  0xf1   : > { %v4290_v61 = vpop.permute.xlu0 %485 }
  0xf3   : > { %3254 = vmatmul.msk.f32.gmra.mxu1 %vm922_vm2, %v558_v56  ;;  %v559_v56 = vsel %vm552_vm3, %v534_v2, %v468_v19 }
  0xf6   : > { %816 = vrot.lane.b32.xlu2 %v3979_v41, %s3728_s29  ;;  %814 = vrot.lane.b32.xlu1 %v3982_v42, %s3728_s29  ;;  %v4316_v41 = vld [vmem:[%s3795_s27 + $0x38] sm:$0xff] }
  0xf7   : > { %812 = vrot.lane.b32.xlu0 %v3985_v43, %s3728_s29  ;;  %v535_v19 = vsel %vm527_vm1, %v4316_v41, %v4069_v62 }
  0xf8   : > { %v4304_v27 = vpop.permute.xlu2 %702  ;;  %v4306_v40 = vpop.permute.xlu1 %493 }
  0xf9   : > { %6305 = vst [vmem:[#allocation33_spill] sm:$0xff] %v4306_v40  ;;  %v4311_v15 = vpop.permute.xlu0 %491 }
  0xfa   : > { %6306 = vst [vmem:[#allocation34_spill] sm:$0xff] %v4311_v15  ;;  %v3222_v15 = vld [vmem:[%s6249_s2 + $0xc8] sm:$0x7] }
  0xfb   : > { %3255 = vmatmul.msk.f32.gmra.mxu1 %vm922_vm2, %v559_v56  ;;  %v4336_v56 = vld [vmem:[%s3795_s27 + $0x40] sm:$0xff]  ;;  %3223 = vmatpush.msk.msra.mxu0 %vm995_vm0, %v3222_v15 }
  0xfc   : > { %3409 = vmatpush.msk.msra.mxu3 %vm995_vm0, %v3222_v15 }
  0xfe   : > { %822 = vrot.lane.b32.xlu2 %v3996_v45, %s3728_s29  ;;  %820 = vrot.lane.b32.xlu1 %v3999_v46, %s3728_s29  ;;  %v560_v45 = vsel %vm552_vm3, %v535_v19, %v470_v22  ;;  %v536_v22 = vsel %vm527_vm1, %v4336_v56, %v3993_v44 }
  0xff   : > { %818 = vrot.lane.b32.xlu0 %v4002_v47, %s3728_s29 }
 0x100   : > { %v4324_v40 = vpop.permute.xlu2 %708  ;;  %v4326_v63 = vpop.permute.xlu1 %499 }
 0x101   : > { %6307 = vst [vmem:[#allocation35_spill] sm:$0xff] %v4324_v40  ;;  %v4331_v2 = vpop.permute.xlu0 %497  ;;  %v4398_v40 = vld [vmem:[%s3795_s27 + $0x50] sm:$0xff] }
 0x102   : > { %6308 = vst [vmem:[#allocation36_spill] sm:$0xff] %v4326_v63 }
 0x103   : > { %6309 = vst [vmem:[#allocation37_spill] sm:$0xff] %v4331_v2  ;;  %3256 = vmatmul.msk.f32.gmra.mxu1 %vm922_vm2, %v560_v45  ;;  %v561_v45 = vsel %vm552_vm3, %v536_v22, %v4180_v4  ;;  %v4366_v2 = vld [vmem:[%s3795_s27 + $0x48] sm:$0xff] }
 0x104   : > { %v537_v22 = vsel %vm527_vm1, %v4366_v2, %v4107_v24  ;;  %v3220_v24 = vld [vmem:[%s6249_s2 + $0xb8] sm:$0xff] }
 0x106   : > { %828 = vrot.lane.b32.xlu2 %v4017_v51, %s3728_s29  ;;  %826 = vrot.lane.b32.xlu1 %v4020_v52, %s3728_s29  ;;  %v4357_v51 = vld [vmem:[%s3795_s27 + $0xd2] sm:$0xff]  ;;  %v4360_v52 = vld [vmem:[%s3795_s27 + $0xca] sm:$0xff] }
 0x107   : > { %824 = vrot.lane.b32.xlu0 %v4023_v53, %s3728_s29  ;;  %v4363_v53 = vld [vmem:[%s3795_s27 + $0xc2] sm:$0xff] }
 0x108   : > { %v4344_v62 = vpop.permute.xlu2 %714  ;;  %v4346_v63 = vpop.permute.xlu1 %694 }
 0x109   : > { %6310 = vst [vmem:[#allocation38_spill] sm:$0xff] %v4344_v62  ;;  %v4351_v19 = vpop.permute.xlu0 %692  ;;  %v562_v62 = vsel %vm552_vm3, %v537_v22, %v4250_v49  ;;  %v3219_v49 = vld [vmem:[%s6249_s2 + $0xb0] sm:$0xff]  ;;  %v3217_v22 = vld [vmem:[%s6249_s2 + $0xa0] sm:$0xff] }
 0x10b   : > { %3257 = vmatmul.msk.f32.gmra.mxu1 %vm922_vm2, %v561_v45 }
 0x10e   : > { %834 = vrot.lane.b32.xlu2 %v4357_v51, %s3728_s29  ;;  %832 = vrot.lane.b32.xlu1 %v4360_v52, %s3728_s29 }
 0x10f   : > { %830 = vrot.lane.b32.xlu0 %v4363_v53, %s3728_s29 }
 0x110   : > { %v4374_v44 = vpop.permute.xlu2 %720  ;;  %v4376_v4 = vpop.permute.xlu1 %700 }
 0x111   : > { %6311 = vst [vmem:[#allocation39_spill] sm:$0xff] %v4374_v44  ;;  %v4381_v45 = vpop.permute.xlu0 %698  ;;  %v3221_v44 = vld [vmem:[%s6249_s2 + $0xc0] sm:$0xff] }
 0x112   : > { %1003 = vmatpush.msra.mxu0 %v3221_v44  ;;  %3410 = vmatpush.msra.mxu3 %v3221_v44 }
 0x113   : > { %3258 = vmatmul.msk.f32.gmra.mxu1 %vm922_vm2, %v562_v62 }
 0x114   : > { %1004 = vmatpush.msra.mxu0 %v3220_v24  ;;  %3411 = vmatpush.msra.mxu3 %v3220_v24  ;;  %v4431_v24 = vld [vmem:[%s3795_s27 + $0x58] sm:$0xff] }
 0x116   : > { %1358 = vrot.lane.b32.xlu2 %v3819_v6, %s3727_s28  ;;  %1356 = vrot.lane.b32.xlu1 %v3822_v7, %s3727_s28  ;;  %v538_v6 = vsel %vm527_vm1, %v4398_v40, %v4105_v5  ;;  %v3218_v7 = vld [vmem:[%s6249_s2 + $0xa8] sm:$0xff]  ;;  %v3216_v5 = vld [vmem:[%s6249_s2 + $0x98] sm:$0xff] }
 0x117   : > { %1354 = vrot.lane.b32.xlu0 %v3825_v8, %s3727_s28  ;;  %1005 = vmatpush.msra.mxu0 %v3219_v49  ;;  %v563_v8 = vsel %vm552_vm3, %v538_v6, %v4245_v28  ;;  %v3215_v28 = vld [vmem:[%s6249_s2 + $0x90] sm:$0xff] }
 0x118   : > { %v4409_v15 = vpop.permute.xlu2 %726  ;;  %v4411_v62 = vpop.permute.xlu1 %706  ;;  %3412 = vmatpush.msra.mxu3 %v3219_v49 }
 0x119   : > { %6312 = vst [vmem:[#allocation40_spill] sm:$0xff] %v4409_v15  ;;  %v4416_v44 = vpop.permute.xlu0 %704  ;;  %1006 = vmatpush.msra.mxu0 %v3218_v7 }
 0x11a   : > { %3413 = vmatpush.msra.mxu3 %v3218_v7 }
 0x11b   : > { %3259 = vmatmul.msk.f32.gmra.mxu1 %vm922_vm2, %v563_v8  ;;  %1007 = vmatpush.msra.mxu0 %v3217_v22  ;;  %v3213_v8 = vld [vmem:[%s6249_s2 + $0x80] sm:$0xff] }
 0x11c   : > { %3414 = vmatpush.msra.mxu3 %v3217_v22  ;;  %v4464_v22 = vld [vmem:[%s3795_s27 + $0x60] sm:$0xff] }
 0x11d   : > { %1008 = vmatpush.msra.mxu0 %v3216_v5 }
 0x11e   : > { %1450 = vrot.lane.b32.xlu2 %v3936_v32, %s3728_s29  ;;  %1362 = vrot.lane.b32.xlu1 %v3837_v10, %s3727_s28  ;;  %v539_v32 = vsel %vm527_vm1, %v4431_v24, %v4010_v48  ;;  %v3214_v10 = vld [vmem:[%s6249_s2 + $0x88] sm:$0xff]  ;;  %v3212_v48 = vld [vmem:[%s6249_s2 + $0x78] sm:$0xff] }
 0x11f   : > { %1360 = vrot.lane.b32.xlu0 %v3840_v11, %s3727_s28  ;;  %1009 = vmatpush.msra.mxu0 %v3215_v28  ;;  %v564_v11 = vsel %vm552_vm3, %v539_v32, %v4193_v0  ;;  %v3211_v0 = vld [vmem:[%s6249_s2 + $0x70] sm:$0xff] }
 0x120   : > { %v4442_v49 = vpop.permute.xlu2 %732  ;;  %v4444_v6 = vpop.permute.xlu1 %712  ;;  %3415 = vmatpush.msra.mxu3 %v3216_v5 }
 0x121   : > { %v4449_v7 = vpop.permute.xlu0 %710  ;;  %1010 = vmatpush.msra.mxu0 %v3214_v10 }
 0x122   : > { %3416 = vmatpush.msra.mxu3 %v3215_v28 }
 0x123   : > { %3260 = vmatmul.msk.f32.gmra.mxu1 %vm922_vm2, %v564_v11  ;;  %1011 = vmatpush.msra.mxu0 %v3213_v8 }
 0x124   : > { %3417 = vmatpush.msra.mxu3 %v3214_v10  ;;  %v4491_v10 = vld [vmem:[%s3795_s27 + $0x68] sm:$0xff] }
 0x125   : > { %1012 = vmatpush.msra.mxu0 %v3212_v48  ;;  %v541_v11 = vsel %vm527_vm1, %v4491_v10, %v4141_v3 }
 0x126   : > { %1452 = vrot.lane.b32.xlu2 %v3933_v31, %s3728_s29  ;;  %1366 = vrot.lane.b32.xlu1 %v3855_v14, %s3727_s28  ;;  %v540_v31 = vsel %vm527_vm1, %v4464_v22, %v4143_v26 }
 0x127   : > { %1364 = vrot.lane.b32.xlu0 %v3834_v9, %s3727_s28  ;;  %1013 = vmatpush.msra.mxu0 %v3211_v0  ;;  %v3210_v9 = vld [vmem:[%s6249_s2 + $0x68] sm:$0xff]  ;;  %v565_v14 = vsel %vm552_vm3, %v540_v31, %v4270_v23 }
 0x128   : > { %v4475_v5 = vpop.permute.xlu2 %738  ;;  %v4477_v28 = vpop.permute.xlu1 %718  ;;  %3418 = vmatpush.msra.mxu3 %v3213_v8 }
 0x129   : > { %v4482_v32 = vpop.permute.xlu0 %716  ;;  %1014 = vmatpush.msra.mxu0 %v3210_v9 }
 0x12a   : > { %3419 = vmatpush.msra.mxu3 %v3212_v48  ;;  %v6316_v48 = vld [vmem:[#allocation5_spill] sm:$0xff] }
 0x12b   : > { %3261 = vmatmul.msk.f32.gmra.mxu1 %vm922_vm2, %v565_v14 }
 0x12c   : > { %3420 = vmatpush.msra.mxu3 %v3211_v0  ;;  %v6318_v0 = vld [vmem:[#allocation14_spill] sm:$0xff] }
 0x12e   : > { %1454 = vrot.lane.b32.xlu2 %v3930_v30, %s3728_s29  ;;  %1370 = vrot.lane.b32.xlu1 %v3849_v12, %s3727_s28  ;;  %v566_v30 = vsel %vm552_vm3, %v541_v11, %v4265_v55  ;;  %v4515_v12 = vld [vmem:[%s3795_s27 + $0x70] sm:$0xff]  ;;  %v6313_v55 = vld [vmem:[#allocation10_spill] sm:$0xff] }
 0x12f   : > { %1368 = vrot.lane.b32.xlu0 %v3852_v13, %s3727_s28  ;;  %3421 = vmatpush.msra.mxu3 %v3210_v9  ;;  %v6319_v9 = vld [vmem:[#allocation24_spill] sm:$0xff] }
 0x130   : > { %v4499_v26 = vpop.permute.xlu2 %792  ;;  %v4501_v23 = vpop.permute.xlu1 %724 }
 0x131   : > { %v4506_v8 = vpop.permute.xlu0 %722  ;;  %3422 = vmatpush.msk.msrb.mxu3 %vm995_vm0, %v4040_v57 }
 0x133   : > { %3262 = vmatmul.msk.f32.gmra.mxu1 %vm922_vm2, %v566_v30  ;;  %3423 = vmatpush.msrb.mxu3 %v4047_v58  ;;  %v542_v58 = vsel %vm527_vm1, %v4515_v12, %v4031_v54  ;;  %v6317_v54 = vld [vmem:[#allocation2_spill] sm:$0xff]  ;;  %v6320_v30 = vld [vmem:[#allocation15_spill] sm:$0xff] }
 0x135   : > { %3424 = vmatpush.msrb.mxu3 %v4053_v59  ;;  %v4540_v59 = vld [vmem:[%s3795_s27 + $0x78] sm:$0xff] }
 0x136   : > { %1374 = vrot.lane.b32.xlu2 %v3867_v16, %s3727_s28  ;;  %1456 = vrot.lane.b32.xlu1 %v3951_v35, %s3728_s29  ;;  %v567_v16 = vsel %vm552_vm3, %v542_v58, %v4215_v50  ;;  %v6315_v35 = vld [vmem:[#allocation13_spill] sm:$0xff]  ;;  %v543_v14 = vsel %vm527_vm1, %v4540_v59, %v6319_v9  ;;  %v860_v9 = vsel %vm527_vm1, %v4235_v18, %v4351_v19  ;;  %v6330_v18 = vld [vmem:[#allocation8_spill] sm:$0xff]  ;;  %v6331_v19 = vld [vmem:[#allocation11_spill] sm:$0xff] }
 0x137   : > { %1372 = vrot.lane.b32.xlu0 %v3870_v17, %s3727_s28  ;;  %3425 = vmatpush.msrb.mxu3 %v6313_v55  ;;  %v6314_v17 = vld [vmem:[#allocation12_spill] sm:$0xff]  ;;  %v6321_v58 = vld [vmem:[#allocation17_spill] sm:$0xff]  ;;  %v6322_v55 = vld [vmem:[#allocation18_spill] sm:$0xff] }
 0x138   : > { %v4524_v13 = vpop.permute.xlu2 %798  ;;  %v4526_v57 = vpop.permute.xlu1 %730 }
 0x139   : > { %v4531_v3 = vpop.permute.xlu0 %728  ;;  %3426 = vmatpush.msrb.mxu3 %v6314_v17  ;;  %v6323_v17 = vld [vmem:[#allocation3_spill] sm:$0xff] }
 0x13b   : > { %3263 = vmatmul.msk.f32.gmra.mxu1 %vm922_vm2, %v567_v16  ;;  %3427 = vmatpush.msrb.mxu3 %v6315_v35  ;;  %v4565_v16 = vld [vmem:[%s3795_s27 + $0x80] sm:$0xff]  ;;  %v6324_v35 = vld [vmem:[#allocation4_spill] sm:$0xff] }
 0x13d   : > { %3428 = vmatpush.msrb.mxu3 %v6318_v0 }
 0x13e   : > { %1378 = vrot.lane.b32.xlu2 %v6316_v48, %s3727_s28  ;;  %1458 = vrot.lane.b32.xlu1 %v3948_v34, %s3728_s29  ;;  %v568_v34 = vsel %vm552_vm3, %v543_v14, %v4290_v61  ;;  %v6325_v48 = vld [vmem:[#allocation19_spill] sm:$0xff] }
 0x13f   : > { %1376 = vrot.lane.b32.xlu0 %v6317_v54, %s3727_s28  ;;  %3429 = vmatpush.msrb.mxu3 %v6320_v30  ;;  %v6326_v54 = vld [vmem:[#allocation23_spill] sm:$0xff] }
 0x140   : > { %v4549_v50 = vpop.permute.xlu2 %804  ;;  %v4551_v31 = vpop.permute.xlu1 %736  ;;  %v544_v0 = vsel %vm527_vm1, %v4565_v16, %v6326_v54 }
 0x141   : > { %v4556_v11 = vpop.permute.xlu0 %734  ;;  %3430 = vmatpush.msrb.mxu3 %v6321_v58  ;;  %v569_v58 = vsel %vm552_vm3, %v544_v0, %v4285_v36 }
 0x143   : > { %3264 = vmatmul.msk.f32.gmra.mxu1 %vm922_vm2, %v568_v34  ;;  %3431 = vmatpush.msrb.mxu3 %v6322_v55  ;;  %v6327_v34 = vld [vmem:[#allocation20_spill] sm:$0xff]  ;;  %v6328_v55 = vld [vmem:[#allocation22_spill] sm:$0xff] }
 0x145   : > { %3432 = vmatpush.msrb.mxu3 %v6325_v48  ;;  %v861_v48 = vsel %vm527_vm1, %v4255_v25, %v4346_v63  ;;  %v4621_v25 = vld [vmem:[%s6249_s2 + $0x128] sm:$0xff]  ;;  %v4630_v63 = vld [vmem:[%s6249_s2 + $0x120] sm:$0xff] }
 0x146   : > { %1382 = vrot.lane.b32.xlu2 %v6323_v17, %s3727_s28  ;;  %1460 = vrot.lane.b32.xlu1 %v3945_v33, %s3728_s29  ;;  %v4590_v17 = vld [vmem:[%s3795_s27 + $0x88] sm:$0xff] }
 0x147   : > { %1380 = vrot.lane.b32.xlu0 %v6324_v35, %s3727_s28  ;;  %3433 = vmatpush.msrb.mxu3 %v6327_v34  ;;  %v6329_v35 = vld [vmem:[#allocation7_spill] sm:$0xff]  ;;  %v545_v36 = vsel %vm527_vm1, %v4590_v17, %v6331_v19 }
 0x148   : > { %v4574_v61 = vpop.permute.xlu2 %810  ;;  %v791_v14 = vpop.permute.xlu1 %790  ;;  %v570_v34 = vsel %vm552_vm3, %v545_v36, %v4228_v21  ;;  %v6332_v21 = vld [vmem:[#allocation6_spill] sm:$0xff] }
 0x149   : > { %v789_v30 = vpop.permute.xlu0 %788  ;;  %3434 = vmatpush.msrb.mxu3 %v6328_v55  ;;  %v4653_v55 = vld [vmem:[%s6249_s2 + $0x110] sm:$0xff] }
 0x14a   : > { %v884_v33 = vsel %vm552_vm3, %v860_v9, %v789_v30  ;;  %v885_v30 = vsel %vm552_vm3, %v861_v48, %v791_v14  ;;  %v4638_v14 = vld [vmem:[%s6249_s2 + $0x118] sm:$0xff] }
 0x14b   : > { %3224 = vmatmul.msk.f32.vlgmr.msra.gmra.mxu0 %vm922_vm2, %v884_v33  ;;  %3265 = vmatmul.msk.f32.gmra.mxu1 %vm922_vm2, %v569_v58 }
 0x14e   : > { %1386 = vrot.lane.b32.xlu2 %v6329_v35, %s3727_s28  ;;  %1384 = vrot.lane.b32.xlu1 %v6330_v18, %s3727_s28  ;;  %v4680_v18 = vld [vmem:[%s6249_s2 + $0xf8] sm:$0xff] }
 0x14f   : > { %1462 = vrot.lane.b32.xlu0 %v3968_v39, %s3728_s29  ;;  %v4612_v39 = vld [vmem:[%s6249_s2 + $0x130] sm:$0x7] }
 0x150   : > { %v797_v54 = vpop.permute.xlu1 %796  ;;  %v4604_v9 = vpop.permute.xlu2 %816  ;;  %3358 = vmatpush.msk.msra.mxu2 %vm995_vm0, %v4612_v39 }
 0x151   : > { %v795_v0 = vpop.permute.xlu0 %794 }
 0x152   : > { %1663 = vmatpush.msra.mxu2 %v4621_v25 }
 0x153   : > { %3225 = vmatmul.msk.f32.gmra.mxu0 %vm922_vm2, %v885_v30  ;;  %3266 = vmatmul.msk.f32.gmra.mxu1 %vm922_vm2, %v570_v34  ;;  %v3318_v30 = vld [vmem:[%s3795_s27 + $0xd9] sm:$0xff] }
 0x154   : > { %1664 = vmatpush.msra.mxu2 %v4630_v63 }
 0x156   : > { %1390 = vrot.lane.b32.xlu2 %v4206_v20, %s3727_s28  ;;  %1388 = vrot.lane.b32.xlu1 %v6332_v21, %s3727_s28  ;;  %v862_v20 = vsel %vm527_vm1, %v4275_v29, %v4283_v60  ;;  %v4662_v29 = vld [vmem:[%s6249_s2 + $0x108] sm:$0xff]  ;;  %v6334_v60 = vld [vmem:[#allocation30_spill] sm:$0xff]  ;;  %v6335_v21 = vld [vmem:[#allocation29_spill] sm:$0xff] }
 0x157   : > { %1464 = vrot.lane.b32.xlu0 %v3965_v38, %s3728_s29  ;;  %v886_v38 = vsel %vm552_vm3, %v862_v20, %v4499_v26  ;;  %1665 = vmatpush.msra.mxu2 %v4638_v14  ;;  %v4672_v26 = vld [vmem:[%s6249_s2 + $0x100] sm:$0xff]  ;;  %v4721_v20 = vld [vmem:[%s6249_s2 + $0xd8] sm:$0xff] }
 0x158   : > { %v4643_v33 = vpop.permute.xlu1 %802  ;;  %v4657_v35 = vpop.permute.xlu2 %822 }
 0x159   : > { %v4645_v58 = vpop.permute.xlu0 %800  ;;  %6333 = vst [vmem:[#allocation10_spill] sm:$0xff] %v4657_v35  ;;  %1666 = vmatpush.msra.mxu2 %v4653_v55 }
 0x15b   : > { %3226 = vmatmul.msk.f32.gmra.mxu0 %vm922_vm2, %v886_v38  ;;  %1667 = vmatpush.msra.mxu2 %v4662_v29 }
 0x15d   : > { %1668 = vmatpush.msra.mxu2 %v4672_v26 }
 0x15e   : > { %1468 = vrot.lane.b32.xlu2 %v3985_v43, %s3728_s29  ;;  %1392 = vrot.lane.b32.xlu1 %v6334_v60, %s3727_s28  ;;  %v863_v43 = vsel %vm527_vm1, %v4296_v1, %v4381_v45  ;;  %v4702_v45 = vld [vmem:[%s6249_s2 + $0xe8] sm:$0xff] }
 0x15f   : > { %1466 = vrot.lane.b32.xlu0 %v3962_v37, %s3728_s29  ;;  %v887_v48 = vsel %vm552_vm3, %v863_v43, %v795_v0  ;;  %v4694_v37 = vld [vmem:[%s6249_s2 + $0xf0] sm:$0xff]  ;;  %1669 = vmatpush.msra.mxu2 %v4680_v18  ;;  %v4713_v0 = vld [vmem:[%s6249_s2 + $0xe0] sm:$0xff] }
 0x160   : > { %v4685_v19 = vpop.permute.xlu1 %808  ;;  %v4705_v34 = vpop.permute.xlu2 %828 }
 0x161   : > { %v4687_v36 = vpop.permute.xlu0 %806  ;;  %1670 = vmatpush.msra.mxu2 %v4694_v37 }
 0x163   : > { %3227 = vmatmul.msk.f32.gmra.mxu0 %vm922_vm2, %v887_v48  ;;  %1671 = vmatpush.msra.mxu2 %v4702_v45  ;;  %v4735_v48 = vld [vmem:[%s6249_s2 + $0xd0] sm:$0xff] }
 0x165   : > { %1672 = vmatpush.msra.mxu2 %v4713_v0 }
 0x166   : > { %1470 = vrot.lane.b32.xlu2 %v3982_v42, %s3728_s29  ;;  %1396 = vrot.lane.b32.xlu1 %v3318_v30, %s3727_s28  ;;  %v864_v42 = vsel %vm527_vm1, %v4316_v41, %v4376_v4  ;;  %v3320_v30 = vld [vmem:[%s3795_s27 + $0xe9] sm:$0xff]  ;;  %v3319_v4 = vld [vmem:[%s3795_s27 + $0xe1] sm:$0xff] }
 0x167   : > { %1394 = vrot.lane.b32.xlu0 %v6335_v21, %s3727_s28  ;;  %v888_v43 = vsel %vm552_vm3, %v864_v42, %v797_v54  ;;  %1673 = vmatpush.msra.mxu2 %v4721_v20  ;;  %v6336_v21 = vld [vmem:[#allocation9_spill] sm:$0xff]  ;;  %v865_v42 = vsel %vm527_vm1, %v4336_v56, %v4304_v27  ;;  %v4765_v27 = vld [vmem:[%s3795_s27 + $0xa8] sm:$0xff] }
 0x168   : > { %v4726_v38 = vpop.permute.xlu1 %814  ;;  %v4746_v54 = vpop.permute.xlu2 %834  ;;  %v889_v15 = vsel %vm552_vm3, %v865_v42, %v4524_v13 }
 0x169   : > { %v4728_v60 = vpop.permute.xlu0 %812  ;;  %1674 = vmatpush.msra.mxu2 %v4735_v48 }
 0x16b   : > { %3228 = vmatmul.msk.f32.gmra.mxu0 %vm922_vm2, %v888_v43 }
 0x16e   : > { %1472 = vrot.lane.b32.xlu2 %v6336_v21, %s3728_s29  ;;  %1400 = vrot.lane.b32.xlu1 %v3320_v30, %s3727_s28  ;;  %v866_v30 = vsel %vm527_vm1, %v4366_v2, %v4416_v44  ;;  %v3336_v21 = vld [vmem:[%s3795_s27 + $0xaa] sm:$0xff]  ;;  %v3335_v44 = vld [vmem:[%s3795_s27 + $0xa2] sm:$0xff] }
 0x16f   : > { %1398 = vrot.lane.b32.xlu0 %v3319_v4, %s3727_s28  ;;  %s237_s28 = smul.u32 24, %s3709_s15 }
 0x170   : > { %v4751_v43 = vpop.permute.xlu1 %820  ;;  %s3449_s15 = smul.u32 48, %s6411_s16 }
 0x171   : > { %v4753_v35 = vpop.permute.xlu0 %818  ;;  %p240_p6 = scmp.lt.s32.totalorder %s237_s28, 47 }
 0x173   : > { %3229 = vmatmul.msk.f32.gmra.mxu0 %vm922_vm2, %v889_v15  ;;  %v878_v15 = vsel %vm527_vm1, %v4765_v27, %v4531_v3  ;;  %v4790_v3 = vld [vmem:[%s3795_s27 + $0xb0] sm:$0xff]  ;;  %s6413_s28 = smov (!%p240_p6, %s237_s28), 47 }
 0x174   : > { %s4862_s16 = sadd.s32 %s3449_s15, %s6413_s28 }
 0x176   : > { %1476 = vrot.lane.b32.xlu2 %v3999_v46, %s3728_s29  ;;  %1486 = vrot.lane.b32.xlu1 %v4363_v53, %s3728_s29  ;;  %v4773_v46 = vpop.permute.xlu2 %1358  ;;  %v890_v53 = vsel %vm552_vm3, %v866_v30, %v4645_v58  ;;  %v867_v58 = vsel %vm527_vm1, %v4398_v40, %v4411_v62  ;;  %v3338_v62 = vld [vmem:[%s3795_s27 + $0xba] sm:$0xff] }
 0x177   : > { %1474 = vrot.lane.b32.xlu0 %v4002_v47, %s3728_s29 }
 0x178   : > { %v827_v13 = vpop.permute.xlu1 %826 }
 0x179   : > { %v825_v4 = vpop.permute.xlu0 %824 }
 0x17a   : > { %v902_v47 = vsel %vm552_vm3, %v878_v15, %v825_v4  ;;  %v3337_v4 = vld [vmem:[%s3795_s27 + $0xb2] sm:$0xff] }
 0x17b   : > { %3230 = vmatmul.msk.f32.gmra.mxu0 %vm922_vm2, %v890_v53  ;;  %3242 = vmatmul.msk.f32.vlgmr.msra.gmra.mxu3 %vm922_vm2, %v902_v47 }
 0x17c   : > { %3435 = vmatpush.msk.msra.mxu3 %vm995_vm0, %v4612_v39  ;;  %v879_v39 = vsel %vm527_vm1, %v4790_v3, %v4526_v57  ;;  %v4816_v57 = vld [vmem:[%s3795_s27 + $0xb8] sm:$0xff] }
 0x17d   : > { %v903_v30 = vsel %vm552_vm3, %v879_v39, %v827_v13 }
 0x17e   : > { %1488 = vrot.lane.b32.xlu1 %v4360_v52, %s3728_s29  ;;  %1480 = vrot.lane.b32.xlu2 %v3336_v21, %s3728_s29  ;;  %v1451_v15 = vpop.permute.xlu2 %1450  ;;  %v3344_v21 = vld [vmem:[%s3795_s27 + $0xea] sm:$0xff] }
 0x17f   : > { %1478 = vrot.lane.b32.xlu0 %v3335_v44, %s3728_s29  ;;  %3436 = vmatpush.msra.mxu3 %v4621_v25  ;;  %v891_v25 = vsel %vm552_vm3, %v867_v58, %v4643_v33 }
 0x180   : > { %v4798_v42 = vpop.permute.xlu1 %832 }
 0x181   : > { %v831_v52 = vpop.permute.xlu0 %830  ;;  %3437 = vmatpush.msra.mxu3 %v4630_v63  ;;  %v6337_v63 = vld [vmem:[#allocation35_spill] sm:$0xff] }
 0x182   : > { %v868_v33 = vsel %vm527_vm1, %v4431_v24, %v6337_v63 }
 0x183   : > { %3231 = vmatmul.msk.f32.gmra.mxu0 %vm922_vm2, %v891_v25  ;;  %3243 = vmatmul.msk.f32.gmra.mxu3 %vm922_vm2, %v903_v30 }
 0x184   : > { %3438 = vmatpush.msra.mxu3 %v4638_v14 }
 0x186   : > { %1490 = vrot.lane.b32.xlu1 %v4357_v51, %s3728_s29  ;;  %1484 = vrot.lane.b32.xlu2 %v3338_v62, %s3728_s29  ;;  %v880_v51 = vsel %vm527_vm1, %v4816_v57, %v4442_v49  ;;  %v3343_v49 = vld [vmem:[%s3795_s27 + $0xe2] sm:$0xff] }
 0x187   : > { %1482 = vrot.lane.b32.xlu0 %v3337_v4, %s3728_s29  ;;  %3439 = vmatpush.msra.mxu3 %v4653_v55  ;;  %v892_v55 = vsel %vm552_vm3, %v868_v33, %v4549_v50  ;;  %v904_v47 = vsel %vm552_vm3, %v880_v51, %v4705_v34  ;;  %v1453_v50 = vpop.permute.xlu2 %1452  ;;  %v6339_v4 = vld [vmem:[#allocation26_spill] sm:$0xff] }
 0x188   : > { %v1357_v14 = vpop.permute.xlu1 %1356 }
 0x189   : > { %v1355_v13 = vpop.permute.xlu0 %1354  ;;  %3440 = vmatpush.msra.mxu3 %v4662_v29  ;;  %v3342_v29 = vld [vmem:[%s3795_s27 + $0xda] sm:$0xff]  ;;  %v1523_v34 = vsel %vm527_vm1, %v4316_v41, %v1357_v14 }
 0x18a   : > { %v1522_v53 = vsel %vm527_vm1, %v4296_v1, %v1355_v13  ;;  %v4840_v1 = vld [vmem:[%s3795_s27 + $0xc0] sm:$0xff]  ;;  %v1547_v41 = vsel %vm552_vm3, %v1523_v34, %v1453_v50  ;;  %v6342_v50 = vld [vmem:[#allocation33_spill] sm:$0xff] }
 0x18b   : > { %3232 = vmatmul.msk.f32.gmra.mxu0 %vm922_vm2, %v892_v55  ;;  %3244 = vmatmul.msk.f32.gmra.mxu3 %vm922_vm2, %v904_v47  ;;  %v1546_v24 = vsel %vm552_vm3, %v1522_v53, %v1451_v15  ;;  %v881_v44 = vsel %vm527_vm1, %v4840_v1, %v4556_v11  ;;  %v6340_v14 = vld [vmem:[#allocation34_spill] sm:$0xff] }
 0x18c   : > { %3359 = vmatmul.msk.f32.vlgmr.msra.gmra.mxu2 %vm922_vm2, %v1546_v24  ;;  %3441 = vmatpush.msra.mxu3 %v4672_v26  ;;  %v869_v26 = vsel %vm527_vm1, %v4464_v22, %v4449_v7  ;;  %v4867_v7 = vld [vmem:[%s3795_s27 + $0xc8] sm:$0xff]  ;;  %v1524_v22 = vsel %vm527_vm1, %v4336_v56, %v4773_v46 }
 0x18d   : > { %v893_v25 = vsel %vm552_vm3, %v869_v26, %v4687_v36  ;;  %v870_v36 = vsel %vm527_vm1, %v4491_v10, %v4444_v6 }
 0x18e   : > { %1494 = vrot.lane.b32.xlu1 %v3343_v49, %s3728_s29  ;;  %1496 = vrot.lane.b32.xlu2 %v3344_v21, %s3728_s29  ;;  %v894_v56 = vsel %vm552_vm3, %v870_v36, %v4685_v19  ;;  %v4902_v19 = vld [vmem:[%s3795_s27 + $0xd0] sm:$0xff]  ;;  %v6345_v36 = vld [vmem:[#allocation31_spill] sm:$0xff] }
 0x18f   : > { %1492 = vrot.lane.b32.xlu0 %v3342_v29, %s3728_s29  ;;  %3442 = vmatpush.msra.mxu3 %v4680_v18  ;;  %v905_v18 = vsel %vm552_vm3, %v881_v44, %v831_v52  ;;  %s3088_s29 = sshll.u32 %s4862_s16, 3  ;;  %v1455_v11 = vpop.permute.xlu2 %1454 }
 0x190   : > { %v1363_v58 = vpop.permute.xlu1 %1362  ;;  %s4888_s30 = scalar_lea.vmem %s6248_s1, %s3088_s29  ;;  %v1548_v10 = vsel %vm552_vm3, %v1524_v22, %v1455_v11  ;;  %s6114_s10 = scalar_lea.vmem %s6251_s4, %s3088_s29 }
 0x191   : > { %v1361_v39 = vpop.permute.xlu0 %1360  ;;  %3443 = vmatpush.msra.mxu3 %v4694_v37  ;;  %v882_v37 = vsel %vm527_vm1, %v4867_v7, %v4551_v31  ;;  %v2280_v31 = vld [vmem:[%s4888_s30] sm:$0xff]  ;;  %v1526_v24 = vsel %vm527_vm1, %v4398_v40, %v1363_v58  ;;  %v3278_v40 = vld [vmem:[%s3795_s27 + $0x58] sm:$0xff]  ;;  %v6343_v58 = vld [vmem:[#allocation16_spill] sm:$0xff] }
 0x192   : > { %v906_v6 = vsel %vm552_vm3, %v882_v37, %v4798_v42 }
 0x193   : > { %3233 = vmatmul.msk.f32.gmra.mxu0 %vm922_vm2, %v893_v25  ;;  %3245 = vmatmul.msk.f32.gmra.mxu3 %vm922_vm2, %v905_v18 }
 0x194   : > { %3360 = vmatmul.msk.f32.gmra.mxu2 %vm922_vm2, %v1547_v41  ;;  %3444 = vmatpush.msra.mxu3 %v4702_v45 }
 0x196   : > { %3445 = vmatpush.msra.mxu3 %v4713_v0  ;;  %v6338_v0 = vld [vmem:[#allocation38_spill] sm:$0xff] }
 0x197   : > { %2328 = vrot.lane.b32.xlu0 %v2280_v31, %s3729_s5  ;;  %v4914_v30 = vpop.permute.xlu2 %1374 }
 0x198   : > { %3446 = vmatpush.msra.mxu3 %v4721_v20  ;;  %v4881_v45 = vpop.permute.xlu1 %1366  ;;  %v871_v20 = vsel %vm527_vm1, %v4515_v12, %v6338_v0  ;;  %v2281_v12 = vld [vmem:[%s4888_s30 + $0x8] sm:$0xff] }
 0x199   : > { %v1365_v52 = vpop.permute.xlu0 %1364  ;;  %v895_v62 = vsel %vm552_vm3, %v871_v20, %v4574_v61  ;;  %2330 = vrot.lane.b32.xlu1 %v2281_v12, %s3729_s5  ;;  %v872_v61 = vsel %vm527_vm1, %v4540_v59, %v4482_v32  ;;  %v6341_v59 = vld [vmem:[#allocation25_spill] sm:$0xff] }
 0x19a   : > { %3447 = vmatpush.msra.mxu3 %v4735_v48  ;;  %v883_v48 = vsel %vm527_vm1, %v4902_v19, %v4475_v5  ;;  %v4925_v5 = vld [vmem:[%s3795_s27 + $0x90] sm:$0xff]  ;;  %v896_v53 = vsel %vm552_vm3, %v872_v61, %v4728_v60  ;;  %v873_v60 = vsel %vm527_vm1, %v4565_v16, %v4477_v28  ;;  %v279_v28 = vld [vmem:[%s3795_s27 + $0xa0] sm:$0xff]  ;;  %v1527_v18 = vsel %vm527_vm1, %v3278_v40, %v1365_v52 }
 0x19b   : > { %3234 = vmatmul.msk.f32.gmra.mxu0 %vm922_vm2, %v894_v56  ;;  %3246 = vmatmul.msk.f32.gmra.mxu3 %vm922_vm2, %v906_v6  ;;  %v907_v15 = vsel %vm552_vm3, %v883_v48, %v4746_v54  ;;  %v546_v63 = vsel %vm527_vm1, %v4925_v5, %v6339_v4  ;;  %v1525_v54 = vsel %vm527_vm1, %v4366_v2, %v1361_v39  ;;  %v278_v2 = vld [vmem:[%s3795_s27 + $0x98] sm:$0xff]  ;;  %v6344_v39 = vld [vmem:[#allocation39_spill] sm:$0xff]  ;;  %v3279_v52 = vld [vmem:[%s3795_s27 + $0x60] sm:$0xff] }
 0x19c   : > { %3361 = vmatmul.msk.f32.gmra.mxu2 %vm922_vm2, %v1548_v10  ;;  %v571_v13 = vsel %vm552_vm3, %v546_v63, %v6340_v14  ;;  %v547_v47 = vsel %vm527_vm1, %v278_v2, %v6341_v59  ;;  %v897_v29 = vsel %vm552_vm3, %v873_v60, %v4726_v38  ;;  %v548_v38 = vsel %vm527_vm1, %v279_v28, %v6343_v58  ;;  %v6351_v60 = vld [vmem:[#allocation40_spill] sm:$0xff] }
 0x19d   : > { %v572_v34 = vsel %vm552_vm3, %v547_v47, %v6342_v50  ;;  %v874_v25 = vsel %vm527_vm1, %v4590_v17, %v6344_v39  ;;  %v573_v37 = vsel %vm552_vm3, %v548_v38, %v6345_v36  ;;  %v2283_v17 = vld [vmem:[%s4888_s30 + $0x18] sm:$0xff]  ;;  %v875_v31 = vsel %vm527_vm1, %v4925_v5, %v4506_v8  ;;  %v2284_v8 = vld [vmem:[%s4888_s30 + $0x20] sm:$0xff]  ;;  %v2286_v47 = vld [vmem:[%s4888_s30 + $0x30] sm:$0xff] }
 0x19e   : > { %v898_v11 = vsel %vm552_vm3, %v874_v25, %v4604_v9  ;;  %v6346_v9 = vld [vmem:[#allocation28_spill] sm:$0xff]  ;;  %v1528_v0 = vsel %vm527_vm1, %v3279_v52, %v4881_v45  ;;  %v6348_v45 = vld [vmem:[#allocation27_spill] sm:$0xff]  ;;  %v876_v61 = vsel %vm527_vm1, %v278_v2, %v4501_v23  ;;  %v6350_v2 = vld [vmem:[#allocation21_spill] sm:$0xff] }
 0x19f   : > { %v4944_v32 = vpop.permute.xlu2 %1378  ;;  %2334 = vrot.lane.b32.xlu0 %v2283_v17, %s3729_s5  ;;  %v549_v10 = vsel %vm527_vm1, %v4765_v27, %v6346_v9  ;;  %v2282_v27 = vld [vmem:[%s4888_s30 + $0x10] sm:$0xff]  ;;  %v550_v63 = vsel %vm527_vm1, %v4790_v3, %v6348_v45  ;;  %v2285_v38 = vld [vmem:[%s4888_s30 + $0x28] sm:$0xff]  ;;  %v2287_v39 = vld [vmem:[%s4888_s30 + $0x38] sm:$0xff] }
 0x1a0   : > { %v4910_v46 = vpop.permute.xlu1 %1370  ;;  %2332 = vrot.lane.b32.xlu2 %v2282_v27, %s3729_s5  ;;  %v6353_v40 = vld [vmem:[#allocation32_spill] sm:$0xff]  ;;  %v3282_v25 = vld [vmem:[%s3795_s27 + $0x78] sm:$0xff]  ;;  %v2288_v36 = vld [vmem:[%s4888_s30 + $0x40] sm:$0xff] }
 0x1a1   : > { %v4912_v42 = vpop.permute.xlu0 %1368  ;;  %2336 = vrot.lane.b32.xlu1 %v2284_v8, %s3729_s5  ;;  %v2296_v45 = vld [vmem:[%s4888_s30 + $0x80] sm:$0xff] }
 0x1a3   : > { %3235 = vmatmul.msk.f32.gmra.mxu0 %vm922_vm2, %v895_v62  ;;  %3247 = vmatmul.msk.f32.gmra.mxu3 %vm922_vm2, %v907_v15  ;;  %v899_v62 = vsel %vm552_vm3, %v875_v31, %v4753_v35  ;;  %v6347_v15 = vld [vmem:[#allocation37_spill] sm:$0xff]  ;;  %v3280_v35 = vld [vmem:[%s3795_s27 + $0x68] sm:$0xff] }
 0x1a4   : > { %v574_v12 = vsel %vm552_vm3, %v549_v10, %v6347_v15  ;;  %v2291_v31 = vld [vmem:[%s4888_s30 + $0x58] sm:$0xff]  ;;  %v3284_v15 = vld [vmem:[%s3795_s27 + $0x88] sm:$0xff] }
 0x1a7   : > { %v4967_v44 = vpop.permute.xlu2 %1382  ;;  %2340 = vrot.lane.b32.xlu0 %v2286_v47, %s3729_s5  ;;  %v2297_v47 = vld [vmem:[%s4888_s30 + $0x88] sm:$0xff] }
 0x1a8   : > { %v1457_v33 = vpop.permute.xlu1 %1456  ;;  %2338 = vrot.lane.b32.xlu2 %v2285_v38, %s3729_s5 }
 0x1a9   : > { %v4935_v51 = vpop.permute.xlu0 %1372  ;;  %v1549_v55 = vsel %vm552_vm3, %v1525_v54, %v1457_v33  ;;  %v1529_v33 = vsel %vm527_vm1, %v3280_v35, %v4912_v42  ;;  %v3281_v42 = vld [vmem:[%s3795_s27 + $0x70] sm:$0xff]  ;;  %2342 = vrot.lane.b32.xlu1 %v2287_v39, %s3729_s5 }
 0x1aa   : > { %3362 = vmatmul.msk.f32.gmra.mxu2 %vm922_vm2, %v1549_v55  ;;  %v6349_v55 = vld [vmem:[#allocation36_spill] sm:$0xff] }
 0x1ab   : > { %3236 = vmatmul.msk.f32.gmra.mxu0 %vm922_vm2, %v896_v53  ;;  %3267 = vmatmul.msk.f32.vlgmr.msrb.gmra.mxu3 %vm922_vm2, %v571_v13  ;;  %v900_v53 = vsel %vm552_vm3, %v876_v61, %v4751_v43  ;;  %v575_v59 = vsel %vm552_vm3, %v550_v63, %v6349_v55  ;;  %v551_v43 = vsel %vm527_vm1, %v4816_v57, %v6350_v2  ;;  %v2289_v57 = vld [vmem:[%s4888_s30 + $0x48] sm:$0xff]  ;;  %v2298_v63 = vld [vmem:[%s4888_s30 + $0x90] sm:$0xff]  ;;  %v1180_v55 = vpop.f32.mrf.mxu1 }
 0x1ac   : > { %v576_v58 = vsel %vm552_vm3, %v551_v43, %v6353_v40  ;;  %v3294_v40 = vld [vmem:[%s3795_s27 + $0xd8] sm:$0xff] }
 0x1af   : > { %v4988_v6 = vpop.permute.xlu2 %1386  ;;  %2346 = vrot.lane.b32.xlu0 %v2289_v57, %s3729_s5 }
 0x1b0   : > { %v1459_v49 = vpop.permute.xlu1 %1458  ;;  %2344 = vrot.lane.b32.xlu2 %v2288_v36, %s3729_s5 }
 0x1b1   : > { %v4955_v21 = vpop.permute.xlu0 %1376  ;;  %v1550_v26 = vsel %vm552_vm3, %v1526_v24, %v1459_v49  ;;  %v877_v24 = vsel %vm527_vm1, %v279_v28, %v6351_v60 }
 0x1b2   : > { %3363 = vmatmul.msk.f32.gmra.mxu2 %vm922_vm2, %v1550_v26  ;;  %v1533_v8 = vsel %vm527_vm1, %v3284_v15, %v4955_v21 }
 0x1b3   : > { %3237 = vmatmul.msk.f32.gmra.mxu0 %vm922_vm2, %v897_v29  ;;  %3268 = vmatmul.msk.f32.gmra.mxu3 %vm922_vm2, %v572_v34  ;;  %v1530_v29 = vsel %vm527_vm1, %v3281_v42, %v4910_v46  ;;  %v6352_v34 = vld [vmem:[#allocation10_spill] sm:$0xff]  ;;  %v2301_v42 = vld [vmem:[%s4888_s30 + $0xa8] sm:$0xff] }
 0x1b4   : > { %v901_v26 = vsel %vm552_vm3, %v877_v24, %v6352_v34  ;;  %v2302_v34 = vld [vmem:[%s4888_s30 + $0xb0] sm:$0xff] }
 0x1b7   : > { %v1391_v14 = vpop.permute.xlu2 %1390 }
 0x1b8   : > { %v1461_v41 = vpop.permute.xlu1 %1460  ;;  %2350 = vrot.lane.b32.xlu2 %v2291_v31, %s3729_s5 }
 0x1b9   : > { %v4975_v22 = vpop.permute.xlu0 %1380  ;;  %v1551_v56 = vsel %vm552_vm3, %v1527_v18, %v1461_v41  ;;  %v1531_v41 = vsel %vm527_vm1, %v3282_v25, %v4935_v51  ;;  %v1532_v51 = vsel %vm527_vm1, %v4565_v16, %v4914_v30  ;;  %v1540_v16 = vsel %vm527_vm1, %v4840_v1, %v1391_v14  ;;  %v2303_v25 = vld [vmem:[%s4888_s30 + $0xb8] sm:$0xff] }
 0x1ba   : > { %3364 = vmatmul.msk.f32.gmra.mxu2 %vm922_vm2, %v1551_v56  ;;  %v2292_v56 = vld [vmem:[%s4888_s30 + $0x60] sm:$0xff]  ;;  %v1534_v14 = vsel %vm527_vm1, %v4925_v5, %v4944_v32  ;;  %v3286_v5 = vld [vmem:[%s3795_s27 + $0x98] sm:$0xff] }
 0x1bb   : > { %3238 = vmatmul.msk.f32.gmra.mxu0 %vm922_vm2, %v898_v11  ;;  %3269 = vmatmul.msk.f32.gmra.mxu3 %vm922_vm2, %v573_v37  ;;  %v2290_v37 = vld [vmem:[%s4888_s30 + $0x50] sm:$0xff]  ;;  %v1535_v43 = vsel %vm527_vm1, %v3286_v5, %v4975_v22 }
 0x1bc   : > { %2348 = vrot.lane.b32.xlu1 %v2290_v37, %s3729_s5  ;;  %2352 = vrot.lane.b32.xlu0 %v2292_v56, %s3729_s5 }
 0x1bf   : > { %v1469_v46 = vpop.permute.xlu2 %1468 }
 0x1c0   : > { %v4998_v20 = vpop.permute.xlu1 %1384  ;;  %v1555_v17 = vsel %vm552_vm3, %v1531_v41, %v1469_v46 }
 0x1c1   : > { %v1463_v48 = vpop.permute.xlu0 %1462 }
 0x1c2   : > { %v1552_v4 = vsel %vm552_vm3, %v1528_v0, %v1463_v48  ;;  %v2293_v0 = vld [vmem:[%s4888_s30 + $0x68] sm:$0xff]  ;;  %v2295_v48 = vld [vmem:[%s4888_s30 + $0x78] sm:$0xff] }
 0x1c3   : > { %3239 = vmatmul.msk.f32.gmra.mxu0 %vm922_vm2, %v899_v62  ;;  %3270 = vmatmul.msk.f32.gmra.mxu3 %vm922_vm2, %v574_v12 }
 0x1c4   : > { %3365 = vmatmul.msk.f32.gmra.mxu2 %vm922_vm2, %v1552_v4  ;;  %2354 = vrot.lane.b32.xlu1 %v2293_v0, %s3729_s5  ;;  %v2294_v4 = vld [vmem:[%s4888_s30 + $0x70] sm:$0xff]  ;;  %v3296_v0 = vld [vmem:[%s3795_s27 + $0xe8] sm:$0xff] }
 0x1c5   : > { %2358 = vrot.lane.b32.xlu0 %v2295_v48, %s3729_s5  ;;  %2356 = vrot.lane.b32.xlu2 %v2294_v4, %s3729_s5  ;;  %v1538_v4 = vsel %vm527_vm1, %v4790_v3, %v4988_v6 }
 0x1c7   : > { %v1471_v52 = vpop.permute.xlu2 %1470 }
 0x1c8   : > { %v5018_v54 = vpop.permute.xlu1 %1388  ;;  %v1556_v62 = vsel %vm552_vm3, %v1532_v51, %v1471_v52  ;;  %v1016_v21 = vpop.f32.mrf.mxu0 }
 0x1c9   : > { %v1465_v13 = vpop.permute.xlu0 %1464  ;;  %v1181_v48 = vadd.f32 %v1180_v55, %v1016_v21 }
 0x1ca   : > { %v1553_v23 = vsel %vm552_vm3, %v1529_v33, %v1465_v13 }
 0x1cb   : > { %3240 = vmatmul.msk.f32.gmra.mxu0 %vm922_vm2, %v900_v53  ;;  %3271 = vmatmul.msk.f32.gmra.mxu3 %vm922_vm2, %v575_v59 }
 0x1cc   : > { %3366 = vmatmul.msk.f32.gmra.mxu2 %vm922_vm2, %v1553_v23  ;;  %2360 = vrot.lane.b32.xlu1 %v2296_v45, %s3729_s5  ;;  %v2299_v23 = vld [vmem:[%s4888_s30 + $0x98] sm:$0xff] }
 0x1cd   : > { %2364 = vrot.lane.b32.xlu0 %v2298_v63, %s3729_s5  ;;  %2362 = vrot.lane.b32.xlu2 %v2297_v47, %s3729_s5 }
 0x1cf   : > { %v1473_v12 = vpop.permute.xlu2 %1472 }
 0x1d0   : > { %v1393_v49 = vpop.permute.xlu1 %1392  ;;  %v1557_v61 = vsel %vm552_vm3, %v1533_v8, %v1473_v12  ;;  %v1019_v60 = vpop.f32.mrf.mxu0 }
 0x1d1   : > { %v1467_v50 = vpop.permute.xlu0 %1466  ;;  %v1541_v1 = vsel %vm527_vm1, %v4867_v7, %v1393_v49 }
 0x1d2   : > { %v1554_v28 = vsel %vm552_vm3, %v1530_v29, %v1467_v50  ;;  %v2300_v50 = vld [vmem:[%s4888_s30 + $0xa0] sm:$0xff] }
 0x1d3   : > { %3241 = vmatmul.msk.f32.gmra.mxu0 %vm922_vm2, %v901_v26  ;;  %3272 = vmatmul.msk.f32.gmra.mxu3 %vm922_vm2, %v576_v58  ;;  %v3287_v26 = vld [vmem:[%s3795_s27 + $0xa0] sm:$0xff] }
 0x1d4   : > { %3367 = vmatmul.msk.f32.gmra.mxu2 %vm922_vm2, %v1554_v28  ;;  %2366 = vrot.lane.b32.xlu1 %v2299_v23, %s3729_s5  ;;  %v1536_v38 = vsel %vm527_vm1, %v3287_v26, %v4967_v44  ;;  %v3295_v44 = vld [vmem:[%s3795_s27 + $0xe0] sm:$0xff] }
 0x1d5   : > { %2370 = vrot.lane.b32.xlu0 %v2301_v42, %s3729_s5  ;;  %2368 = vrot.lane.b32.xlu2 %v2300_v50, %s3729_s5 }
 0x1d7   : > { %v1477_v7 = vpop.permute.xlu2 %1476 }
 0x1d8   : > { %v5055_v18 = vpop.permute.xlu1 %1396  ;;  %v1559_v29 = vsel %vm552_vm3, %v1535_v43, %v1477_v7  ;;  %v1022_v41 = vpop.f32.mrf.mxu0 }
 0x1d9   : > { %v1395_v11 = vpop.permute.xlu0 %1394  ;;  %v1543_v39 = vsel %vm527_vm1, %v3294_v40, %v5055_v18 }
 0x1da   : > { %v1542_v32 = vsel %vm527_vm1, %v4902_v19, %v1395_v11  ;;  %v1183_v19 = vpop.f32.mrf.mxu1  ;;  %v3288_v11 = vld [vmem:[%s3795_s27 + $0xa8] sm:$0xff] }
 0x1db   : > { %v1537_v18 = vsel %vm527_vm1, %v3288_v11, %v4998_v20  ;;  %v5155_v20 = vld [vmem:[%s6250_s3] ss:$0 sm:$0xff]  ;;  %v1184_v63 = vadd.f32 %v1183_v19, %v1019_v60 }
 0x1dc   : > { %3368 = vmatmul.msk.f32.gmra.mxu2 %vm922_vm2, %v1555_v17  ;;  %2372 = vrot.lane.b32.xlu1 %v2302_v34, %s3729_s5 }
 0x1dd   : > { %2374 = vrot.lane.b32.xlu2 %v2303_v25, %s3729_s5 }
 0x1df   : > { %v1481_v22 = vpop.permute.xlu2 %1480 }
 0x1e0   : > { %v5067_v9 = vpop.permute.xlu1 %1400  ;;  %v1561_v51 = vsel %vm552_vm3, %v1537_v18, %v1481_v22 }
 0x1e1   : > { %v5072_v10 = vpop.permute.xlu0 %1398  ;;  %v1545_v15 = vsel %vm527_vm1, %v3296_v0, %v5067_v9  ;;  %v3290_v9 = vld [vmem:[%s3795_s27 + $0xb8] sm:$0xff]  ;;  %s3730_s27 = smov 64  }
 0x1e2   : > { %v1186_v36 = vpop.f32.mrf.mxu1  ;;  %v1544_v17 = vsel %vm527_vm1, %v3295_v44, %v5072_v10  ;;  %v1539_v3 = vsel %vm527_vm1, %v3290_v9, %v5018_v54 }
 0x1e4   : > { %3369 = vmatmul.msk.f32.gmra.mxu2 %vm922_vm2, %v1556_v62  ;;  %v1025_v62 = vpop.f32.mrf.mxu0 }
 0x1e7   : > { %v1485_v37 = vpop.permute.xlu2 %1484 }
 0x1e8   : > { %v1487_v30 = vpop.permute.xlu1 %1486 }
 0x1e9   : > { %v1564_v27 = vsel %vm552_vm3, %v1540_v16, %v1487_v30  ;;  %v1475_v35 = vpop.permute.xlu0 %1474 }
 0x1ea   : > { %3377 = vmatmul.msk.f32.vlgmr.msra.gmra.mxu3 %vm922_vm2, %v1564_v27  ;;  %v1558_v59 = vsel %vm552_vm3, %v1534_v14, %v1475_v35  ;;  %v1189_v30 = vpop.f32.mrf.mxu1 }
 0x1eb   : > { %v1190_v43 = vadd.f32 %v1189_v30, %v1025_v62 }
 0x1ec   : > { %3370 = vmatmul.msk.f32.gmra.mxu2 %vm922_vm2, %v1557_v61  ;;  %v1028_v6 = vpop.f32.mrf.mxu0 }
 0x1ef   : > { %v1497_v12 = vpop.permute.xlu2 %1496 }
 0x1f0   : > { %v1489_v33 = vpop.permute.xlu1 %1488  ;;  %v1569_v35 = vsel %vm552_vm3, %v1545_v15, %v1497_v12 }
 0x1f1   : > { %v1479_v13 = vpop.permute.xlu0 %1478  ;;  %v1565_v53 = vsel %vm552_vm3, %v1541_v1, %v1489_v33 }
 0x1f2   : > { %3378 = vmatmul.msk.f32.gmra.mxu3 %vm922_vm2, %v1565_v53  ;;  %v1560_v28 = vsel %vm552_vm3, %v1536_v38, %v1479_v13  ;;  %v1192_v14 = vpop.f32.mrf.mxu1  ;;  %v1563_v13 = vsel %vm552_vm3, %v1539_v3, %v1485_v37  ;;  %v1187_v53 = vadd.f32 %v1186_v36, %v1022_v41 }
 0x1f3   : > { %v1193_v34 = vadd.f32 %v1192_v14, %v1028_v6 }
 0x1f4   : > { %3371 = vmatmul.msk.f32.gmra.mxu2 %vm922_vm2, %v1558_v59  ;;  %v1031_v23 = vpop.f32.mrf.mxu0 }
 0x1f8   : > { %v1491_v2 = vpop.permute.xlu1 %1490 }
 0x1f9   : > { %v1483_v24 = vpop.permute.xlu0 %1482  ;;  %v1566_v49 = vsel %vm552_vm3, %v1542_v32, %v1491_v2 }
 0x1fa   : > { %3379 = vmatmul.msk.f32.gmra.mxu3 %vm922_vm2, %v1566_v49  ;;  %v1562_v27 = vsel %vm552_vm3, %v1538_v4, %v1483_v24  ;;  %v1195_v7 = vpop.f32.mrf.mxu1 }
 0x1fc   : > { %3372 = vmatmul.msk.f32.gmra.mxu2 %vm922_vm2, %v1559_v29  ;;  %v1034_v2 = vpop.f32.mrf.mxu0 }
 0x1fe   : > { %v5127_v58 = vpop.f32.mrf.mxu3 }
 0x200   : > { %v1495_v56 = vpop.permute.xlu1 %1494 }
 0x201   : > { %v1493_v57 = vpop.permute.xlu0 %1492  ;;  %v1568_v31 = vsel %vm552_vm3, %v1544_v17, %v1495_v56 }
 0x202   : > { %v1567_v46 = vsel %vm552_vm3, %v1543_v39, %v1493_v57  ;;  %v1198_v60 = vpop.f32.mrf.mxu1 }
 0x203   : > { %3380 = vmatmul.msk.f32.gmra.mxu3 %vm922_vm2, %v1567_v46  ;;  %v1199_v18 = vadd.f32 %v1198_v60, %v1034_v2 }
 0x204   : > { %3373 = vmatmul.msk.f32.gmra.mxu2 %vm922_vm2, %v1560_v28  ;;  %v1037_v19 = vpop.f32.mrf.mxu0  ;;  %v1196_v28 = vadd.f32 %v1195_v7, %v1031_v23 }
 0x206   : > { %v5145_v52 = vpop.f32.mrf.mxu3 }
 0x20a   : > { %v1201_v40 = vpop.f32.mrf.mxu1 }
 0x20b   : > { %3381 = vmatmul.msk.f32.gmra.mxu3 %vm922_vm2, %v1568_v31  ;;  %v1202_v62 = vadd.f32 %v1201_v40, %v1037_v19 }
 0x20c   : > { %3374 = vmatmul.msk.f32.gmra.mxu2 %vm922_vm2, %v1561_v51  ;;  %v1040_v25 = vpop.f32.mrf.mxu0 }
 0x20e   : > { %v5171_v45 = vpop.f32.mrf.mxu3 }
 0x20f   : > { %v1676_v10 = vpop.f32.mrf.mxu2 }
 0x210   : > { %v1748_v16 = vadd.f32 %v1676_v10, %v1181_v48 }
 0x212   : > { %v5163_v8 = vadd.f32 %v5155_v20, %v1748_v16  ;;  %v1204_v44 = vpop.f32.mrf.mxu1 }
 0x213   : > { %3382 = vmatmul.msk.f32.gmra.mxu3 %vm922_vm2, %v1569_v35 }
 0x214   : > { %3495 = vtanh.f32 %v5163_v8  ;;  %3375 = vmatmul.msk.f32.gmra.mxu2 %vm922_vm2, %v1562_v27  ;;  %v1043_v31 = vpop.f32.mrf.mxu0  ;;  %v1205_v27 = vadd.f32 %v1204_v44, %v1040_v25 }
 0x216   : > { %v5182_v55 = vpop.f32.mrf.mxu3 }
 0x217   : > { %v1679_v61 = vpop.f32.mrf.mxu2 }
 0x218   : > { %v1749_v1 = vadd.f32 %v1679_v61, %v1184_v63 }
 0x21a   : > { %v3496_v21 = vpop.eup %3495  ;;  %v5176_v33 = vadd.f32 %v5155_v20, %v1749_v1  ;;  %v1207_v48 = vpop.f32.mrf.mxu1 }
 0x21b   : > { %2448 = vrot.lane.b32.xlu0 %v3496_v21, %s3729_s5  ;;  %v1208_v1 = vadd.f32 %v1207_v48, %v1043_v31 }
 0x21c   : > { %3497 = vtanh.f32 %v5176_v33  ;;  %3376 = vmatmul.msk.f32.gmra.mxu2 %vm922_vm2, %v1563_v13  ;;  %v1046_v4 = vpop.f32.mrf.mxu0 }
 0x21e   : > { %v5189_v5 = vpop.f32.mrf.mxu3 }
 0x21f   : > { %v1682_v59 = vpop.f32.mrf.mxu2 }
 0x220   : > { %v1750_v54 = vadd.f32 %v1682_v59, %v1187_v53 }
 0x222   : > { %v3498_v47 = vpop.eup %3497  ;;  %v5185_v42 = vadd.f32 %v5155_v20, %v1750_v54  ;;  %v1210_v35 = vpop.f32.mrf.mxu1 }
 0x223   : > { %2450 = vrot.lane.b32.xlu1 %v3498_v47, %s3729_s5  ;;  %v5234_v47 = vpop.permute.xlu0 %2328  ;;  %v1211_v7 = vadd.f32 %v1210_v35, %v1046_v4 }
 0x224   : > { %3499 = vtanh.f32 %v5185_v42  ;;  %v1049_v21 = vpop.f32.mrf.mxu0 }
 0x226   : > { %v5195_v50 = vpop.f32.mrf.mxu3 }
 0x22a   : > { %v3500_v32 = vpop.eup %3499  ;;  %v1213_v53 = vpop.f32.mrf.mxu1 }
 0x22b   : > { %2452 = vrot.lane.b32.xlu2 %v3500_v32, %s3729_s5  ;;  %v5245_v19 = vpop.permute.xlu0 %2334 }
 0x22c   : > { %v1052_v2 = vpop.f32.mrf.mxu0 }
 0x22d   : > { %v1685_v24 = vpop.f32.mrf.mxu2 }
 0x22e   : > { %v1751_v49 = vadd.f32 %v1685_v24, %v1190_v43  ;;  %v5203_v57 = vpop.f32.mrf.mxu3  ;;  %v5240_v24 = vpop.permute.xlu1 %2330 }
 0x230   : > { %v5193_v29 = vadd.f32 %v5155_v20, %v1751_v49 }
 0x232   : > { %3501 = vtanh.f32 %v5193_v29 }
 0x233   : > { %v5258_v44 = vpop.permute.xlu0 %2340 }
 0x234   : > { %v1055_v25 = vpop.f32.mrf.mxu0 }
 0x235   : > { %v1688_v22 = vpop.f32.mrf.mxu2 }
 0x236   : > { %v1752_v26 = vadd.f32 %v1688_v22, %v1193_v34  ;;  %v5210_v37 = vpop.f32.mrf.mxu3  ;;  %v1216_v34 = vpop.f32.mrf.mxu1  ;;  %v1214_v22 = vadd.f32 %v1213_v53, %v1049_v21  ;;  %v3383_v21 = vmul.f32 -1.442695, %v5163_v8  ;;  %v3386_v8 = vmul.f32 -1.442695, %v5193_v29 }
 0x238   : > { %v3502_v38 = vpop.eup %3501  ;;  %v5199_v39 = vadd.f32 %v5155_v20, %v1752_v26 }
 0x239   : > { %2454 = vrot.lane.b32.xlu0 %v3502_v38, %s3729_s5  ;;  %v5251_v38 = vpop.permute.xlu2 %2332 }
 0x23a   : > { %3503 = vtanh.f32 %v5199_v39 }
 0x23b   : > { %v5271_v4 = vpop.permute.xlu0 %2346 }
 0x23d   : > { %v1691_v46 = vpop.f32.mrf.mxu2 }
 0x23e   : > { %v1753_v41 = vadd.f32 %v1691_v46, %v1196_v28  ;;  %v5217_v12 = vpop.f32.mrf.mxu3 }
 0x240   : > { %v3504_v11 = vpop.eup %3503  ;;  %v5206_v36 = vadd.f32 %v5155_v20, %v1753_v41  ;;  %v5253_v41 = vpop.permute.xlu1 %2336 }
 0x241   : > { %2456 = vrot.lane.b32.xlu1 %v3504_v11, %s3729_s5  ;;  %v5262_v31 = vpop.permute.xlu2 %2338 }
 0x242   : > { %3505 = vtanh.f32 %v5206_v36 }
 0x246   : > { %v5227_v6 = vpop.f32.mrf.mxu3 }
 0x247   : > { %v1694_v56 = vpop.f32.mrf.mxu2 }
 0x248   : > { %v1754_v17 = vadd.f32 %v1694_v56, %v1199_v18  ;;  %v3506_v51 = vpop.eup %3505  ;;  %v1219_v18 = vpop.f32.mrf.mxu1  ;;  %v1217_v56 = vadd.f32 %v1216_v34, %v1052_v2 }
 0x249   : > { %2458 = vrot.lane.b32.xlu2 %v3506_v51, %s3729_s5 }
 0x24a   : > { %v5213_v0 = vadd.f32 %v5155_v20, %v1754_v17 }
 0x24c   : > { %3507 = vtanh.f32 %v5213_v0 }
 0x24e   : > { %v5238_v23 = vpop.f32.mrf.mxu3 }
 0x24f   : > { %v1697_v10 = vpop.f32.mrf.mxu2 }
 0x250   : > { %v1755_v15 = vadd.f32 %v1697_v10, %v1202_v62  ;;  %v5264_v10 = vpop.permute.xlu1 %2342  ;;  %v1222_v35 = vpop.f32.mrf.mxu1 }
 0x252   : > { %v3508_v16 = vpop.eup %3507  ;;  %v5220_v30 = vadd.f32 %v5155_v20, %v1755_v15 }
 0x253   : > { %2460 = vrot.lane.b32.xlu0 %v3508_v16, %s3729_s5  ;;  %v1058_v16 = vpop.f32.mrf.mxu0 }
 0x254   : > { %3509 = vtanh.f32 %v5220_v30 }
 0x256   : > { %v5249_v26 = vpop.f32.mrf.mxu3 }
 0x257   : > { %v1700_v9 = vpop.f32.mrf.mxu2 }
 0x258   : > { %v1756_v63 = vadd.f32 %v1700_v9, %v1205_v27  ;;  %v1220_v27 = vadd.f32 %v1219_v18, %v1055_v25  ;;  %v5282_v53 = vpop.permute.xlu1 %2348  ;;  %v3385_v25 = vmul.f32 -1.442695, %v5185_v42  ;;  %v1235_v42 = vadd.f32 %v5203_v57, %v5127_v58 }
 0x259   : > { %v3389_v57 = vmul.f32 -1.442695, %v5213_v0 }
 0x25a   : > { %v3510_v61 = vpop.eup %3509  ;;  %v5225_v3 = vadd.f32 %v5155_v20, %v1756_v63 }
 0x25b   : > { %2462 = vrot.lane.b32.xlu1 %v3510_v61, %s3729_s5 }
 0x25c   : > { %3511 = vtanh.f32 %v5225_v3 }
 0x25f   : > { %v1703_v14 = vpop.f32.mrf.mxu2 }
 0x260   : > { %v1757_v13 = vadd.f32 %v1703_v14, %v1208_v1  ;;  %v5276_v14 = vpop.permute.xlu2 %2344  ;;  %v5298_v18 = vpop.permute.xlu1 %2354 }
 0x261   : > { %6354 = vst [vmem:[#allocation12_spill] sm:$0xff] %v5298_v18 }
 0x262   : > { %v3512_v59 = vpop.eup %3511  ;;  %v5232_v54 = vadd.f32 %v5155_v20, %v1757_v13 }
 0x263   : > { %2464 = vrot.lane.b32.xlu2 %v3512_v59, %s3729_s5  ;;  %v1061_v59 = vpop.f32.mrf.mxu0 }
 0x264   : > { %3513 = vtanh.f32 %v5232_v54 }
 0x267   : > { %v1706_v32 = vpop.f32.mrf.mxu2 }
 0x268   : > { %v1758_v43 = vadd.f32 %v1706_v32, %v1211_v7  ;;  %v3384_v7 = vmul.f32 -1.442695, %v5176_v33  ;;  %v5286_v32 = vpop.permute.xlu0 %2352 }
 0x26a   : > { %v3514_v60 = vpop.eup %3513  ;;  %v5243_v49 = vadd.f32 %v5155_v20, %v1758_v43  ;;  %v1223_v43 = vadd.f32 %v1222_v35, %v1058_v16 }
 0x26b   : > { %2466 = vrot.lane.b32.xlu0 %v3514_v60, %s3729_s5  ;;  %v1225_v60 = vpop.f32.mrf.mxu1  ;;  %v1064_v16 = vpop.f32.mrf.mxu0 }
 0x26c   : > { %3515 = vtanh.f32 %v5243_v49 }
 0x26d   : > { %v1730_v17 = vpop.f32.mrf.mxu3 }
 0x26f   : > { %v1709_v40 = vpop.f32.mrf.mxu2 }
 0x270   : > { %v1759_v28 = vadd.f32 %v1709_v40, %v1214_v22 }
 0x272   : > { %v3516_v46 = vpop.eup %3515  ;;  %v5256_v11 = vadd.f32 %v5155_v20, %v1759_v28 }
 0x273   : > { %2468 = vrot.lane.b32.xlu1 %v3516_v46, %s3729_s5  ;;  %v5292_v46 = vpop.permute.xlu2 %2350 }
 0x274   : > { %3517 = vtanh.f32 %v5256_v11 }
 0x275   : > { %v5273_v61 = vpop.f32.mrf.mxu3 }
 0x277   : > { %v1712_v51 = vpop.f32.mrf.mxu2 }
 0x278   : > { %v1760_v48 = vadd.f32 %v1712_v51, %v1217_v56  ;;  %v1226_v56 = vadd.f32 %v1225_v60, %v1061_v59 }
 0x27a   : > { %v3518_v62 = vpop.eup %3517  ;;  %v5267_v15 = vadd.f32 %v5155_v20, %v1760_v48  ;;  %v3387_v48 = vmul.f32 -1.442695, %v5199_v39 }
 0x27b   : > { %2470 = vrot.lane.b32.xlu2 %v3518_v62, %s3729_s5  ;;  %v5319_v60 = vpop.permute.xlu2 %2356 }
 0x27c   : > { %3519 = vtanh.f32 %v5267_v15 }
 0x27d   : > { %v5289_v40 = vpop.f32.mrf.mxu3 }
 0x27f   : > { %v1715_v9 = vpop.f32.mrf.mxu2 }
 0x280   : > { %v1761_v63 = vadd.f32 %v1715_v9, %v1220_v27  ;;  %v5304_v27 = vpop.permute.xlu0 %2358 }
 0x281   : > { %6355 = vst [vmem:[#allocation13_spill] sm:$0xff] %v5304_v27 }
 0x282   : > { %v3520_v1 = vpop.eup %3519  ;;  %v5279_v13 = vadd.f32 %v5155_v20, %v1761_v63  ;;  %v1228_v63 = vpop.f32.mrf.mxu1 }
 0x283   : > { %2472 = vrot.lane.b32.xlu0 %v3520_v1, %s3729_s5 }
 0x284   : > { %3521 = vtanh.f32 %v5279_v13 }
 0x285   : > { %3523 = vpow2.f32 %v3383_v21 }
 0x286   : > { %3525 = vpow2.f32 %v3384_v7  ;;  %v1766_v7 = vadd.f32 %v1730_v17, %v1235_v42 }
 0x287   : > { %v1718_v2 = vpop.f32.mrf.mxu2  ;;  %3527 = vpow2.f32 %v3386_v8  ;;  %v3388_v8 = vmul.f32 -1.442695, %v5206_v36 }
 0x288   : > { %v1762_v22 = vadd.f32 %v1718_v2, %v1223_v43  ;;  %v1739_v2 = vpop.f32.mrf.mxu3  ;;  %v1229_v43 = vadd.f32 %v1228_v63, %v1064_v16  ;;  %v5331_v36 = vadd.f32 %v5155_v20, %v1766_v7  ;;  %v1067_v16 = vpop.f32.mrf.mxu0 }
 0x28a   : > { %v3522_v34 = vpop.eup %3521  ;;  %v5295_v33 = vadd.f32 %v5155_v20, %v1762_v22  ;;  %v5323_v22 = vpop.permute.xlu1 %2360 }
 0x28b   : > { %2474 = vrot.lane.b32.xlu1 %v3522_v34, %s3729_s5  ;;  %v3524_v28 = vpop.eup %3523  ;;  %6356 = vst [vmem:[#allocation5_spill] sm:$0xff] %v5323_v22 }
 0x28c   : > { %3529 = vtanh.f32 %v5295_v33  ;;  %v5301_v29 = vadd.f32 1.0, %v3524_v28  ;;  %v3526_v62 = vpop.eup %3525 }
 0x28d   : > { %3531 = vpow2.f32 %v3385_v25  ;;  %v3528_v9 = vpop.eup %3527  ;;  %v5312_v59 = vadd.f32 1.0, %v3526_v62  ;;  %v1238_v25 = vadd.f32 %v5210_v37, %v5145_v52  ;;  %v1244_v62 = vadd.f32 %v5227_v6, %v5182_v55  ;;  %v1231_v37 = vpop.f32.mrf.mxu1 }
 0x28e   : > { %3533 = vrcp.f32 %v5301_v29  ;;  %v5314_v39 = vadd.f32 1.0, %v3528_v9  ;;  %v5341_v9 = vpop.permute.xlu0 %2364  ;;  %v3390_v6 = vmul.f32 -1.442695, %v5220_v30  ;;  %v1241_v30 = vadd.f32 %v5217_v12, %v5171_v45 }
 0x28f   : > { %v1721_v51 = vpop.f32.mrf.mxu2  ;;  %3535 = vpow2.f32 %v3387_v48  ;;  %6357 = vst [vmem:[#allocation2_spill] sm:$0xff] %v5341_v9  ;;  %v1769_v42 = vadd.f32 %v1739_v2, %v1244_v62  ;;  %v1247_v62 = vadd.f32 %v5238_v23, %v5189_v5  ;;  %vm1901_vm5 = vweird.f32 %v5301_v29 }
 0x290   : > { %v1763_v35 = vadd.f32 %v1721_v51, %v1226_v56  ;;  %v1768_v45 = vadd.f32 %v5289_v40, %v1241_v30  ;;  %vm1916_vm9 = vweird.f32 %v5312_v59  ;;  %vm1946_vm13 = vweird.f32 %v5314_v39 }
 0x292   : > { %v5310_v1 = vadd.f32 %v5155_v20, %v1763_v35  ;;  %v3530_v21 = vpop.eup %3529  ;;  %v1767_v35 = vadd.f32 %v5273_v61, %v1238_v25  ;;  %v1232_v61 = vadd.f32 %v1231_v37, %v1067_v16  ;;  %v3391_v16 = vmul.f32 -1.442695, %v5225_v3 }
 0x293   : > { %2476 = vrot.lane.b32.xlu2 %v3530_v21, %s3729_s5  ;;  %v3532_v58 = vpop.eup %3531 }
 0x294   : > { %3537 = vtanh.f32 %v5310_v1  ;;  %v5325_v17 = vpop.eup %3533  ;;  %v5333_v51 = vadd.f32 1.0, %v3532_v58  ;;  %v5357_v7 = vadd.f32 %v5155_v20, %v1767_v35  ;;  %v5372_v35 = vpop.permute.xlu1 %2366 }
 0x295   : > { %3539 = vrcp.f32 %v5312_v59  ;;  %v3536_v56 = vpop.eup %3535  ;;  %v1897_v52 = vmul.f32 %v5325_v17, %v5301_v29  ;;  %6359 = vst [vmem:[#allocation24_spill] sm:$0xff] %v5372_v35  ;;  %vm1902_vm4 = vweird.f32 %v5325_v17  ;;  %v3394_v35 = vmul.f32 -1.442695, %v5256_v11 }
 0x296   : > { %3541 = vrcp.f32 %v5314_v39  ;;  %v5347_v63 = vadd.f32 1.0, %v3536_v56  ;;  %v5367_v56 = vadd.f32 %v5155_v20, %v1769_v42  ;;  %v5387_v23 = vpop.permute.xlu0 %2370  ;;  %vm5418_vm6 = vmor %vm1901_vm5, %vm1902_vm4  ;;  %vm1931_vm15 = vweird.f32 %v5333_v51 }
 0x297   : > { %v1724_v34 = vpop.f32.mrf.mxu2  ;;  %3543 = vpow2.f32 %v3388_v8  ;;  %v1742_v8 = vpop.f32.mrf.mxu3  ;;  %6360 = vst [vmem:[#allocation15_spill] sm:$0xff] %v5387_v23 }
 0x298   : > { %v1764_v28 = vadd.f32 %v1724_v34, %v1229_v43  ;;  %3545 = vpow2.f32 %v3389_v57  ;;  %v1898_v57 = vsub.f32 1.0, %v1897_v52  ;;  %v5359_v34 = vpop.permute.xlu2 %2362  ;;  %vm1961_vm5 = vweird.f32 %v5347_v63 }
 0x299   : > { %6358 = vst [vmem:[#allocation14_spill] sm:$0xff] %v5359_v34  ;;  %v3393_v34 = vmul.f32 -1.442695, %v5243_v49  ;;  %v1967_v49 = vand.u32 2147483648, %v5347_v63 }
 0x29a   : > { %v5336_v0 = vadd.f32 %v5155_v20, %v1764_v28  ;;  %v3538_v48 = vpop.eup %3537  ;;  %v1899_v42 = vmul.f32 %v5325_v17, %v1898_v57  ;;  %v5399_v57 = vadd.f32 %v5155_v20, %v1768_v45 }
 0x29b   : > { %2478 = vrot.lane.b32.xlu0 %v3538_v48, %s3729_s5  ;;  %v5350_v55 = vpop.eup %3539 }
 0x29c   : > { %3547 = vtanh.f32 %v5336_v0  ;;  %v5354_v21 = vpop.eup %3541  ;;  %v1912_v25 = vmul.f32 %v5350_v55, %v5312_v59  ;;  %vm1917_vm8 = vweird.f32 %v5350_v55 }
 0x29d   : > { %3549 = vtanh.f32 %v5331_v36  ;;  %v3544_v58 = vpop.eup %3543  ;;  %v1942_v40 = vmul.f32 %v5354_v21, %v5314_v39  ;;  %vm5460_vm10 = vmor %vm1916_vm9, %vm1917_vm8  ;;  %vm1947_vm11 = vweird.f32 %v5354_v21 }
 0x29e   : > { %3551 = vrcp.f32 %v5333_v51  ;;  %v3546_v2 = vpop.eup %3545  ;;  %v1913_v5 = vsub.f32 1.0, %v1912_v25  ;;  %vm5495_vm0 = vmor %vm1946_vm13, %vm1947_vm11 }
 0x29f   : > { %v1727_v43 = vpop.f32.mrf.mxu2  ;;  %3553 = vrcp.f32 %v5347_v63  ;;  %v5385_v3 = vadd.f32 1.0, %v3546_v2  ;;  %v1900_v2 = vadd.f32 %v5325_v17, %v1899_v42  ;;  %v1943_v45 = vsub.f32 1.0, %v1942_v40  ;;  %v5433_v40 = vpop.permute.xlu1 %2372 }
 0x2a0   : > { %v1765_v28 = vadd.f32 %v1727_v43, %v1232_v61  ;;  %3555 = vpow2.f32 %v3390_v6  ;;  %v1770_v6 = vadd.f32 %v1742_v8, %v1247_v62  ;;  %v5390_v61 = vadd.f32 1.0, %v3544_v58  ;;  %v1745_v62 = vpop.f32.mrf.mxu3  ;;  %v5414_v23 = vpop.permute.xlu2 %2368  ;;  %6365 = vst [vmem:[#allocation17_spill] sm:$0xff] %v5433_v40 }
 0x2a1   : > { %3557 = vtanh.f32 %v5357_v7  ;;  %v1905_v58 = vand.u32 2147483647, %v5301_v29  ;;  %v1250_v42 = vadd.f32 %v5249_v26, %v5195_v50  ;;  %v1904_v50 = vsel %vm5418_vm6, %v5325_v17, %v1900_v2 }
 0x2a2   : > { %v3548_v48 = vpop.eup %3547  ;;  %v5375_v52 = vadd.f32 %v5155_v20, %v1765_v28  ;;  %v5405_v25 = vadd.f32 %v5155_v20, %v1770_v6  ;;  %v1944_v2 = vmul.f32 %v5354_v21, %v1943_v45  ;;  %v1922_v45 = vand.u32 2147483648, %v5312_v59 }
 0x2a3   : > { %v3550_v37 = vpop.eup %3549  ;;  %2480 = vrot.lane.b32.xlu1 %v3548_v48, %s3729_s5  ;;  %v1914_v48 = vmul.f32 %v5350_v55, %v1913_v5  ;;  %vm5429_vm7 = vcmp.eq.f32.partialorder %v1905_v58, 8.507059e+37  ;;  %v1771_v11 = vadd.f32 %v1745_v62, %v1250_v42  ;;  %v3392_v58 = vmul.f32 -1.442695, %v5232_v54 }
 0x2a4   : > { %v5380_v12 = vpop.eup %3551  ;;  %3559 = vtanh.f32 %v5375_v52  ;;  %2484 = vrot.lane.b32.xlu0 %v3550_v37, %s3729_s5  ;;  %v1907_v37 = vand.u32 2147483648, %v5301_v29  ;;  %v1920_v62 = vand.u32 2147483647, %v5312_v59  ;;  %v1945_v40 = vadd.f32 %v5354_v21, %v1944_v2 }
 0x2a5   : > { %3561 = vtanh.f32 %v5367_v56  ;;  %v5394_v43 = vpop.eup %3553  ;;  %v1927_v8 = vmul.f32 %v5380_v12, %v5333_v51  ;;  %vm1932_vm12 = vweird.f32 %v5380_v12 }
 0x2a6   : > { %3563 = vpow2.f32 %v3391_v16  ;;  %v3556_v28 = vpop.eup %3555  ;;  %v1957_v22 = vmul.f32 %v5394_v43, %v5347_v63  ;;  %v1908_v17 = vor.u32 1.1754944e-38, %v1907_v37  ;;  %vm1921_vm14 = vcmp.eq.f32.partialorder %v1920_v62, 8.507059e+37  ;;  %vm5502_vm1 = vmor %vm1931_vm15, %vm1932_vm12 }
 0x2a7   : > { %v3558_v30 = vpop.eup %3557  ;;  %3565 = vrcp.f32 %v5385_v3  ;;  %v1928_v5 = vsub.f32 1.0, %v1927_v8  ;;  %v1915_v8 = vadd.f32 %v5350_v55, %v1914_v48  ;;  %vm1962_vm3 = vweird.f32 %v5394_v43 }
 0x2a8   : > { %3567 = vrcp.f32 %v5390_v61  ;;  %v5456_v37 = vsel %vm5429_vm7, %v1908_v17, %v1904_v50  ;;  %v1958_v50 = vsub.f32 1.0, %v1957_v22  ;;  %v1950_v22 = vand.u32 2147483647, %v5314_v39  ;;  %v5488_v2 = vpop.permute.xlu2 %2374  ;;  %vm5539_vm6 = vmor %vm1961_vm5, %vm1962_vm3 }
 0x2a9   : > { %3569 = vtanh.f32 %v5399_v57  ;;  %v1929_v48 = vmul.f32 %v5380_v12, %v1928_v5  ;;  %v1937_v5 = vand.u32 2147483648, %v5333_v51  ;;  %v1919_v26 = vsel %vm5460_vm10, %v5350_v55, %v1915_v8  ;;  %6368 = vst [vmem:[#allocation18_spill] sm:$0xff] %v5488_v2 }
 0x2aa   : > { %v3560_v16 = vpop.eup %3559  ;;  %3571 = vtanh.f32 %v5405_v25  ;;  %v1952_v55 = vand.u32 2147483648, %v5314_v39  ;;  %v1959_v54 = vmul.f32 %v5394_v43, %v1958_v50  ;;  %vm1951_vm2 = vcmp.eq.f32.partialorder %v1950_v22, 8.507059e+37 }
 0x2ab   : > { %v3562_v6 = vpop.eup %3561  ;;  %2482 = vrot.lane.b32.xlu2 %v3560_v16, %s3729_s5  ;;  %2486 = vrot.lane.b32.xlu1 %v3558_v30, %s3729_s5  ;;  %v5439_v30 = vadd.f32 1.0, %v3556_v28  ;;  %3573 = vpow2.f32 %v3394_v35  ;;  %v2449_v28 = vpop.permute.xlu0 %2448  ;;  %v1938_v62 = vor.u32 1.1754944e-38, %v1937_v5  ;;  %vm1991_vm10 = vweird.f32 %v5385_v3 }
 0x2ac   : > { %v3564_v29 = vpop.eup %3563  ;;  %2490 = vrot.lane.b32.xlu0 %v3562_v6, %s3729_s5  ;;  %v1953_v2 = vor.u32 1.1754944e-38, %v1952_v55  ;;  %vm1976_vm12 = vweird.f32 %v5390_v61 }
 0x2ad   : > { %v5446_v16 = vpop.eup %3565  ;;  %v5450_v42 = vadd.f32 1.0, %v3564_v29  ;;  %v5467_v29 = vadd.f32 %v5155_v20, %v1771_v11  ;;  %3575 = vrcp.f32 %v5439_v30  ;;  %v2520_v20 = vmul.f32 %v2449_v28, %v5456_v37 }
 0x2ae   : > { %v5452_v6 = vpop.eup %3567  ;;  %v1987_v59 = vmul.f32 %v5446_v16, %v5385_v3  ;;  %3577 = vpow2.f32 %v3392_v58  ;;  %v1930_v11 = vadd.f32 %v5380_v12, %v1929_v48  ;;  %v1923_v48 = vor.u32 1.1754944e-38, %v1922_v45 }
 0x2af   : > { %v3570_v35 = vpop.eup %3569  ;;  %3579 = vrcp.f32 %v5450_v42  ;;  %v1972_v8 = vmul.f32 %v5452_v6, %v5390_v61  ;;  %v1949_v45 = vsel %vm5495_vm0, %v5354_v21, %v1945_v40  ;;  %v1965_v28 = vand.u32 2147483647, %v5347_v63 }
 0x2b0   : > { %v3572_v17 = vpop.eup %3571  ;;  %3581 = vtanh.f32 %v5467_v29  ;;  %v5512_v9 = vsel %vm1921_vm14, %v1923_v48, %v1919_v26  ;;  %v1934_v50 = vsel %vm5502_vm1, %v5380_v12, %v1930_v11  ;;  %v1960_v26 = vadd.f32 %v5394_v43, %v1959_v54 }
 0x2b1   : > { %v3574_v58 = vpop.eup %3573  ;;  %v1973_v5 = vsub.f32 1.0, %v1972_v8  ;;  %3583 = vpow2.f32 %v3393_v34  ;;  %vm1966_vm7 = vcmp.eq.f32.partialorder %v1965_v28, 8.507059e+37  ;;  %v1968_v54 = vor.u32 1.1754944e-38, %v1967_v49 }
 0x2b2   : > { %v5519_v21 = vadd.f32 1.0, %v3574_v58  ;;  %vm1992_vm8 = vweird.f32 %v5446_v16  ;;  %vm1977_vm9 = vweird.f32 %v5452_v6  ;;  %vm2006_vm1 = vweird.f32 %v5439_v30 }
 0x2b3   : > { %2488 = vrot.lane.b32.xlu2 %v3570_v35, %s3729_s5  ;;  %2492 = vrot.lane.b32.xlu1 %v3572_v17, %s3729_s5  ;;  %v1935_v35 = vand.u32 2147483647, %v5333_v51  ;;  %v1988_v17 = vsub.f32 1.0, %v1987_v59  ;;  %v5510_v27 = vpop.eup %3575  ;;  %v2455_v18 = vpop.permute.xlu0 %2454  ;;  %v5523_v59 = vsel %vm1951_vm2, %v1953_v2, %v1949_v45  ;;  %v1974_v58 = vmul.f32 %v5452_v6, %v1973_v5  ;;  %vm5563_vm11 = vmor %vm1991_vm10, %vm1992_vm8 }
 0x2b4   : > { %2568 = vrot.lane.b32.xlu0 %v2520_v20, %s3729_s5  ;;  %v2451_v20 = vpop.permute.xlu1 %2450  ;;  %v3578_v51 = vpop.eup %3577  ;;  %v2002_v8 = vmul.f32 %v5510_v27, %v5439_v30  ;;  %v2523_v22 = vmul.f32 %v2455_v18, %v5523_v59  ;;  %3585 = vrcp.f32 %v5519_v21  ;;  %v1964_v18 = vsel %vm5539_vm6, %v5394_v43, %v1960_v26  ;;  %vm5580_vm13 = vmor %vm1976_vm12, %vm1977_vm9 }
 0x2b5   : > { %v5521_v40 = vpop.eup %3579  ;;  %v2521_v12 = vmul.f32 %v2451_v20, %v5512_v9  ;;  %v1989_v55 = vmul.f32 %v5446_v16, %v1988_v17  ;;  %vm1936_vm4 = vcmp.eq.f32.partialorder %v1935_v35, 8.507059e+37  ;;  %v5548_v63 = vadd.f32 1.0, %v3578_v51 }
 0x2b6   : > { %v3582_v11 = vpop.eup %3581  ;;  %v5536_v2 = vsel %vm1936_vm4, %v1938_v62, %v1934_v50  ;;  %v2017_v34 = vmul.f32 %v5521_v40, %v5450_v42  ;;  %v2003_v35 = vsub.f32 1.0, %v2002_v8  ;;  %v2453_v62 = vpop.permute.xlu2 %2452  ;;  %v1980_v17 = vand.u32 2147483647, %v5390_v61 }
 0x2b7   : > { %v1990_v39 = vadd.f32 %v5446_v16, %v1989_v55  ;;  %v1982_v43 = vand.u32 2147483648, %v5390_v61  ;;  %v1997_v20 = vand.u32 2147483648, %v5385_v3  ;;  %v1975_v50 = vadd.f32 %v5452_v6, %v1974_v58  ;;  %v3584_v28 = vpop.eup %3583 }
 0x2b8   : > { %v5559_v51 = vsel %vm1966_vm7, %v1968_v54, %v1964_v18  ;;  %v1995_v5 = vand.u32 2147483647, %v5385_v3  ;;  %3587 = vrcp.f32 %v5548_v63  ;;  %v2018_v49 = vsub.f32 1.0, %v2017_v34 }
 0x2b9   : > { %v1994_v3 = vsel %vm5563_vm11, %v5446_v16, %v1990_v39  ;;  %v2004_v8 = vmul.f32 %v5510_v27, %v2003_v35  ;;  %v1998_v48 = vor.u32 1.1754944e-38, %v1997_v20  ;;  %v1979_v61 = vsel %vm5580_vm13, %v5452_v6, %v1975_v50 }
 0x2ba   : > { %v5570_v55 = vpop.eup %3585  ;;  %vm1981_vm14 = vcmp.eq.f32.partialorder %v1980_v17, 8.507059e+37  ;;  %v1983_v16 = vor.u32 1.1754944e-38, %v1982_v43  ;;  %vm1996_vm15 = vcmp.eq.f32.partialorder %v1995_v5, 8.507059e+37  ;;  %v2019_v34 = vmul.f32 %v5521_v40, %v2018_v49 }
 0x2bb   : > { %2494 = vrot.lane.b32.xlu2 %v3582_v11, %s3729_s5  ;;  %2570 = vrot.lane.b32.xlu1 %v2521_v12, %s3729_s5  ;;  %v2522_v12 = vmul.f32 %v2453_v62, %v5536_v2  ;;  %v5589_v18 = vsel %vm1996_vm15, %v1998_v48, %v1994_v3  ;;  %v2062_v39 = vmul.f32 %v5570_v55, %v5519_v21  ;;  %vm2007_vm0 = vweird.f32 %v5510_v27 }
 0x2bc   : > { %2574 = vrot.lane.b32.xlu0 %v2523_v22, %s3729_s5  ;;  %v2457_v45 = vpop.permute.xlu1 %2456  ;;  %v3397_v22 = vmul.f32 -1.442695, %v5295_v33  ;;  %v5591_v33 = vadd.f32 1.0, %v3584_v28  ;;  %v2005_v35 = vadd.f32 %v5510_v27, %v2004_v8  ;;  %v5601_v17 = vsel %vm1981_vm14, %v1983_v16, %v1979_v61  ;;  %vm5609_vm3 = vmor %vm2006_vm1, %vm2007_vm0 }
 0x2bd   : > { %v2524_v11 = vmul.f32 %v2457_v45, %v5559_v51  ;;  %v2012_v43 = vand.u32 2147483648, %v5439_v30  ;;  %v2010_v20 = vand.u32 2147483647, %v5439_v30  ;;  %v3395_v50 = vmul.f32 -1.442695, %v5267_v15 }
 0x2be   : > { %3589 = vpow2.f32 %v3397_v22  ;;  %v2459_v62 = vpop.permute.xlu2 %2458  ;;  %v5599_v45 = vpop.eup %3587  ;;  %vm2022_vm2 = vweird.f32 %v5521_v40  ;;  %v2020_v26 = vadd.f32 %v5521_v40, %v2019_v34  ;;  %v2009_v30 = vsel %vm5609_vm3, %v5510_v27, %v2005_v35 }
 0x2bf   : > { %3591 = vrcp.f32 %v5591_v33  ;;  %v2525_v28 = vmul.f32 %v2459_v62, %v5601_v17  ;;  %v2032_v15 = vmul.f32 %v5599_v45, %v5548_v63  ;;  %v2013_v49 = vor.u32 1.1754944e-38, %v2012_v43 }
 0x2c0   : > { %vm2021_vm4 = vweird.f32 %v5450_v42  ;;  %v2025_v3 = vand.u32 2147483647, %v5450_v42  ;;  %vm2011_vm5 = vcmp.eq.f32.partialorder %v2010_v20, 8.507059e+37  ;;  %3593 = vpow2.f32 %v3395_v50 }
 0x2c1   : > { %vm2023_vm6 = vmor %vm2021_vm4, %vm2022_vm2  ;;  %v5627_v22 = vsel %vm2011_vm5, %v2013_v49, %v2009_v30  ;;  %v2033_v61 = vsub.f32 1.0, %v2032_v15  ;;  %v3396_v35 = vmul.f32 -1.442695, %v5279_v13  ;;  %vm2067_vm8 = vweird.f32 %v5570_v55 }
 0x2c2   : > { %v2024_v27 = vsel %vm2023_vm6, %v5521_v40, %v2020_v26  ;;  %vm2026_vm7 = vcmp.eq.f32.partialorder %v2025_v3, 8.507059e+37  ;;  %v2072_v5 = vand.u32 2147483648, %v5519_v21  ;;  %vm2066_vm9 = vweird.f32 %v5519_v21 }
 0x2c3   : > { %2572 = vrot.lane.b32.xlu2 %v2522_v12, %s3729_s5  ;;  %2576 = vrot.lane.b32.xlu1 %v2524_v11, %s3729_s5  ;;  %v2063_v12 = vsub.f32 1.0, %v2062_v39  ;;  %v2027_v11 = vand.u32 2147483648, %v5450_v42  ;;  %v2034_v20 = vmul.f32 %v5599_v45, %v2033_v61  ;;  %v2070_v13 = vand.u32 2147483647, %v5519_v21  ;;  %vm2068_vm10 = vmor %vm2066_vm9, %vm2067_vm8 }
 0x2c4   : > { %v3590_v8 = vpop.eup %3589  ;;  %vm2037_vm11 = vweird.f32 %v5599_v45  ;;  %v2073_v15 = vor.u32 1.1754944e-38, %v2072_v5  ;;  %v2042_v49 = vand.u32 2147483648, %v5548_v63  ;;  %vm2036_vm13 = vweird.f32 %v5548_v63 }
 0x2c5   : > { %v2461_v54 = vpop.permute.xlu0 %2460  ;;  %v2064_v48 = vmul.f32 %v5570_v55, %v2063_v12  ;;  %v2028_v16 = vor.u32 1.1754944e-38, %v2027_v11  ;;  %v5634_v39 = vadd.f32 1.0, %v3590_v8  ;;  %v2035_v12 = vadd.f32 %v5599_v45, %v2034_v20  ;;  %vm2038_vm14 = vmor %vm2036_vm13, %vm2037_vm11 }
 0x2c6   : > { %v2526_v6 = vmul.f32 %v2461_v54, %v5589_v18  ;;  %v2465_v34 = vpop.permute.xlu2 %2464  ;;  %v5632_v54 = vpop.eup %3591  ;;  %vm2071_vm12 = vcmp.eq.f32.partialorder %v2070_v13, 8.507059e+37  ;;  %v2040_v21 = vand.u32 2147483647, %v5548_v63  ;;  %v3400_v3 = vmul.f32 -1.442695, %v5375_v52 }
 0x2c7   : > { %v5637_v62 = vsel %vm2026_vm7, %v2028_v16, %v2024_v27  ;;  %v3594_v43 = vpop.eup %3593  ;;  %v2047_v50 = vmul.f32 %v5632_v54, %v5591_v33  ;;  %3595 = vrcp.f32 %v5634_v39  ;;  %v2043_v16 = vor.u32 1.1754944e-38, %v2042_v49 }
 0x2c8   : > { %2580 = vrot.lane.b32.xlu0 %v2526_v6, %s3729_s5  ;;  %v2528_v40 = vmul.f32 %v2465_v34, %v5637_v62  ;;  %v2065_v6 = vadd.f32 %v5570_v55, %v2064_v48  ;;  %3597 = vpow2.f32 %v3396_v35  ;;  %v2039_v48 = vsel %vm2038_vm14, %v5599_v45, %v2035_v12 }
 0x2c9   : > { %v2048_v30 = vsub.f32 1.0, %v2047_v50  ;;  %vm2041_vm15 = vcmp.eq.f32.partialorder %v2040_v21, 8.507059e+37  ;;  %vm2052_vm0 = vweird.f32 %v5632_v54  ;;  %vm2051_vm1 = vweird.f32 %v5591_v33 }
 0x2ca   : > { %v2069_v26 = vsel %vm2068_vm10, %v5570_v55, %v2065_v6  ;;  %v5671_v63 = vsel %vm2041_vm15, %v2043_v16, %v2039_v48  ;;  %v2057_v6 = vand.u32 2147483648, %v5591_v33  ;;  %v3403_v20 = vmul.f32 -1.442695, %v5399_v57  ;;  %vm2053_vm2 = vmor %vm2051_vm1, %vm2052_vm0 }
 0x2cb   : > { %2578 = vrot.lane.b32.xlu2 %v2525_v28, %s3729_s5  ;;  %v5651_v28 = vadd.f32 1.0, %v3594_v43  ;;  %v5660_v8 = vsel %vm2071_vm12, %v2073_v15, %v2069_v26  ;;  %v2049_v61 = vmul.f32 %v5632_v54, %v2048_v30  ;;  %v2055_v43 = vand.u32 2147483647, %v5591_v33 }
 0x2cc   : > { %v3398_v5 = vmul.f32 -1.442695, %v5310_v1  ;;  %v3401_v12 = vmul.f32 -1.442695, %v5331_v36  ;;  %v2058_v15 = vor.u32 1.1754944e-38, %v2057_v6  ;;  %vm2111_vm5 = vweird.f32 %v5634_v39 }
 0x2cd   : > { %v2463_v58 = vpop.permute.xlu1 %2462  ;;  %v5662_v27 = vpop.eup %3595  ;;  %3599 = vrcp.f32 %v5651_v28  ;;  %v2050_v35 = vadd.f32 %v5632_v54, %v2049_v61  ;;  %vm2056_vm3 = vcmp.eq.f32.partialorder %v2055_v43, 8.507059e+37  ;;  %v3399_v36 = vmul.f32 -1.442695, %v5336_v0 }
 0x2ce   : > { %v2527_v42 = vmul.f32 %v2463_v58, %v5627_v22  ;;  %v3598_v58 = vpop.eup %3597  ;;  %3601 = vpow2.f32 %v3400_v3  ;;  %v2107_v52 = vmul.f32 %v5662_v27, %v5634_v39  ;;  %v3406_v3 = vmul.f32 -1.442695, %v5467_v29 }
 0x2cf   : > { %v5673_v34 = vadd.f32 1.0, %v3598_v58  ;;  %v2054_v26 = vsel %vm2053_vm2, %v5632_v54, %v2050_v35  ;;  %vm2112_vm4 = vweird.f32 %v5662_v27  ;;  %v2117_v58 = vand.u32 2147483648, %v5634_v39 }
 0x2d0   : > { %2582 = vrot.lane.b32.xlu1 %v2527_v42, %s3729_s5  ;;  %v2108_v50 = vsub.f32 1.0, %v2107_v52  ;;  %v5692_v33 = vsel %vm2056_vm3, %v2058_v15, %v2054_v26  ;;  %v2115_v61 = vand.u32 2147483647, %v5634_v39  ;;  %v3402_v52 = vmul.f32 -1.442695, %v5357_v7  ;;  %vm2113_vm6 = vmor %vm2111_vm5, %vm2112_vm4 }
 0x2d1   : > { %3603 = vrcp.f32 %v5673_v34  ;;  %v2118_v6 = vor.u32 1.1754944e-38, %v2117_v58  ;;  %v3404_v26 = vmul.f32 -1.442695, %v5367_v56  ;;  %vm2081_vm9 = vweird.f32 %v5651_v28 }
 0x2d2   : > { %3605 = vpow2.f32 %v3403_v20  ;;  %v2109_v57 = vmul.f32 %v5662_v27, %v2108_v50  ;;  %vm2116_vm8 = vcmp.eq.f32.partialorder %v2115_v61, 8.507059e+37  ;;  %vm2096_vm13 = vweird.f32 %v5673_v34 }
 0x2d3   : > { %2584 = vrot.lane.b32.xlu2 %v2528_v40, %s3729_s5  ;;  %v5678_v40 = vpop.eup %3599  ;;  %3607 = vpow2.f32 %v3398_v5 }
 0x2d4   : > { %v3602_v13 = vpop.eup %3601  ;;  %v2077_v30 = vmul.f32 %v5678_v40, %v5651_v28  ;;  %3609 = vpow2.f32 %v3401_v12  ;;  %vm2082_vm7 = vweird.f32 %v5678_v40 }
 0x2d5   : > { %v2471_v11 = vpop.permute.xlu2 %2470  ;;  %vm2083_vm10 = vmor %vm2081_vm9, %vm2082_vm7 }
 0x2d6   : > { %v2531_v55 = vmul.f32 %v2471_v11, %v5660_v8  ;;  %v5694_v11 = vadd.f32 1.0, %v3602_v13  ;;  %v2078_v54 = vsub.f32 1.0, %v2077_v30  ;;  %v2085_v30 = vand.u32 2147483647, %v5651_v28 }
 0x2d7   : > { %v5697_v21 = vpop.eup %3603 }
 0x2d8   : > { %3611 = vrcp.f32 %v5694_v11  ;;  %v3606_v48 = vpop.eup %3605  ;;  %v2079_v16 = vmul.f32 %v5678_v40, %v2078_v54  ;;  %v2092_v0 = vmul.f32 %v5697_v21, %v5673_v34  ;;  %vm2086_vm11 = vcmp.eq.f32.partialorder %v2085_v30, 8.507059e+37 }
 0x2d9   : > { %v3608_v29 = vpop.eup %3607  ;;  %3613 = vpow2.f32 %v3399_v36  ;;  %vm2097_vm12 = vweird.f32 %v5697_v21  ;;  %vm2156_vm1 = vweird.f32 %v5694_v11 }
 0x2da   : > { %3615 = vpow2.f32 %v3406_v3  ;;  %v5716_v39 = vadd.f32 1.0, %v3608_v29  ;;  %v2080_v43 = vadd.f32 %v5678_v40, %v2079_v16  ;;  %v2093_v20 = vsub.f32 1.0, %v2092_v0  ;;  %vm2098_vm14 = vmor %vm2096_vm13, %vm2097_vm12 }
 0x2db   : > { %2590 = vrot.lane.b32.xlu2 %v2531_v55, %s3729_s5  ;;  %v2110_v55 = vadd.f32 %v5662_v27, %v2109_v57  ;;  %3617 = vpow2.f32 %v3402_v52  ;;  %v2102_v0 = vand.u32 2147483648, %v5673_v34  ;;  %v3405_v52 = vmul.f32 -1.442695, %v5405_v25 }
 0x2dc   : > { %v2094_v56 = vmul.f32 %v5697_v21, %v2093_v20  ;;  %vm2126_vm9 = vweird.f32 %v5716_v39 }
 0x2dd   : > { %v2467_v42 = vpop.permute.xlu0 %2466  ;;  %v2114_v35 = vsel %vm2113_vm6, %v5662_v27, %v2110_v55  ;;  %v2087_v27 = vand.u32 2147483648, %v5651_v28 }
 0x2de   : > { %v2529_v45 = vmul.f32 %v2467_v42, %v5671_v63  ;;  %v3610_v42 = vpop.eup %3609  ;;  %v5723_v5 = vsel %vm2116_vm8, %v2118_v6, %v2114_v35 }
 0x2df   : > { %v5719_v50 = vpop.eup %3611  ;;  %v5721_v7 = vadd.f32 1.0, %v3610_v42  ;;  %v2088_v28 = vor.u32 1.1754944e-38, %v2087_v27  ;;  %v2100_v42 = vand.u32 2147483647, %v5673_v34  ;;  %v2103_v27 = vor.u32 1.1754944e-38, %v2102_v0 }
 0x2e0   : > { %2586 = vrot.lane.b32.xlu0 %v2529_v45, %s3729_s5  ;;  %v5713_v45 = vadd.f32 1.0, %v3606_v48  ;;  %v3614_v15 = vpop.eup %3613  ;;  %v2095_v48 = vadd.f32 %v5697_v21, %v2094_v56  ;;  %vm2157_vm0 = vweird.f32 %v5719_v50 }
 0x2e1   : > { %v3616_v57 = vpop.eup %3615  ;;  %v5740_v54 = vadd.f32 1.0, %v3614_v15  ;;  %vm2101_vm15 = vcmp.eq.f32.partialorder %v2100_v42, 8.507059e+37  ;;  %vm2158_vm2 = vmor %vm2156_vm1, %vm2157_vm0  ;;  %vm2171_vm7 = vweird.f32 %v5721_v7 }
 0x2e2   : > { %3619 = vrcp.f32 %v5713_v45  ;;  %v3618_v36 = vpop.eup %3617  ;;  %v5742_v3 = vadd.f32 1.0, %v3616_v57  ;;  %v2099_v20 = vsel %vm2098_vm14, %v5697_v21, %v2095_v48  ;;  %vm2201_vm6 = vweird.f32 %v5713_v45 }
 0x2e3   : > { %3621 = vrcp.f32 %v5716_v39  ;;  %v5761_v6 = vadd.f32 1.0, %v3618_v36  ;;  %v5775_v30 = vsel %vm2101_vm15, %v2103_v27, %v2099_v20  ;;  %vm2141_vm1 = vweird.f32 %v5740_v54 }
 0x2e4   : > { %3623 = vrcp.f32 %v5721_v7 }
 0x2e5   : > { %v2469_v49 = vpop.permute.xlu1 %2468  ;;  %3625 = vpow2.f32 %v3404_v26 }
 0x2e6   : > { %v2530_v1 = vmul.f32 %v2469_v49, %v5692_v33  ;;  %v2084_v49 = vsel %vm2083_vm10, %v5678_v40, %v2080_v43  ;;  %3627 = vrcp.f32 %v5740_v54 }
 0x2e7   : > { %v5744_v55 = vsel %vm2086_vm11, %v2088_v28, %v2084_v49  ;;  %3629 = vrcp.f32 %v5742_v3  ;;  %v2162_v28 = vand.u32 2147483648, %v5694_v11 }
 0x2e8   : > { %2588 = vrot.lane.b32.xlu1 %v2530_v1, %s3729_s5  ;;  %v2152_v1 = vmul.f32 %v5719_v50, %v5694_v11  ;;  %v5749_v16 = vpop.eup %3619  ;;  %3631 = vpow2.f32 %v3405_v52 }
 0x2e9   : > { %v5752_v29 = vpop.eup %3621  ;;  %3633 = vrcp.f32 %v5761_v6  ;;  %v2163_v20 = vor.u32 1.1754944e-38, %v2162_v28  ;;  %vm2202_vm4 = vweird.f32 %v5749_v16  ;;  %v2207_v28 = vand.u32 2147483648, %v5713_v45 }
 0x2ea   : > { %v2153_v61 = vsub.f32 1.0, %v2152_v1  ;;  %v5759_v35 = vpop.eup %3623  ;;  %v2122_v26 = vmul.f32 %v5752_v29, %v5716_v39  ;;  %vm2127_vm5 = vweird.f32 %v5752_v29  ;;  %vm5823_vm8 = vmor %vm2201_vm6, %vm2202_vm4 }
 0x2eb   : > { %v3626_v43 = vpop.eup %3625  ;;  %v2167_v34 = vmul.f32 %v5759_v35, %v5721_v7  ;;  %vm2172_vm10 = vweird.f32 %v5759_v35  ;;  %vm5832_vm11 = vmor %vm2126_vm9, %vm2127_vm5 }
 0x2ec   : > { %v2154_v25 = vmul.f32 %v5719_v50, %v2153_v61  ;;  %v5777_v15 = vpop.eup %3627  ;;  %v2123_v36 = vsub.f32 1.0, %v2122_v26  ;;  %vm5860_vm0 = vmor %vm2171_vm7, %vm2172_vm10  ;;  %vm2186_vm10 = vweird.f32 %v5761_v6 }
 0x2ed   : > { %v2477_v13 = vpop.permute.xlu2 %2476  ;;  %v5782_v1 = vpop.eup %3629  ;;  %v2137_v42 = vmul.f32 %v5777_v15, %v5740_v54  ;;  %vm2142_vm15 = vweird.f32 %v5777_v15 }
 0x2ee   : > { %v2534_v12 = vmul.f32 %v2477_v13, %v5723_v5  ;;  %v2197_v13 = vmul.f32 %v5749_v16, %v5713_v45  ;;  %v2155_v49 = vadd.f32 %v5719_v50, %v2154_v25  ;;  %v3632_v48 = vpop.eup %3631  ;;  %v2242_v52 = vmul.f32 %v5782_v1, %v5742_v3 }
 0x2ef   : > { %vm2247_vm14 = vweird.f32 %v5782_v1 }
 0x2f0   : > { %2596 = vrot.lane.b32.xlu2 %v2534_v12, %s3729_s5  ;;  %v5773_v12 = vadd.f32 1.0, %v3626_v43  ;;  %v2198_v56 = vsub.f32 1.0, %v2197_v13  ;;  %v2159_v61 = vsel %vm2158_vm2, %v5719_v50, %v2155_v49  ;;  %v5795_v43 = vpop.eup %3633  ;;  %v5799_v13 = vadd.f32 1.0, %v3632_v48 }
 0x2f1   : > { %v2132_v48 = vand.u32 2147483648, %v5716_v39  ;;  %vm2246_vm2 = vweird.f32 %v5742_v3 }
 0x2f2   : > { %3635 = vrcp.f32 %v5773_v12  ;;  %v2199_v0 = vmul.f32 %v5749_v16, %v2198_v56  ;;  %v2182_v56 = vmul.f32 %v5795_v43, %v5761_v6  ;;  %vm2248_vm4 = vmor %vm2246_vm2, %vm2247_vm14 }
 0x2f3   : > { %3637 = vrcp.f32 %v5799_v13 }
 0x2f5   : > { %v2473_v58 = vpop.permute.xlu0 %2472 }
 0x2f6   : > { %v2532_v40 = vmul.f32 %v2473_v58, %v5744_v55  ;;  %v2160_v58 = vand.u32 2147483647, %v5694_v11  ;;  %v2124_v11 = vmul.f32 %v5752_v29, %v2123_v36 }
 0x2f8   : > { %2592 = vrot.lane.b32.xlu0 %v2532_v40, %s3729_s5  ;;  %v2168_v40 = vsub.f32 1.0, %v2167_v34  ;;  %vm2161_vm3 = vcmp.eq.f32.partialorder %v2160_v58, 8.507059e+37  ;;  %v2200_v34 = vadd.f32 %v5749_v16, %v2199_v0  ;;  %v5806_v49 = vpop.eup %3635  ;;  %v2125_v36 = vadd.f32 %v5752_v29, %v2124_v11 }
 0x2f9   : > { %v5801_v27 = vsel %vm2161_vm3, %v2163_v20, %v2159_v61  ;;  %v2205_v58 = vand.u32 2147483647, %v5713_v45  ;;  %v2177_v61 = vand.u32 2147483648, %v5721_v7  ;;  %v2183_v0 = vsub.f32 1.0, %v2182_v56  ;;  %vm5873_vm3 = vmor %vm2141_vm1, %vm2142_vm15 }
 0x2fa   : > { %v2169_v25 = vmul.f32 %v5759_v35, %v2168_v40  ;;  %6381 = vst [vmem:[#allocation3_spill] sm:$0xff] %v5801_v27  ;;  %v2130_v40 = vand.u32 2147483647, %v5716_v39  ;;  %v2204_v45 = vsel %vm5823_vm8, %v5749_v16, %v2200_v34  ;;  %v2129_v39 = vsel %vm5832_vm11, %v5752_v29, %v2125_v36  ;;  %v5854_v36 = vpop.eup %3637 }
 0x2fb   : > { %vm2206_vm12 = vcmp.eq.f32.partialorder %v2205_v58, 8.507059e+37  ;;  %v2133_v16 = vor.u32 1.1754944e-38, %v2132_v48  ;;  %vm2187_vm8 = vweird.f32 %v5795_v43  ;;  %vm2217_vm9 = vweird.f32 %v5806_v49 }
 0x2fc   : > { %v2170_v11 = vadd.f32 %v5759_v35, %v2169_v25  ;;  %vm2131_vm13 = vcmp.eq.f32.partialorder %v2130_v40, 8.507059e+37  ;;  %vm2188_vm11 = vmor %vm2186_vm10, %vm2187_vm8  ;;  %vm2231_vm1 = vweird.f32 %v5799_v13 }
 0x2fd   : > { %v2475_v21 = vpop.permute.xlu1 %2474 }
 0x2fe   : > { %v2533_v57 = vmul.f32 %v2475_v21, %v5775_v30  ;;  %v2243_v21 = vsub.f32 1.0, %v2242_v52  ;;  %v2250_v52 = vand.u32 2147483647, %v5742_v3 }
 0x300   : > { %2594 = vrot.lane.b32.xlu1 %v2533_v57, %s3729_s5  ;;  %v2138_v57 = vsub.f32 1.0, %v2137_v42  ;;  %v2244_v42 = vmul.f32 %v5782_v1, %v2243_v21  ;;  %v2252_v21 = vand.u32 2147483648, %v5742_v3  ;;  %vm2251_vm6 = vcmp.eq.f32.partialorder %v2250_v52, 8.507059e+37 }
 0x301   : > { %v2222_v52 = vand.u32 2147483648, %v5773_v12 }
 0x302   : > { %v2139_v20 = vmul.f32 %v5777_v15, %v2138_v57  ;;  %v5850_v57 = vsel %vm2131_vm13, %v2133_v16, %v2129_v39  ;;  %v2253_v16 = vor.u32 1.1754944e-38, %v2252_v21 }
 0x304   : > { %v2140_v56 = vadd.f32 %v5777_v15, %v2139_v20  ;;  %v2145_v20 = vand.u32 2147483647, %v5740_v54 }
 0x305   : > { %v2483_v50 = vpop.permute.xlu2 %2482 }
 0x306   : > { %v2537_v26 = vmul.f32 %v2483_v50, %v5801_v27  ;;  %v2208_v50 = vor.u32 1.1754944e-38, %v2207_v28  ;;  %v2245_v28 = vadd.f32 %v5782_v1, %v2244_v42  ;;  %v2144_v39 = vsel %vm5873_vm3, %v5777_v15, %v2140_v56 }
 0x307   : > { %vm2146_vm7 = vcmp.eq.f32.partialorder %v2145_v20, 8.507059e+37  ;;  %v2220_v42 = vand.u32 2147483647, %v5773_v12 }
 0x308   : > { %2602 = vrot.lane.b32.xlu2 %v2537_v26, %s3729_s5  ;;  %v2212_v26 = vmul.f32 %v5806_v49, %v5773_v12  ;;  %v5844_v34 = vsel %vm2206_vm12, %v2208_v50, %v2204_v45  ;;  %v2175_v45 = vand.u32 2147483647, %v5721_v7  ;;  %v2174_v50 = vsel %vm5860_vm0, %v5759_v35, %v2170_v11 }
 0x309   : > { %v2184_v7 = vmul.f32 %v5795_v43, %v2183_v0  ;;  %v2249_v3 = vsel %vm2248_vm4, %v5782_v1, %v2245_v28  ;;  %vm2216_vm12 = vweird.f32 %v5773_v12  ;;  %vm2221_vm15 = vcmp.eq.f32.partialorder %v2220_v42, 8.507059e+37 }
 0x30a   : > { %v2213_v48 = vsub.f32 1.0, %v2212_v26  ;;  %v2178_v26 = vor.u32 1.1754944e-38, %v2177_v61  ;;  %vm2176_vm5 = vcmp.eq.f32.partialorder %v2175_v45, 8.507059e+37  ;;  %v5895_v1 = vsel %vm2251_vm6, %v2253_v16, %v2249_v3  ;;  %vm2218_vm13 = vmor %vm2216_vm12, %vm2217_vm9 }
 0x30b   : > { %v2185_v28 = vadd.f32 %v5795_v43, %v2184_v7  ;;  %v2190_v45 = vand.u32 2147483647, %v5761_v6  ;;  %v2402_v3 = vmul.f32 %v5251_v38, %v5536_v2  ;;  %vm2232_vm0 = vweird.f32 %v5854_v36 }
 0x30c   : > { %v2214_v35 = vmul.f32 %v5806_v49, %v2213_v48  ;;  %v5892_v11 = vsel %vm2176_vm5, %v2178_v26, %v2174_v50  ;;  %vm2233_vm2 = vmor %vm2231_vm1, %vm2232_vm0  ;;  %vm2904_vm4 = vcmask 261120   ;;  %vm2929_vm5 = vcmask 523264  }
 0x30d   : > { %v2489_v27 = vpop.permute.xlu2 %2488  ;;  %v2479_v29 = vpop.permute.xlu0 %2478  ;;  %v2189_v20 = vsel %vm2188_vm11, %v5795_v43, %v2185_v28  ;;  %vm2191_vm14 = vcmp.eq.f32.partialorder %v2190_v45, 8.507059e+37 }
 0x30e   : > { %v2540_v25 = vmul.f32 %v2489_v27, %v5844_v34  ;;  %v2535_v40 = vmul.f32 %v2479_v29, %v5850_v57  ;;  %v2147_v27 = vand.u32 2147483648, %v5740_v54  ;;  %v2227_v54 = vmul.f32 %v5854_v36, %v5799_v13 }
 0x30f   : > { %v2215_v48 = vadd.f32 %v5806_v49, %v2214_v35 }
 0x310   : > { %2608 = vrot.lane.b32.xlu2 %v2540_v25, %s3729_s5  ;;  %2598 = vrot.lane.b32.xlu0 %v2535_v40, %s3729_s5  ;;  %v2148_v25 = vor.u32 1.1754944e-38, %v2147_v27  ;;  %v2228_v58 = vsub.f32 1.0, %v2227_v54  ;;  %v2192_v40 = vand.u32 2147483648, %v5761_v6 }
 0x311   : > { %v2219_v7 = vsel %vm2218_vm13, %v5806_v49, %v2215_v48 }
 0x312   : > { %v5897_v29 = vsel %vm2146_vm7, %v2148_v25, %v2144_v39  ;;  %v2229_v6 = vmul.f32 %v5854_v36, %v2228_v58  ;;  %v2193_v50 = vor.u32 1.1754944e-38, %v2192_v40  ;;  %v2223_v39 = vor.u32 1.1754944e-38, %v2222_v52 }
 0x314   : > { %v5921_v54 = vsel %vm2191_vm14, %v2193_v50, %v2189_v20  ;;  %v5927_v25 = vsel %vm2221_vm15, %v2223_v39, %v2219_v7  ;;  %v2230_v49 = vadd.f32 %v5854_v36, %v2229_v6 }
 0x315   : > { %v2495_v0 = vpop.permute.xlu2 %2494  ;;  %v2481_v15 = vpop.permute.xlu1 %2480 }
 0x316   : > { %v2543_v61 = vmul.f32 %v2495_v0, %v5895_v1  ;;  %v2536_v21 = vmul.f32 %v2481_v15, %v5897_v29  ;;  %v2485_v56 = vpop.permute.xlu0 %2484  ;;  %v2237_v0 = vand.u32 2147483648, %v5799_v13  ;;  %v2235_v15 = vand.u32 2147483647, %v5799_v13 }
 0x317   : > { %v2538_v27 = vmul.f32 %v2485_v56, %v5892_v11  ;;  %v2234_v28 = vsel %vm2233_vm2, %v5854_v36, %v2230_v49  ;;  %v2400_v56 = vmul.f32 %v5234_v47, %v5456_v37  ;;  %v2401_v47 = vmul.f32 %v5240_v24, %v5512_v9 }
 0x318   : > { %2614 = vrot.lane.b32.xlu2 %v2543_v61, %s3729_s5  ;;  %2600 = vrot.lane.b32.xlu1 %v2536_v21, %s3729_s5  ;;  %v2238_v61 = vor.u32 1.1754944e-38, %v2237_v0  ;;  %v2405_v21 = vmul.f32 %v5262_v31, %v5601_v17  ;;  %vm2236_vm3 = vcmp.eq.f32.partialorder %v2235_v15, 8.507059e+37  ;;  %v2408_v31 = vmul.f32 %v5276_v14, %v5637_v62 }
 0x319   : > { %2604 = vrot.lane.b32.xlu0 %v2538_v27, %s3729_s5  ;;  %v2403_v36 = vmul.f32 %v5245_v19, %v5523_v59  ;;  %v2404_v24 = vmul.f32 %v5253_v41, %v5559_v51  ;;  %v2411_v19 = vmul.f32 %v5292_v46, %v5660_v8  ;;  %v2406_v41 = vmul.f32 %v5258_v44, %v5589_v18 }
 0x31a   : > { %v5942_v40 = vsel %vm2236_vm3, %v2238_v61, %v2234_v28 }
 0x31d   : > { %v2573_v26 = vpop.permute.xlu2 %2572  ;;  %v2487_v16 = vpop.permute.xlu1 %2486 }
 0x31e   : > { %v5924_v12 = vadd.f32 %v2573_v26, %v2402_v3  ;;  %v2539_v43 = vmul.f32 %v2487_v16, %v5921_v54  ;;  %v2491_v35 = vpop.permute.xlu0 %2490 }
 0x31f   : > { %v2541_v38 = vmul.f32 %v2491_v35, %v5927_v25 }
 0x320   : > { %3639 = vtanh.f32 %v5924_v12  ;;  %2606 = vrot.lane.b32.xlu1 %v2539_v43, %s3729_s5 }
 0x321   : > { %2610 = vrot.lane.b32.xlu0 %v2541_v38, %s3729_s5 }
 0x325   : > { %v2579_v58 = vpop.permute.xlu2 %2578  ;;  %v2493_v27 = vpop.permute.xlu1 %2492 }
 0x326   : > { %v3640_v48 = vpop.eup %3639  ;;  %v5944_v45 = vadd.f32 %v2579_v58, %v2405_v21  ;;  %v2542_v13 = vmul.f32 %v2493_v27, %v5942_v40  ;;  %v2569_v52 = vpop.permute.xlu0 %2568 }
 0x327   : > { %v5947_v42 = vadd.f32 %v2569_v52, %v2400_v56  ;;  %2716 = vrot.lane.b32.xlu2 %v3640_v48, %s3729_s5  ;;  %v2407_v56 = vmul.f32 %v5264_v10, %v5627_v22  ;;  %v2409_v10 = vmul.f32 %v5271_v4, %v5671_v63 }
 0x328   : > { %3641 = vtanh.f32 %v5944_v45  ;;  %2612 = vrot.lane.b32.xlu1 %v2542_v13, %s3729_s5  ;;  %v2414_v13 = vmul.f32 %v5319_v60, %v5723_v5  ;;  %v2410_v60 = vmul.f32 %v5282_v53, %v5692_v33 }
 0x329   : > { %3643 = vtanh.f32 %v5947_v42 }
 0x32d   : > { %v2585_v20 = vpop.permute.xlu2 %2584  ;;  %v2571_v6 = vpop.permute.xlu1 %2570 }
 0x32e   : > { %v3642_v50 = vpop.eup %3641  ;;  %v5959_v7 = vadd.f32 %v2585_v20, %v2408_v31  ;;  %v5961_v3 = vadd.f32 %v2571_v6, %v2401_v47  ;;  %v2575_v39 = vpop.permute.xlu0 %2574 }
 0x32f   : > { %v3644_v26 = vpop.eup %3643  ;;  %v5963_v16 = vadd.f32 %v2575_v39, %v2403_v36  ;;  %2722 = vrot.lane.b32.xlu2 %v3642_v50, %s3729_s5 }
 0x330   : > { %3645 = vtanh.f32 %v5959_v7  ;;  %2712 = vrot.lane.b32.xlu0 %v3644_v26, %s3729_s5 }
 0x331   : > { %3647 = vtanh.f32 %v5961_v3 }
 0x332   : > { %3649 = vtanh.f32 %v5963_v16 }
 0x335   : > { %v2591_v14 = vpop.permute.xlu2 %2590  ;;  %v2577_v43 = vpop.permute.xlu1 %2576 }
 0x336   : > { %v3646_v35 = vpop.eup %3645  ;;  %v5974_v49 = vadd.f32 %v2591_v14, %v2411_v19  ;;  %v5976_v38 = vadd.f32 %v2577_v43, %v2404_v24  ;;  %v2420_v24 = vmul.f32 %v5414_v23, %v5844_v34  ;;  %v2412_v19 = vmul.f32 %v5286_v32, %v5744_v55 }
 0x337   : > { %v3648_v0 = vpop.eup %3647  ;;  %2728 = vrot.lane.b32.xlu2 %v3646_v35, %s3729_s5 }
 0x338   : > { %v3650_v15 = vpop.eup %3649  ;;  %3651 = vtanh.f32 %v5974_v49  ;;  %2714 = vrot.lane.b32.xlu1 %v3648_v0, %s3729_s5  ;;  %v6390_v0 = vld [vmem:[#allocation12_spill] sm:$0xff] }
 0x339   : > { %3653 = vtanh.f32 %v5976_v38  ;;  %2718 = vrot.lane.b32.xlu0 %v3650_v15, %s3729_s5  ;;  %v2413_v15 = vmul.f32 %v6390_v0, %v5775_v30 }
 0x33a   : > { %v2581_v46 = vpop.permute.xlu0 %2580 }
 0x33b   : > { %v5985_v28 = vadd.f32 %v2581_v46, %v2406_v41 }
 0x33d   : > { %3655 = vtanh.f32 %v5985_v28 }
 0x33e   : > { %v3652_v61 = vpop.eup %3651 }
 0x33f   : > { %v3654_v21 = vpop.eup %3653  ;;  %2734 = vrot.lane.b32.xlu2 %v3652_v61, %s3729_s5 }
 0x340   : > { %2720 = vrot.lane.b32.xlu1 %v3654_v21, %s3729_s5 }
 0x342   : > { %v2583_v58 = vpop.permute.xlu1 %2582 }
 0x343   : > { %v3656_v44 = vpop.eup %3655  ;;  %v5992_v27 = vadd.f32 %v2583_v58, %v2407_v56  ;;  %v6391_v56 = vld [vmem:[#allocation3_spill] sm:$0xff]  ;;  %v6392_v58 = vld [vmem:[#allocation14_spill] sm:$0xff] }
 0x344   : > { %2724 = vrot.lane.b32.xlu0 %v3656_v44, %s3729_s5  ;;  %v2417_v44 = vmul.f32 %v6392_v58, %v6391_v56  ;;  %v6397_v58 = vld [vmem:[#allocation5_spill] sm:$0xff] }
 0x345   : > { %3657 = vtanh.f32 %v5992_v27 }
 0x34a   : > { %v2597_v52 = vpop.permute.xlu2 %2596 }
 0x34b   : > { %v3658_v48 = vpop.eup %3657  ;;  %v5999_v47 = vadd.f32 %v2597_v52, %v2414_v13 }
 0x34c   : > { %2726 = vrot.lane.b32.xlu1 %v3658_v48, %s3729_s5 }
 0x34d   : > { %3659 = vtanh.f32 %v5999_v47 }
 0x352   : > { %v2587_v31 = vpop.permute.xlu0 %2586 }
 0x353   : > { %v6004_v36 = vadd.f32 %v2587_v31, %v2409_v10  ;;  %v3660_v20 = vpop.eup %3659  ;;  %v6393_v31 = vld [vmem:[#allocation18_spill] sm:$0xff] }
 0x354   : > { %2740 = vrot.lane.b32.xlu2 %v3660_v20, %s3729_s5  ;;  %v2423_v20 = vmul.f32 %v6393_v31, %v5895_v1 }
 0x355   : > { %3661 = vtanh.f32 %v6004_v36 }
 0x35a   : > { %v2589_v6 = vpop.permute.xlu1 %2588 }
 0x35b   : > { %v3662_v50 = vpop.eup %3661  ;;  %v6010_v39 = vadd.f32 %v2589_v6, %v2410_v60  ;;  %v6394_v6 = vld [vmem:[#allocation2_spill] sm:$0xff] }
 0x35c   : > { %2730 = vrot.lane.b32.xlu0 %v3662_v50, %s3729_s5  ;;  %v2418_v50 = vmul.f32 %v6394_v6, %v5892_v11 }
 0x35d   : > { %3663 = vtanh.f32 %v6010_v39 }
 0x362   : > { %v2603_v4 = vpop.permute.xlu2 %2602 }
 0x363   : > { %v3664_v26 = vpop.eup %3663  ;;  %v6035_v48 = vadd.f32 %v2603_v4, %v2417_v44  ;;  %v2416_v44 = vmul.f32 %v6397_v58, %v5897_v29 }
 0x364   : > { %2732 = vrot.lane.b32.xlu1 %v3664_v26, %s3729_s5 }
 0x36a   : > { %v2609_v14 = vpop.permute.xlu2 %2608  ;;  %v2593_v53 = vpop.permute.xlu0 %2592 }
 0x36b   : > { %v6019_v43 = vadd.f32 %v2609_v14, %v2420_v24  ;;  %v6021_v35 = vadd.f32 %v2593_v53, %v2412_v19  ;;  %v6396_v53 = vld [vmem:[#allocation24_spill] sm:$0xff] }
 0x36c   : > { %v2419_v0 = vmul.f32 %v6396_v53, %v5921_v54 }
 0x36d   : > { %3665 = vtanh.f32 %v6019_v43 }
 0x36e   : > { %3667 = vtanh.f32 %v6021_v35 }
 0x372   : > { %v2595_v41 = vpop.permute.xlu1 %2594  ;;  %v2615_v32 = vpop.permute.xlu2 %2614 }
 0x373   : > { %v3666_v46 = vpop.eup %3665  ;;  %v6027_v61 = vadd.f32 %v2595_v41, %v2413_v15  ;;  %v6042_v60 = vadd.f32 %v2615_v32, %v2423_v20 }
 0x374   : > { %v3668_v23 = vpop.eup %3667  ;;  %2752 = vrot.lane.b32.xlu2 %v3666_v46, %s3729_s5 }
 0x375   : > { %2736 = vrot.lane.b32.xlu0 %v3668_v23, %s3729_s5  ;;  %3669 = vtanh.f32 %v6027_v61 }
 0x376   : > { %3671 = vtanh.f32 %v6035_v48 }
 0x377   : > { %3673 = vtanh.f32 %v6042_v60 }
 0x37b   : > { %v3670_v21 = vpop.eup %3669 }
 0x37c   : > { %2738 = vrot.lane.b32.xlu1 %v3670_v21, %s3729_s5  ;;  %v3672_v4 = vpop.eup %3671 }
 0x37d   : > { %v3674_v46 = vpop.eup %3673 }
 0x381   : > { %v2717_v13 = vpop.permute.xlu2 %2716 }
 0x382   : > { %v2786_v52 = vmul.f32 %v2717_v13, %v5536_v2  ;;  %v2599_v10 = vpop.permute.xlu0 %2598  ;;  %v6395_v2 = vld [vmem:[#allocation13_spill] sm:$0xff] }
 0x383   : > { %v2415_v14 = vmul.f32 %v6395_v2, %v5850_v57 }
 0x384   : > { %2836 = vrot.lane.b32.xlu2 %v2786_v52, %s3730_s27  ;;  %v6398_v52 = vld [vmem:[#allocation15_spill] sm:$0xff] }
 0x385   : > { %v6055_v15 = vadd.f32 %v2599_v10, %v2415_v14  ;;  %v2421_v10 = vmul.f32 %v6398_v52, %v5927_v25 }
 0x389   : > { %v2723_v23 = vpop.permute.xlu2 %2722 }
 0x38a   : > { %v2601_v26 = vpop.permute.xlu1 %2600  ;;  %v2789_v20 = vmul.f32 %v2723_v23, %v5601_v17 }
 0x38b   : > { %v2605_v24 = vpop.permute.xlu0 %2604  ;;  %v6067_v31 = vadd.f32 %v2601_v26, %v2416_v44  ;;  %v6399_v26 = vld [vmem:[#allocation17_spill] sm:$0xff] }
 0x38c   : > { %v6046_v19 = vadd.f32 %v2605_v24, %v2418_v50  ;;  %2746 = vrot.lane.b32.xlu2 %v3672_v4, %s3729_s5  ;;  %v2422_v14 = vmul.f32 %v6399_v26, %v5942_v40 }
 0x38e   : > { %3675 = vtanh.f32 %v6046_v19 }
 0x391   : > { %v2729_v24 = vpop.permute.xlu2 %2728 }
 0x392   : > { %v2607_v41 = vpop.permute.xlu1 %2606  ;;  %v2792_v53 = vmul.f32 %v2729_v24, %v5637_v62 }
 0x393   : > { %v6057_v32 = vadd.f32 %v2607_v41, %v2419_v0  ;;  %v2611_v13 = vpop.permute.xlu0 %2610 }
 0x394   : > { %v3676_v21 = vpop.eup %3675  ;;  %2758 = vrot.lane.b32.xlu2 %v3674_v46, %s3729_s5  ;;  %v6070_v6 = vadd.f32 %v2611_v13, %v2421_v10 }
 0x395   : > { %3677 = vtanh.f32 %v6057_v32  ;;  %2748 = vrot.lane.b32.xlu0 %v3676_v21, %s3729_s5 }
 0x396   : > { %3679 = vtanh.f32 %v6055_v15 }
 0x397   : > { %3681 = vtanh.f32 %v6067_v31 }
 0x398   : > { %3683 = vtanh.f32 %v6070_v6 }
 0x399   : > { %v2735_v23 = vpop.permute.xlu2 %2734 }
 0x39a   : > { %v2613_v2 = vpop.permute.xlu1 %2612  ;;  %v2795_v21 = vmul.f32 %v2735_v23, %v5660_v8 }
 0x39b   : > { %v3678_v50 = vpop.eup %3677  ;;  %v6079_v17 = vadd.f32 %v2613_v2, %v2422_v14 }
 0x39c   : > { %v3680_v4 = vpop.eup %3679  ;;  %2842 = vrot.lane.b32.xlu2 %v2789_v20, %s3730_s27  ;;  %2750 = vrot.lane.b32.xlu1 %v3678_v50, %s3729_s5 }
 0x39d   : > { %2742 = vrot.lane.b32.xlu0 %v3680_v4, %s3729_s5  ;;  %v3682_v0 = vpop.eup %3681  ;;  %3685 = vtanh.f32 %v6079_v17 }
 0x39e   : > { %v3684_v41 = vpop.eup %3683 }
 0x3a2   : > { %v2713_v46 = vpop.permute.xlu0 %2712 }
 0x3a3   : > { %v3686_v58 = vpop.eup %3685  ;;  %v2784_v44 = vmul.f32 %v2713_v46, %v5456_v37 }
 0x3a4   : > { %2848 = vrot.lane.b32.xlu2 %v2792_v53, %s3730_s27  ;;  %2744 = vrot.lane.b32.xlu1 %v3682_v0, %s3729_s5 }
 0x3a5   : > { %2754 = vrot.lane.b32.xlu0 %v3684_v41, %s3729_s5 }
 0x3aa   : > { %v2715_v62 = vpop.permute.xlu1 %2714 }
 0x3ab   : > { %v2719_v13 = vpop.permute.xlu0 %2718  ;;  %v2785_v10 = vmul.f32 %v2715_v62, %v5512_v9 }
 0x3ac   : > { %2854 = vrot.lane.b32.xlu2 %v2795_v21, %s3730_s27  ;;  %2756 = vrot.lane.b32.xlu1 %v3686_v58, %s3729_s5  ;;  %v2787_v50 = vmul.f32 %v2719_v13, %v5523_v59 }
 0x3ad   : > { %2832 = vrot.lane.b32.xlu0 %v2784_v44, %s3730_s27 }
 0x3ae   : > { %v2741_v52 = vpop.permute.xlu2 %2740 }
 0x3af   : > { %v2798_v20 = vmul.f32 %v2741_v52, %v5723_v5 }
 0x3b2   : > { %v2721_v37 = vpop.permute.xlu1 %2720 }
 0x3b3   : > { %v2788_v4 = vmul.f32 %v2721_v37, %v5559_v51 }
 0x3b4   : > { %2860 = vrot.lane.b32.xlu2 %v2798_v20, %s3730_s27  ;;  %2834 = vrot.lane.b32.xlu1 %v2785_v10, %s3730_s27 }
 0x3b5   : > { %2838 = vrot.lane.b32.xlu0 %v2787_v50, %s3730_s27 }
 0x3b6   : > { %v2725_v8 = vpop.permute.xlu0 %2724 }
 0x3b7   : > { %v2790_v24 = vmul.f32 %v2725_v8, %v5589_v18 }
 0x3bc   : > { %2840 = vrot.lane.b32.xlu1 %v2788_v4, %s3730_s27 }
 0x3bd   : > { %2844 = vrot.lane.b32.xlu0 %v2790_v24, %s3730_s27 }
 0x3be   : > { %v2727_v9 = vpop.permute.xlu1 %2726 }
 0x3bf   : > { %v2791_v59 = vmul.f32 %v2727_v9, %v5627_v22 }
 0x3c4   : > { %2846 = vrot.lane.b32.xlu1 %v2791_v59, %s3730_s27 }
 0x3ce   : > { %v2753_v5 = vpop.permute.xlu2 %2752  ;;  %v2731_v2 = vpop.permute.xlu0 %2730 }
 0x3cf   : > { %v2804_v26 = vmul.f32 %v2753_v5, %v5844_v34  ;;  %v2793_v14 = vmul.f32 %v2731_v2, %v5671_v63 }
 0x3d1   : > { %2872 = vrot.lane.b32.xlu2 %v2804_v26, %s3730_s27  ;;  %2850 = vrot.lane.b32.xlu0 %v2793_v14, %s3730_s27 }
 0x3d6   : > { %v2733_v51 = vpop.permute.xlu1 %2732 }
 0x3d7   : > { %v2794_v18 = vmul.f32 %v2733_v51, %v5692_v33 }
 0x3d9   : > { %2852 = vrot.lane.b32.xlu1 %v2794_v18, %s3730_s27 }
 0x3de   : > { %v2837_v22 = vpop.permute.xlu2 %2836 }
 0x3df   : > { %v2907_v63 = vsel %vm2904_vm4, %v2837_v22, %v5924_v12 }
 0x3e0   : > { %2932 = vst.msk [vmem:[%s6114_s10 + $0x10] sm:$0xff] %vm2929_vm5, %v2907_v63 }
 0x3e6   : > { %v2747_v34 = vpop.permute.xlu2 %2746 }
 0x3e7   : > { %v2801_v33 = vmul.f32 %v2747_v34, %v6391_v56  ;;  %v2737_v53 = vpop.permute.xlu0 %2736 }
 0x3e8   : > { %v2796_v0 = vmul.f32 %v2737_v53, %v5744_v55 }
 0x3e9   : > { %2866 = vrot.lane.b32.xlu2 %v2801_v33, %s3730_s27 }
 0x3ea   : > { %2856 = vrot.lane.b32.xlu0 %v2796_v0, %s3730_s27 }
 0x3ee   : > { %v2759_v41 = vpop.permute.xlu2 %2758  ;;  %v2739_v23 = vpop.permute.xlu1 %2738 }
 0x3ef   : > { %v2807_v46 = vmul.f32 %v2759_v41, %v5895_v1  ;;  %v2797_v12 = vmul.f32 %v2739_v23, %v5775_v30 }
 0x3f1   : > { %2878 = vrot.lane.b32.xlu2 %v2807_v46, %s3730_s27  ;;  %2858 = vrot.lane.b32.xlu1 %v2797_v12, %s3730_s27 }
 0x3f6   : > { %v2843_v56 = vpop.permute.xlu2 %2842 }
 0x3f7   : > { %v2910_v21 = vsel %vm2904_vm4, %v2843_v56, %v5944_v45 }
 0x3f8   : > { %2935 = vst.msk [vmem:[%s6114_s10 + $0x28] sm:$0xff] %vm2929_vm5, %v2910_v21 }
 0x3fe   : > { %v2849_v55 = vpop.permute.xlu2 %2848 }
 0x3ff   : > { %v2913_v58 = vsel %vm2904_vm4, %v2849_v55, %v5959_v7 }
 0x400   : > { %2938 = vst.msk [vmem:[%s6114_s10 + $0x40] sm:$0xff] %vm2929_vm5, %v2913_v58 }
 0x406   : > { %v2855_v1 = vpop.permute.xlu2 %2854 }
 0x407   : > { %v2916_v30 = vsel %vm2904_vm4, %v2855_v1, %v5974_v49  ;;  %v2749_v44 = vpop.permute.xlu0 %2748 }
 0x408   : > { %2941 = vst.msk [vmem:[%s6114_s10 + $0x58] sm:$0xff] %vm2929_vm5, %v2916_v30  ;;  %v2802_v62 = vmul.f32 %v2749_v44, %v5892_v11 }
 0x40a   : > { %2868 = vrot.lane.b32.xlu0 %v2802_v62, %s3730_s27 }
 0x40e   : > { %v2861_v45 = vpop.permute.xlu2 %2860  ;;  %v2751_v13 = vpop.permute.xlu1 %2750 }
 0x40f   : > { %v2919_v52 = vsel %vm2904_vm4, %v2861_v45, %v5999_v47  ;;  %v2803_v7 = vmul.f32 %v2751_v13, %v5921_v54  ;;  %v2743_v10 = vpop.permute.xlu0 %2742 }
 0x410   : > { %2944 = vst.msk [vmem:[%s6114_s10 + $0x70] sm:$0xff] %vm2929_vm5, %v2919_v52  ;;  %v2799_v49 = vmul.f32 %v2743_v10, %v5850_v57 }
 0x411   : > { %2870 = vrot.lane.b32.xlu1 %v2803_v7, %s3730_s27 }
 0x412   : > { %2862 = vrot.lane.b32.xlu0 %v2799_v49, %s3730_s27 }
 0x416   : > { %v2745_v11 = vpop.permute.xlu1 %2744 }
 0x417   : > { %v2800_v20 = vmul.f32 %v2745_v11, %v5897_v29  ;;  %v2755_v50 = vpop.permute.xlu0 %2754 }
 0x418   : > { %v2805_v47 = vmul.f32 %v2755_v50, %v5927_v25 }
 0x419   : > { %2864 = vrot.lane.b32.xlu1 %v2800_v20, %s3730_s27 }
 0x41a   : > { %2874 = vrot.lane.b32.xlu0 %v2805_v47, %s3730_s27 }
 0x41e   : > { %v2757_v54 = vpop.permute.xlu1 %2756 }
 0x41f   : > { %v2806_v57 = vmul.f32 %v2757_v54, %v5942_v40  ;;  %v2833_v37 = vpop.permute.xlu0 %2832 }
 0x420   : > { %v2905_v8 = vsel %vm2904_vm4, %v2833_v37, %v5947_v42 }
 0x421   : > { %2930 = vst.msk [vmem:[%s6114_s10] sm:$0xff] %vm2929_vm5, %v2905_v8  ;;  %2876 = vrot.lane.b32.xlu1 %v2806_v57, %s3730_s27 }
 0x426   : > { %v2835_v29 = vpop.permute.xlu1 %2834 }
 0x427   : > { %v2906_v25 = vsel %vm2904_vm4, %v2835_v29, %v5961_v3  ;;  %v2839_v4 = vpop.permute.xlu0 %2838 }
 0x428   : > { %2931 = vst.msk [vmem:[%s6114_s10 + $0x8] sm:$0xff] %vm2929_vm5, %v2906_v25  ;;  %v2908_v40 = vsel %vm2904_vm4, %v2839_v4, %v5963_v16 }
 0x429   : > { %2933 = vst.msk [vmem:[%s6114_s10 + $0x18] sm:$0xff] %vm2929_vm5, %v2908_v40 }
 0x42b   : > { %v2873_v24 = vpop.permute.xlu2 %2872 }
 0x42c   : > { %v2925_v42 = vsel %vm2904_vm4, %v2873_v24, %v6019_v43 }
 0x42d   : > { %2950 = vst.msk [vmem:[%s6114_s10 + $0xa0] sm:$0xff] %vm2929_vm5, %v2925_v42 }
 0x42e   : > { %v2841_v9 = vpop.permute.xlu1 %2840 }
 0x42f   : > { %v2909_v3 = vsel %vm2904_vm4, %v2841_v9, %v5976_v38  ;;  %v2845_v59 = vpop.permute.xlu0 %2844 }
 0x430   : > { %2934 = vst.msk [vmem:[%s6114_s10 + $0x20] sm:$0xff] %vm2929_vm5, %v2909_v3  ;;  %v2911_v16 = vsel %vm2904_vm4, %v2845_v59, %v5985_v28 }
 0x431   : > { %2936 = vst.msk [vmem:[%s6114_s10 + $0x30] sm:$0xff] %vm2929_vm5, %v2911_v16 }
 0x436   : > { %v2847_v5 = vpop.permute.xlu1 %2846 }
 0x437   : > { %v2912_v43 = vsel %vm2904_vm4, %v2847_v5, %v5992_v27 }
 0x438   : > { %2937 = vst.msk [vmem:[%s6114_s10 + $0x38] sm:$0xff] %vm2929_vm5, %v2912_v43 }
 0x443   : > { %v2867_v2 = vpop.permute.xlu2 %2866  ;;  %v2851_v26 = vpop.permute.xlu0 %2850 }
 0x444   : > { %v2922_v38 = vsel %vm2904_vm4, %v2867_v2, %v6035_v48  ;;  %v2914_v14 = vsel %vm2904_vm4, %v2851_v26, %v6004_v36 }
 0x445   : > { %2947 = vst.msk [vmem:[%s6114_s10 + $0x88] sm:$0xff] %vm2929_vm5, %v2922_v38 }
 0x446   : > { %2939 = vst.msk [vmem:[%s6114_s10 + $0x48] sm:$0xff] %vm2929_vm5, %v2914_v14 }
 0x44b   : > { %v2879_v28 = vpop.permute.xlu2 %2878  ;;  %v2853_v51 = vpop.permute.xlu1 %2852 }
 0x44c   : > { %v2928_v27 = vsel %vm2904_vm4, %v2879_v28, %v6042_v60  ;;  %v2915_v18 = vsel %vm2904_vm4, %v2853_v51, %v6010_v39 }
 0x44d   : > { %2953 = vst.msk [vmem:[%s6114_s10 + $0xb8] sm:$0xff] %vm2929_vm5, %v2928_v27 }
 0x44e   : > { %2940 = vst.msk [vmem:[%s6114_s10 + $0x50] sm:$0xff] %vm2929_vm5, %v2915_v18 }
 0x45c   : > { %v2857_v36 = vpop.permute.xlu0 %2856 }
 0x45d   : > { %v2917_v48 = vsel %vm2904_vm4, %v2857_v36, %v6021_v35 }
 0x45e   : > { %2942 = vst.msk [vmem:[%s6114_s10 + $0x60] sm:$0xff] %vm2929_vm5, %v2917_v48 }
 0x463   : > { %v2859_v22 = vpop.permute.xlu1 %2858 }
 0x464   : > { %v2918_v60 = vsel %vm2904_vm4, %v2859_v22, %v6027_v61 }
 0x465   : > { %2943 = vst.msk [vmem:[%s6114_s10 + $0x68] sm:$0xff] %vm2929_vm5, %v2918_v60 }
 0x47c   : > { %v2869_v39 = vpop.permute.xlu0 %2868 }
 0x47d   : > { %v2923_v63 = vsel %vm2904_vm4, %v2869_v39, %v6046_v19 }
 0x47e   : > { %2948 = vst.msk [vmem:[%s6114_s10 + $0x90] sm:$0xff] %vm2929_vm5, %v2923_v63 }
 0x483   : > { %v2871_v34 = vpop.permute.xlu1 %2870 }
 0x484   : > { %v2924_v35 = vsel %vm2904_vm4, %v2871_v34, %v6057_v32  ;;  %v2863_v33 = vpop.permute.xlu0 %2862 }
 0x485   : > { %2949 = vst.msk [vmem:[%s6114_s10 + $0x98] sm:$0xff] %vm2929_vm5, %v2924_v35  ;;  %v2920_v61 = vsel %vm2904_vm4, %v2863_v33, %v6055_v15 }
 0x486   : > { %2945 = vst.msk [vmem:[%s6114_s10 + $0x78] sm:$0xff] %vm2929_vm5, %v2920_v61 }
 0x48b   : > { %v2865_v53 = vpop.permute.xlu1 %2864 }
 0x48c   : > { %v2921_v0 = vsel %vm2904_vm4, %v2865_v53, %v6067_v31  ;;  %v2875_v19 = vpop.permute.xlu0 %2874 }
 0x48d   : > { %2946 = vst.msk [vmem:[%s6114_s10 + $0x80] sm:$0xff] %vm2929_vm5, %v2921_v0  ;;  %v2926_v41 = vsel %vm2904_vm4, %v2875_v19, %v6070_v6 }
 0x48e   : > { %2951 = vst.msk [vmem:[%s6114_s10 + $0xa8] sm:$0xff] %vm2929_vm5, %v2926_v41 }
 0x493   : > { %v2877_v32 = vpop.permute.xlu1 %2876 }
 0x494   : > { %v2927_v46 = vsel %vm2904_vm4, %v2877_v32, %v6079_v17 }
 0x495   : > { %2952 = vst.msk [vmem:[%s6114_s10 + $0xb0] sm:$0xff] %vm2929_vm5, %v2927_v46 }
 0x496 PF: > { %s14_s19 = sadd.s32 1, %s3725_s19   ;;  %s6400_s15 = smov %s3717_s17 }
 0x497   : > { %p11_p7 = scmp.ge.s32.totalorder %s14_s19, 6   ;;  %s6401_s16 = smov %s3721_s18 }
 0x498   : > { %s6402_s17 = smov %s6405_s20  ;;  %s6403_s18 = smov %s6409_s21 }
 0x499   :  { %13 = sbr.rel (!%p11_p7) target bundleno = 3 (0x3), region = 80 }

</bundles_post_ra>
